<compile_context>
chip_gen: v7x
topology: tpu7x:2x2x1
jax: 0.10.0
libtpu: 0.0.40
codegen_flags: <defaults>
</compile_context>

<pallas_src>
import functools
import math

import jax
import jax.numpy as jnp
import numpy as np
from jax.experimental import pallas as pl
from jax.experimental.pallas import tpu as pltpu

SQRT2 = math.sqrt(2.0)
NEG_SLOPE = 0.2
LANE = 128
SUBLANE = 8


def _round_up(x, m):
    return (x + m - 1) // m * m


# --------------------------------------------------------------------------
# Pallas kernels
# --------------------------------------------------------------------------

def _conv_kernel(x_ref, w_ref, b_ref, *rest, offsets, res_offsets,
                 cin_pad, res_cin_pad, nout_pad, activate, fuse_res):
    """Fused conv (+bias +FusedLeakyReLU [+fused skip-conv residual merge]).

    x_ref : (1, P, cin_pad, Lp)    bf16, stride-phase split, flattened, padded
    w_ref : (Cout, T*cin_pad)      bf16, tap-major big-K weight matrix
    b_ref : (Cout, 1)              f32
    rest  : [rx_ref, rw_ref,] o_ref, xs_ref [, rs_ref]
    o_ref : (1, Cout, nout_pad)    bf16, lane-dense wide output
    xs/rs : VMEM scratch for the tap-stacked MXU operands (bf16)
    """
    if fuse_res:
        rx_ref, rw_ref, o_ref, xs_ref, rs_ref = rest
    else:
        o_ref, xs_ref = rest

    # One pass of aligned sublane copies builds the big-K operand.  Every row
    # of the scratch is overwritten each grid step (cin_pad padding rows come
    # zero-filled from the input), so no init / stale-VMEM hazard.
    for t, (ph, off) in enumerate(offsets):
        xs_ref[t * cin_pad:(t + 1) * cin_pad, :] = (
            x_ref[0, ph, :, off:off + nout_pad])

    # Single big-K MXU dot (bf16 operands, f32 accumulation).
    acc = jnp.dot(w_ref[...], xs_ref[...], preferred_element_type=jnp.float32)
    acc = acc + b_ref[...]                                     # bias (Cout,1)
    if activate:                                               # FusedLeakyReLU
        acc = jnp.where(acc >= 0.0, acc, NEG_SLOPE * acc) * SQRT2

    if fuse_res:
        # Fused skip conv: second stacked operand + dot, then (x+skip)/sqrt2.
        for t, (ph, off) in enumerate(res_offsets):
            rs_ref[t * res_cin_pad:(t + 1) * res_cin_pad, :] = (
                rx_ref[0, ph, :, off:off + nout_pad])
        skip = jnp.dot(rw_ref[...], rs_ref[...],
                       preferred_element_type=jnp.float32)
        acc = (acc + skip) * (1.0 / SQRT2)

    o_ref[0] = acc.astype(o_ref.dtype)


def _mm_kernel(x_ref, w_ref, b_ref, o_ref, acc_ref, *, activate):
    """K-tiled matmul, f32 VMEM accumulator, bias + fused-leaky-relu epilogue."""
    @pl.when(pl.program_id(2) == 0)
    def _():
        acc_ref[...] = jnp.zeros_like(acc_ref)

    acc_ref[...] += jnp.dot(x_ref[...], w_ref[...],
                            preferred_element_type=jnp.float32)

    @pl.when(pl.program_id(2) == pl.num_programs(2) - 1)
    def _():
        r = acc_ref[...] + b_ref[...]
        if activate:
            r = jnp.where(r >= 0.0, r, NEG_SLOPE * r) * SQRT2
        o_ref[...] = r.astype(o_ref.dtype)


def _stddev_kernel(x_ref, o_ref):
    x = x_ref[...].astype(jnp.float32)                 # (group, n, C*H*W)
    mu = jnp.mean(x, axis=0, keepdims=True)
    var = jnp.mean((x - mu) ** 2, axis=0)              # biased var over group
    std = jnp.sqrt(var + 1e-8)
    o_ref[...] = jnp.mean(std, axis=1, keepdims=True)  # (n, 1)


# --------------------------------------------------------------------------
# Kernel wrappers
# --------------------------------------------------------------------------

def _conv_geometry(H, W, k, s, p):
    Ho = (H + 2 * p - k) // s + 1
    Wo = (W + 2 * p - k) // s + 1
    dmax = (k - 1) // s
    assert dmax <= 2, "wide-layout trick assumes (k-1)//s <= 2"
    Wwide = Wo + 2                        # wide width >= Wo + dmax
    nout = Ho * Wwide
    nout_pad = _round_up(nout, LANE)      # lane-dense output
    # enough slack rows so every tap can read a full nout_pad window in-bounds
    extra = -(-(dmax + nout_pad - nout) // Wwide)
    Hph = Ho + dmax + extra
    Wph = Wwide
    Lp = Hph * Wph
    offsets = tuple(((a % s) * s + (b % s), (a // s) * Wwide + (b // s))
                    for a in range(k) for b in range(k))
    return dict(Ho=Ho, Wo=Wo, Wwide=Wwide, Hph=Hph, Wph=Wph, Lp=Lp,
                nout=nout, nout_pad=nout_pad, offsets=offsets)


def _prep_conv_input(x, s, p, geo, cin_pad):
    """Zero-pad (spatial + channel->cin_pad), split into s*s stride phases,
    flatten each phase spatially.  Output: (B, s*s, cin_pad, Lp) bf16."""
    B, C, H, W = x.shape
    Hph, Wph = geo["Hph"], geo["Wph"]
    Hneed, Wneed = s * Hph, s * Wph
    assert Hneed - H - p >= 0 and Wneed - W - p >= 0
    xp = jnp.pad(x.astype(jnp.bfloat16),
                 ((0, 0), (0, cin_pad - C),
                  (p, Hneed - H - p), (p, Wneed - W - p)))
    phases = [xp[:, :, a0::s, b0::s][:, :, :Hph, :Wph]
              for a0 in range(s) for b0 in range(s)]
    xph = jnp.stack(phases, axis=1)                    # (B, P, cin_pad, Hph, Wph)
    return xph.reshape(B, s * s, cin_pad, Hph * Wph)


def conv_layer(x, params, *, k, s, p, activate, res=None):
    """One ConvLayer: big-K fused conv -> bias -> act [-> + fused skip conv].

    res = (res_x, res_params, res_k, res_p): a second (non-activated,
    bias-free) conv computed in the same kernel and merged as
    (act(conv(x)) + skip(res_x)) / sqrt(2)  (ResBlock semantics).
    """
    B, Cin, H, W = x.shape
    Cout = params["b"].shape[0]
    cin_pad = _round_up(Cin, SUBLANE)
    geo = _conv_geometry(H, W, k, s, p)
    nout_pad = geo["nout_pad"]
    Kbig = k * k * cin_pad
    assert params["w"].shape == (Cout, Kbig)

    xph = _prep_conv_input(x, s, p, geo, cin_pad)      # (B, P, cin_pad, Lp)
    P = s * s

    in_specs = [
        pl.BlockSpec((1, P, cin_pad, geo["Lp"]), lambda bb: (bb, 0, 0, 0)),
        pl.BlockSpec((Cout, Kbig), lambda bb: (0, 0)),
        pl.BlockSpec((Cout, 1), lambda bb: (0, 0)),
    ]
    args = [xph, params["w"], params["b"]]
    scratch = [pltpu.VMEM((Kbig, nout_pad), jnp.bfloat16)]

    res_offsets = ()
    res_cin_pad = 0
    elems = P * cin_pad * geo["Lp"] + Cout * Kbig + Cout * nout_pad
    scratch_elems = Kbig * nout_pad

    if res is not None:
        rx, rparams, rk, rpad = res
        rcin = rx.shape[1]
        res_cin_pad = _round_up(rcin, SUBLANE)
        geo_r = _conv_geometry(H, W, rk, s, rpad)
        assert geo_r["Ho"] == geo["Ho"] and geo_r["Wo"] == geo["Wo"]
        assert geo_r["nout_pad"] == nout_pad
        rKbig = rk * rk * res_cin_pad
        assert rparams["w"].shape == (Cout, rKbig)
        rxph = _prep_conv_input(rx, s, rpad, geo_r, res_cin_pad)
        in_specs += [
            pl.BlockSpec((1, P, res_cin_pad, geo_r["Lp"]),
                         lambda bb: (bb, 0, 0, 0)),
            pl.BlockSpec((Cout, rKbig), lambda bb: (0, 0)),
        ]
        args += [rxph, rparams["w"]]
        scratch.append(pltpu.VMEM((rKbig, nout_pad), jnp.bfloat16))
        res_offsets = geo_r["offsets"]
        elems += P * res_cin_pad * geo_r["Lp"] + Cout * rKbig
        scratch_elems += rKbig * nout_pad

    kernel = functools.partial(
        _conv_kernel, offsets=geo["offsets"], res_offsets=res_offsets,
        cin_pad=cin_pad, res_cin_pad=res_cin_pad, nout_pad=nout_pad,
        activate=activate, fuse_res=res is not None)

    # Scoped-VMEM budget: double-buffered bf16 blocks + scratch + headroom.
    bytes_needed = 2 * (2 * elems) + 2 * scratch_elems + 8 * Cout + (4 << 20)
    vmem_limit = int(min(112 << 20, max(32 << 20, bytes_needed)))

    out_wide = pl.pallas_call(
        kernel,
        out_shape=jax.ShapeDtypeStruct((B, Cout, nout_pad), jnp.bfloat16),
        grid=(B,),
        in_specs=in_specs,
        out_specs=pl.BlockSpec((1, Cout, nout_pad), lambda bb: (bb, 0, 0)),
        scratch_shapes=scratch,
        compiler_params=pltpu.CompilerParams(
            dimension_semantics=("parallel",),
            vmem_limit_bytes=vmem_limit),
    )(*args)

    Ho, Wo, Wwide = geo["Ho"], geo["Wo"], geo["Wwide"]
    out = out_wide[:, :, :Ho * Wwide].reshape(B, Cout, Ho, Wwide)
    return out[:, :, :, :Wo]                           # NCHW bf16


def matmul_bias_act(x, w, b, activate):
    """x:(M,K) @ w:(K,N) bf16 + b:(1,N) f32; cdiv-padded tiles, K accumulated."""
    M, K = x.shape
    N = w.shape[1]
    x = x.astype(jnp.bfloat16)
    tm = min(256, _round_up(M, SUBLANE))
    tk = min(512, _round_up(K, LANE))
    tn = min(256, _round_up(N, LANE))
    Mp, Kp, Np = _round_up(M, tm), _round_up(K, tk), _round_up(N, tn)
    xp = jnp.pad(x, ((0, Mp - M), (0, Kp - K)))
    wp = jnp.pad(w, ((0, Kp - K), (0, Np - N)))
    bp = jnp.pad(b, ((0, 0), (0, Np - N)))
    out = pl.pallas_call(
        functools.partial(_mm_kernel, activate=activate),
        out_shape=jax.ShapeDtypeStruct((Mp, Np), jnp.float32),
        grid=(Mp // tm, Np // tn, Kp // tk),
        in_specs=[
            pl.BlockSpec((tm, tk), lambda i, j, kk: (i, kk)),
            pl.BlockSpec((tk, tn), lambda i, j, kk: (kk, j)),
            pl.BlockSpec((1, tn), lambda i, j, kk: (0, j)),
        ],
        out_specs=pl.BlockSpec((tm, tn), lambda i, j, kk: (i, j)),
        scratch_shapes=[pltpu.VMEM((tm, tn), jnp.float32)],
        compiler_params=pltpu.CompilerParams(
            dimension_semantics=("parallel", "parallel", "arbitrary")),
    )(xp, wp, bp)
    return out[:M, :N]


def minibatch_stddev_scalar(x_grouped):
    group, n, chw = x_grouped.shape
    return pl.pallas_call(
        _stddev_kernel,
        out_shape=jax.ShapeDtypeStruct((n, 1), jnp.float32),
        grid=(1,),
        in_specs=[pl.BlockSpec((group, n, chw), lambda i: (0, 0, 0))],
        out_specs=pl.BlockSpec((n, 1), lambda i: (0, 0)),
    )(x_grouped)


# --------------------------------------------------------------------------
# Parameter construction (EqualConv2d / EqualLinear semantics)
# --------------------------------------------------------------------------

def _pack_weight(w, cin_pad):
    """(cout, cin, k, k) f32 -> (cout, k*k*cin_pad) bf16, tap-major big-K rows."""
    cout, cin, k, _ = w.shape
    T = k * k
    wt = np.transpose(np.asarray(w), (2, 3, 0, 1)).reshape(T, cout, cin)
    wbig = np.zeros((cout, T * cin_pad), np.float32)
    for t in range(T):
        wbig[:, t * cin_pad:t * cin_pad + cin] = wt[t]
    return jnp.asarray(wbig, dtype=jnp.bfloat16)


def conv_params(key, cin, cout, k, bias=True):
    """EqualConv2d(k, stride=1) weights in big-K layout."""
    kw_, kb = jax.random.split(key)
    w = np.asarray(jax.random.normal(kw_, (cout, cin, k, k), dtype=jnp.float32))
    w = w * (1.0 / math.sqrt(cin * k * k))             # EqualConv2d scale
    b = (np.asarray(jax.random.normal(kb, (cout,), dtype=jnp.float32)) * 0.1
         if bias else np.zeros((cout,), np.float32))
    return {"w": _pack_weight(w, _round_up(cin, SUBLANE)),
            "b": jnp.asarray(b.reshape(cout, 1), jnp.float32)}


def downsample_conv_params(key, cin, cout, k, bias=True):
    """Blur([1,3,3,1]) + EqualConv2d(k, stride=2) folded into one exact
    (k+3)x(k+3) stride-2 conv (no nonlinearity between blur and conv)."""
    kw_, kb = jax.random.split(key)
    w = np.asarray(jax.random.normal(kw_, (cout, cin, k, k), dtype=jnp.float32))
    w = w * (1.0 / math.sqrt(cin * k * k))             # EqualConv2d scale
    k1 = np.array([1.0, 3.0, 3.0, 1.0], dtype=np.float32)
    k2 = np.outer(k1, k1)
    k2 = k2 / k2.sum()                                 # symmetric -> flip no-op
    keff = k + 3
    weff = np.zeros((cout, cin, keff, keff), dtype=np.float32)
    for i in range(k):
        for j in range(k):
            weff[:, :, i:i + 4, j:j + 4] += (
                k2[None, None, :, :] * w[:, :, i:i + 1, j:j + 1])
    b = (np.asarray(jax.random.normal(kb, (cout,), dtype=jnp.float32)) * 0.1
         if bias else np.zeros((cout,), np.float32))
    return {"w": _pack_weight(weff, _round_up(cin, SUBLANE)),
            "b": jnp.asarray(b.reshape(cout, 1), jnp.float32)}


def linear_params(key, din, dout, lr_mul=1.0):
    kw_, kb = jax.random.split(key)
    w = jax.random.normal(kw_, (dout, din), dtype=jnp.float32) / lr_mul
    scale = (1.0 / math.sqrt(din)) * lr_mul            # EqualLinear scale
    wmat = (w * scale).T
    b = jax.random.normal(kb, (dout,), dtype=jnp.float32) * 0.1 * lr_mul
    return {"w": wmat.astype(jnp.bfloat16), "b": b.reshape(1, dout)}


def init_encoder_params(key, size, style_dim, channels):
    log_size = int(math.log(size, 2))
    keys = iter(jax.random.split(key, 64))
    params = {"conv0": conv_params(next(keys), 3, channels[size], 1)}
    in_ch = channels[size]
    res = []
    for i in range(log_size, 2, -1):
        out_ch = channels[2 ** (i - 1)]
        res.append({
            "conv1": conv_params(next(keys), in_ch, in_ch, 3),
            "conv2": downsample_conv_params(next(keys), in_ch, out_ch, 3),
            "skip": downsample_conv_params(next(keys), in_ch, out_ch, 1,
                                           bias=False),
        })
        in_ch = out_ch
    params["res"] = res
    params["final_conv"] = conv_params(next(keys), in_ch + 1, channels[4], 3)
    params["lin1"] = linear_params(next(keys), channels[4] * 4 * 4, channels[4])
    params["lin2"] = linear_params(next(keys), channels[4], style_dim)
    return params


# --------------------------------------------------------------------------
# Forward pass
# --------------------------------------------------------------------------

def encoder_forward(params, x, stddev_group=4):
    x = x.astype(jnp.bfloat16)                         # bf16 activations in HBM

    # conv0: 1x1 + FusedLeakyReLU
    out = conv_layer(x, params["conv0"], k=1, s=1, p=0, activate=True)

    for rp in params["res"]:
        o1 = conv_layer(out, rp["conv1"], k=3, s=1, p=1, activate=True)
        # conv2 = blur + 3x3 stride-2 -> effective 6x6 stride-2; the skip
        # (blur + 1x1 stride-2 -> effective 4x4 stride-2) and the residual
        # merge (act(conv2)+skip)/sqrt(2) are fused into the same kernel.
        out = conv_layer(o1, rp["conv2"], k=6, s=2, p=2, activate=True,
                         res=(out, rp["skip"], 4, 1))

    # minibatch stddev feature (matches torch view/var/mean/repeat ordering)
    B, C, H, W = out.shape
    group = min(B, stddev_group)
    n = B // group
    s_ = minibatch_stddev_scalar(out.reshape(group, n, C * H * W))   # (n, 1)
    s_b = jnp.tile(s_.reshape(n), group)                             # b -> s[b % n]
    std_map = jnp.broadcast_to(s_b[:, None, None, None],
                               (B, 1, H, W)).astype(out.dtype)
    out = jnp.concatenate([out, std_map], axis=1)

    out = conv_layer(out, params["final_conv"], k=3, s=1, p=1, activate=True)
    flat = out.reshape(B, -1)                   # NCHW flatten == torch .view
    h = matmul_bias_act(flat, params["lin1"]["w"], params["lin1"]["b"],
                        activate=True)
    return matmul_bias_act(h, params["lin2"]["w"], params["lin2"]["b"],
                           activate=False)


if __name__ == "__main__":
    size = 16
    style_dim = 8
    channels = {4: 32, 8: 16, 16: 8}   # small synthetic channel table

    key = jax.random.PRNGKey(0)
    kp, kx = jax.random.split(key)
    params = init_encoder_params(kp, size, style_dim, channels)
    x = jax.random.normal(kx, (2, 3, size, size), dtype=jnp.float32)  # NCHW

    fwd = jax.jit(encoder_forward)
    out = fwd(params, x)
    jax.block_until_ready(out)
    assert out.shape == (2, style_dim) and out.dtype == jnp.float32
    assert bool(jnp.all(jnp.isfinite(out)))
    print("KERNEL_OK")
</pallas_src>

<mosaic_0001>
module attributes {stable_mosaic.version = 11 : i64} {
  func.func @_conv_kernel(%arg0: i32, %arg1: memref<1x1x8x396xbf16, #tpu.memory_space<vmem>>, %arg2: memref<8x8xbf16, #tpu.memory_space<vmem>>, %arg3: memref<8x1xf32, #tpu.memory_space<vmem>>, %arg4: memref<1x8x384xbf16, #tpu.memory_space<vmem>>, %arg5: memref<8x384xbf16, #tpu.memory_space<vmem>>) attributes {dimension_semantics = [#tpu.dimension_semantics<parallel>], iteration_bounds = array<i64: 2>, scalar_prefetch = 0 : i64, scratch_operands = 1 : i64, tpu.core_type = #tpu.core_type<tc>, window_params = [{transform_indices = @transform_0, window_bounds = array<i64: 1, 1, 8, 396>}, {pipeline_mode = #tpu.pipeline_mode<synchronous>, transform_indices = @transform_1, window_bounds = array<i64: 8, 8>}, {pipeline_mode = #tpu.pipeline_mode<synchronous>, transform_indices = @transform_2, window_bounds = array<i64: 8, 1>}, {transform_indices = @transform_3, window_bounds = array<i64: 1, 8, 384>}]} {
    %c0 = arith.constant 0 : index
    %c0_0 = arith.constant 0 : index
    %c0_1 = arith.constant 0 : index
    %c0_2 = arith.constant 0 : index
    %0 = vector.load %arg1[%c0, %c0_0, %c0_1, %c0_2] : memref<1x1x8x396xbf16, #tpu.memory_space<vmem>>, vector<1x1x8x384xbf16>
    %1 = vector.shape_cast %0 : vector<1x1x8x384xbf16> to vector<8x384xbf16>
    %c0_3 = arith.constant 0 : index
    %c0_4 = arith.constant 0 : index
    %2 = vector.load %arg5[%c0_3, %c0_4] : memref<8x384xbf16, #tpu.memory_space<vmem>>, vector<8x384xbf16>
    tpu.vector_store %arg5[%c0_3, %c0_4], %1 {strides = array<i32>} : memref<8x384xbf16, #tpu.memory_space<vmem>>, vector<8x384xbf16>,
    %c0_5 = arith.constant 0 : index
    %c0_6 = arith.constant 0 : index
    %3 = vector.load %arg2[%c0_5, %c0_6] : memref<8x8xbf16, #tpu.memory_space<vmem>>, vector<8x8xbf16>
    %c0_7 = arith.constant 0 : index
    %c0_8 = arith.constant 0 : index
    %4 = vector.load %arg5[%c0_7, %c0_8] : memref<8x384xbf16, #tpu.memory_space<vmem>>, vector<8x384xbf16>
    %cst = arith.constant dense<0.000000e+00> : vector<8x384xf32>
    %5 = tpu.matmul %3, %4, %cst {dimension_numbers = #tpu.dot_dimension_numbers<[1], [0], [0], [1], [0, 0, 1, 1], [], []>} : vector<8x8xbf16>, vector<8x384xbf16>, vector<8x384xf32> -> vector<8x384xf32>
    %c0_9 = arith.constant 0 : index
    %c0_10 = arith.constant 0 : index
    %6 = vector.load %arg3[%c0_9, %c0_10] : memref<8x1xf32, #tpu.memory_space<vmem>>, vector<8x1xf32>
    %7 = vector.broadcast %6 : vector<8x1xf32> to vector<8x384xf32>
    %8 = arith.addf %5, %7 : vector<8x384xf32>
    %cst_11 = arith.constant 0.000000e+00 : f32
    %9 = vector.broadcast %cst_11 : f32 to vector<8x384xf32>
    %10 = arith.cmpf oge, %8, %9 : vector<8x384xf32>
    %cst_12 = arith.constant 2.000000e-01 : f32
    %11 = vector.broadcast %cst_12 : f32 to vector<8x384xf32>
    %12 = arith.mulf %11, %8 : vector<8x384xf32>
    %13 = arith.select %10, %8, %12 : vector<8x384xi1>, vector<8x384xf32>
    %cst_13 = arith.constant 1.41421354 : f32
    %14 = vector.broadcast %cst_13 : f32 to vector<8x384xf32>
    %15 = arith.mulf %13, %14 : vector<8x384xf32>
    %16 = arith.truncf %15 : vector<8x384xf32> to vector<8x384xbf16>
    %c0_14 = arith.constant 0 : index
    %c0_15 = arith.constant 0 : index
    %c0_16 = arith.constant 0 : index
    %17 = vector.load %arg4[%c0_14, %c0_15, %c0_16] : memref<1x8x384xbf16, #tpu.memory_space<vmem>>, vector<1x8x384xbf16>
    %18 = vector.shape_cast %17 : vector<1x8x384xbf16> to vector<8x384xbf16>
    %19 = vector.shape_cast %16 : vector<8x384xbf16> to vector<1x8x384xbf16>
    tpu.vector_store %arg4[%c0_14, %c0_15, %c0_16], %19 {strides = array<i32>} : memref<1x8x384xbf16, #tpu.memory_space<vmem>>, vector<1x8x384xbf16>,
    return
  }
  func.func @transform_0(%arg0: i32) -> (i32, i32, i32, i32) {
    %c0_i32 = arith.constant 0 : i32
    %c0_i32_0 = arith.constant 0 : i32
    %c0_i32_1 = arith.constant 0 : i32
    %c0_i32_2 = arith.constant 0 : i32
    return %arg0, %c0_i32, %c0_i32_0, %c0_i32_1 : i32, i32, i32, i32
  }
  func.func @transform_1(%arg0: i32) -> (i32, i32) {
    %c0_i32 = arith.constant 0 : i32
    %c0_i32_0 = arith.constant 0 : i32
    %c0_i32_1 = arith.constant 0 : i32
    return %c0_i32, %c0_i32_0 : i32, i32
  }
  func.func @transform_2(%arg0: i32) -> (i32, i32) {
    %c0_i32 = arith.constant 0 : i32
    %c0_i32_0 = arith.constant 0 : i32
    %c0_i32_1 = arith.constant 0 : i32
    return %c0_i32, %c0_i32_0 : i32, i32
  }
  func.func @transform_3(%arg0: i32) -> (i32, i32, i32) {
    %c0_i32 = arith.constant 0 : i32
    %c0_i32_0 = arith.constant 0 : i32
    %c0_i32_1 = arith.constant 0 : i32
    return %arg0, %c0_i32, %c0_i32_0 : i32, i32, i32
  }
}

module attributes {stable_mosaic.version = 11 : i64} {
  func.func @_conv_kernel(%arg0: i32, %arg1: memref<1x1x8x432xbf16, #tpu.memory_space<vmem>>, %arg2: memref<8x72xbf16, #tpu.memory_space<vmem>>, %arg3: memref<8x1xf32, #tpu.memory_space<vmem>>, %arg4: memref<1x8x384xbf16, #tpu.memory_space<vmem>>, %arg5: memref<72x384xbf16, #tpu.memory_space<vmem>>) attributes {dimension_semantics = [#tpu.dimension_semantics<parallel>], iteration_bounds = array<i64: 2>, scalar_prefetch = 0 : i64, scratch_operands = 1 : i64, tpu.core_type = #tpu.core_type<tc>, window_params = [{transform_indices = @transform_0, window_bounds = array<i64: 1, 1, 8, 432>}, {pipeline_mode = #tpu.pipeline_mode<synchronous>, transform_indices = @transform_1, window_bounds = array<i64: 8, 72>}, {pipeline_mode = #tpu.pipeline_mode<synchronous>, transform_indices = @transform_2, window_bounds = array<i64: 8, 1>}, {transform_indices = @transform_3, window_bounds = array<i64: 1, 8, 384>}]} {
    %c0 = arith.constant 0 : index
    %c0_0 = arith.constant 0 : index
    %c0_1 = arith.constant 0 : index
    %c0_2 = arith.constant 0 : index
    %0 = vector.load %arg1[%c0, %c0_0, %c0_1, %c0_2] : memref<1x1x8x432xbf16, #tpu.memory_space<vmem>>, vector<1x1x8x384xbf16>
    %1 = vector.shape_cast %0 : vector<1x1x8x384xbf16> to vector<8x384xbf16>
    %c0_3 = arith.constant 0 : index
    %c0_4 = arith.constant 0 : index
    %2 = vector.load %arg5[%c0_3, %c0_4] : memref<72x384xbf16, #tpu.memory_space<vmem>>, vector<8x384xbf16>
    tpu.vector_store %arg5[%c0_3, %c0_4], %1 {strides = array<i32>} : memref<72x384xbf16, #tpu.memory_space<vmem>>, vector<8x384xbf16>,
    %c0_5 = arith.constant 0 : index
    %c0_6 = arith.constant 0 : index
    %c0_7 = arith.constant 0 : index
    %c1 = arith.constant 1 : index
    %3 = vector.load %arg1[%c0_5, %c0_6, %c0_7, %c1] : memref<1x1x8x432xbf16, #tpu.memory_space<vmem>>, vector<1x1x8x384xbf16>
    %4 = vector.shape_cast %3 : vector<1x1x8x384xbf16> to vector<8x384xbf16>
    %c8 = arith.constant 8 : index
    %c0_8 = arith.constant 0 : index
    %5 = vector.load %arg5[%c8, %c0_8] : memref<72x384xbf16, #tpu.memory_space<vmem>>, vector<8x384xbf16>
    tpu.vector_store %arg5[%c8, %c0_8], %4 {strides = array<i32>} : memref<72x384xbf16, #tpu.memory_space<vmem>>, vector<8x384xbf16>,
    %c0_9 = arith.constant 0 : index
    %c0_10 = arith.constant 0 : index
    %c0_11 = arith.constant 0 : index
    %c2 = arith.constant 2 : index
    %6 = vector.load %arg1[%c0_9, %c0_10, %c0_11, %c2] : memref<1x1x8x432xbf16, #tpu.memory_space<vmem>>, vector<1x1x8x384xbf16>
    %7 = vector.shape_cast %6 : vector<1x1x8x384xbf16> to vector<8x384xbf16>
    %c16 = arith.constant 16 : index
    %c0_12 = arith.constant 0 : index
    %8 = vector.load %arg5[%c16, %c0_12] : memref<72x384xbf16, #tpu.memory_space<vmem>>, vector<8x384xbf16>
    tpu.vector_store %arg5[%c16, %c0_12], %7 {strides = array<i32>} : memref<72x384xbf16, #tpu.memory_space<vmem>>, vector<8x384xbf16>,
    %c0_13 = arith.constant 0 : index
    %c0_14 = arith.constant 0 : index
    %c0_15 = arith.constant 0 : index
    %c18 = arith.constant 18 : index
    %9 = vector.load %arg1[%c0_13, %c0_14, %c0_15, %c18] : memref<1x1x8x432xbf16, #tpu.memory_space<vmem>>, vector<1x1x8x384xbf16>
    %10 = vector.shape_cast %9 : vector<1x1x8x384xbf16> to vector<8x384xbf16>
    %c24 = arith.constant 24 : index
    %c0_16 = arith.constant 0 : index
    %11 = vector.load %arg5[%c24, %c0_16] : memref<72x384xbf16, #tpu.memory_space<vmem>>, vector<8x384xbf16>
    tpu.vector_store %arg5[%c24, %c0_16], %10 {strides = array<i32>} : memref<72x384xbf16, #tpu.memory_space<vmem>>, vector<8x384xbf16>,
    %c0_17 = arith.constant 0 : index
    %c0_18 = arith.constant 0 : index
    %c0_19 = arith.constant 0 : index
    %c19 = arith.constant 19 : index
    %12 = vector.load %arg1[%c0_17, %c0_18, %c0_19, %c19] : memref<1x1x8x432xbf16, #tpu.memory_space<vmem>>, vector<1x1x8x384xbf16>
    %13 = vector.shape_cast %12 : vector<1x1x8x384xbf16> to vector<8x384xbf16>
    %c32 = arith.constant 32 : index
    %c0_20 = arith.constant 0 : index
    %14 = vector.load %arg5[%c32, %c0_20] : memref<72x384xbf16, #tpu.memory_space<vmem>>, vector<8x384xbf16>
    tpu.vector_store %arg5[%c32, %c0_20], %13 {strides = array<i32>} : memref<72x384xbf16, #tpu.memory_space<vmem>>, vector<8x384xbf16>,
    %c0_21 = arith.constant 0 : index
    %c0_22 = arith.constant 0 : index
    %c0_23 = arith.constant 0 : index
    %c20 = arith.constant 20 : index
    %15 = vector.load %arg1[%c0_21, %c0_22, %c0_23, %c20] : memref<1x1x8x432xbf16, #tpu.memory_space<vmem>>, vector<1x1x8x384xbf16>
    %16 = vector.shape_cast %15 : vector<1x1x8x384xbf16> to vector<8x384xbf16>
    %c40 = arith.constant 40 : index
    %c0_24 = arith.constant 0 : index
    %17 = vector.load %arg5[%c40, %c0_24] : memref<72x384xbf16, #tpu.memory_space<vmem>>, vector<8x384xbf16>
    tpu.vector_store %arg5[%c40, %c0_24], %16 {strides = array<i32>} : memref<72x384xbf16, #tpu.memory_space<vmem>>, vector<8x384xbf16>,
    %c0_25 = arith.constant 0 : index
    %c0_26 = arith.constant 0 : index
    %c0_27 = arith.constant 0 : index
    %c36 = arith.constant 36 : index
    %18 = vector.load %arg1[%c0_25, %c0_26, %c0_27, %c36] : memref<1x1x8x432xbf16, #tpu.memory_space<vmem>>, vector<1x1x8x384xbf16>
    %19 = vector.shape_cast %18 : vector<1x1x8x384xbf16> to vector<8x384xbf16>
    %c48 = arith.constant 48 : index
    %c0_28 = arith.constant 0 : index
    %20 = vector.load %arg5[%c48, %c0_28] : memref<72x384xbf16, #tpu.memory_space<vmem>>, vector<8x384xbf16>
    tpu.vector_store %arg5[%c48, %c0_28], %19 {strides = array<i32>} : memref<72x384xbf16, #tpu.memory_space<vmem>>, vector<8x384xbf16>,
    %c0_29 = arith.constant 0 : index
    %c0_30 = arith.constant 0 : index
    %c0_31 = arith.constant 0 : index
    %c37 = arith.constant 37 : index
    %21 = vector.load %arg1[%c0_29, %c0_30, %c0_31, %c37] : memref<1x1x8x432xbf16, #tpu.memory_space<vmem>>, vector<1x1x8x384xbf16>
    %22 = vector.shape_cast %21 : vector<1x1x8x384xbf16> to vector<8x384xbf16>
    %c56 = arith.constant 56 : index
    %c0_32 = arith.constant 0 : index
    %23 = vector.load %arg5[%c56, %c0_32] : memref<72x384xbf16, #tpu.memory_space<vmem>>, vector<8x384xbf16>
    tpu.vector_store %arg5[%c56, %c0_32], %22 {strides = array<i32>} : memref<72x384xbf16, #tpu.memory_space<vmem>>, vector<8x384xbf16>,
    %c0_33 = arith.constant 0 : index
    %c0_34 = arith.constant 0 : index
    %c0_35 = arith.constant 0 : index
    %c38 = arith.constant 38 : index
    %24 = vector.load %arg1[%c0_33, %c0_34, %c0_35, %c38] : memref<1x1x8x432xbf16, #tpu.memory_space<vmem>>, vector<1x1x8x384xbf16>
    %25 = vector.shape_cast %24 : vector<1x1x8x384xbf16> to vector<8x384xbf16>
    %c64 = arith.constant 64 : index
    %c0_36 = arith.constant 0 : index
    %26 = vector.load %arg5[%c64, %c0_36] : memref<72x384xbf16, #tpu.memory_space<vmem>>, vector<8x384xbf16>
    tpu.vector_store %arg5[%c64, %c0_36], %25 {strides = array<i32>} : memref<72x384xbf16, #tpu.memory_space<vmem>>, vector<8x384xbf16>,
    %c0_37 = arith.constant 0 : index
    %c0_38 = arith.constant 0 : index
    %27 = vector.load %arg2[%c0_37, %c0_38] : memref<8x72xbf16, #tpu.memory_space<vmem>>, vector<8x72xbf16>
    %c0_39 = arith.constant 0 : index
    %c0_40 = arith.constant 0 : index
    %28 = vector.load %arg5[%c0_39, %c0_40] : memref<72x384xbf16, #tpu.memory_space<vmem>>, vector<72x384xbf16>
    %cst = arith.constant dense<0.000000e+00> : vector<8x384xf32>
    %29 = tpu.matmul %27, %28, %cst {dimension_numbers = #tpu.dot_dimension_numbers<[1], [0], [0], [1], [0, 0, 1, 1], [], []>} : vector<8x72xbf16>, vector<72x384xbf16>, vector<8x384xf32> -> vector<8x384xf32>
    %c0_41 = arith.constant 0 : index
    %c0_42 = arith.constant 0 : index
    %30 = vector.load %arg3[%c0_41, %c0_42] : memref<8x1xf32, #tpu.memory_space<vmem>>, vector<8x1xf32>
    %31 = vector.broadcast %30 : vector<8x1xf32> to vector<8x384xf32>
    %32 = arith.addf %29, %31 : vector<8x384xf32>
    %cst_43 = arith.constant 0.000000e+00 : f32
    %33 = vector.broadcast %cst_43 : f32 to vector<8x384xf32>
    %34 = arith.cmpf oge, %32, %33 : vector<8x384xf32>
    %cst_44 = arith.constant 2.000000e-01 : f32
    %35 = vector.broadcast %cst_44 : f32 to vector<8x384xf32>
    %36 = arith.mulf %35, %32 : vector<8x384xf32>
    %37 = arith.select %34, %32, %36 : vector<8x384xi1>, vector<8x384xf32>
    %cst_45 = arith.constant 1.41421354 : f32
    %38 = vector.broadcast %cst_45 : f32 to vector<8x384xf32>
    %39 = arith.mulf %37, %38 : vector<8x384xf32>
    %40 = arith.truncf %39 : vector<8x384xf32> to vector<8x384xbf16>
    %c0_46 = arith.constant 0 : index
    %c0_47 = arith.constant 0 : index
    %c0_48 = arith.constant 0 : index
    %41 = vector.load %arg4[%c0_46, %c0_47, %c0_48] : memref<1x8x384xbf16, #tpu.memory_space<vmem>>, vector<1x8x384xbf16>
    %42 = vector.shape_cast %41 : vector<1x8x384xbf16> to vector<8x384xbf16>
    %43 = vector.shape_cast %40 : vector<8x384xbf16> to vector<1x8x384xbf16>
    tpu.vector_store %arg4[%c0_46, %c0_47, %c0_48], %43 {strides = array<i32>} : memref<1x8x384xbf16, #tpu.memory_space<vmem>>, vector<1x8x384xbf16>,
    return
  }
  func.func @transform_0(%arg0: i32) -> (i32, i32, i32, i32) {
    %c0_i32 = arith.constant 0 : i32
    %c0_i32_0 = arith.constant 0 : i32
    %c0_i32_1 = arith.constant 0 : i32
    %c0_i32_2 = arith.constant 0 : i32
    return %arg0, %c0_i32, %c0_i32_0, %c0_i32_1 : i32, i32, i32, i32
  }
  func.func @transform_1(%arg0: i32) -> (i32, i32) {
    %c0_i32 = arith.constant 0 : i32
    %c0_i32_0 = arith.constant 0 : i32
    %c0_i32_1 = arith.constant 0 : i32
    return %c0_i32, %c0_i32_0 : i32, i32
  }
  func.func @transform_2(%arg0: i32) -> (i32, i32) {
    %c0_i32 = arith.constant 0 : i32
    %c0_i32_0 = arith.constant 0 : i32
    %c0_i32_1 = arith.constant 0 : i32
    return %c0_i32, %c0_i32_0 : i32, i32
  }
  func.func @transform_3(%arg0: i32) -> (i32, i32, i32) {
    %c0_i32 = arith.constant 0 : i32
    %c0_i32_0 = arith.constant 0 : i32
    %c0_i32_1 = arith.constant 0 : i32
    return %arg0, %c0_i32, %c0_i32_0 : i32, i32, i32
  }
}

module attributes {stable_mosaic.version = 11 : i64} {
  func.func @_conv_kernel(%arg0: i32, %arg1: memref<1x4x8x150xbf16, #tpu.memory_space<vmem>>, %arg2: memref<16x288xbf16, #tpu.memory_space<vmem>>, %arg3: memref<16x1xf32, #tpu.memory_space<vmem>>, %arg4: memref<1x4x8x140xbf16, #tpu.memory_space<vmem>>, %arg5: memref<16x128xbf16, #tpu.memory_space<vmem>>, %arg6: memref<1x16x128xbf16, #tpu.memory_space<vmem>>, %arg7: memref<288x128xbf16, #tpu.memory_space<vmem>>, %arg8: memref<128x128xbf16, #tpu.memory_space<vmem>>) attributes {dimension_semantics = [#tpu.dimension_semantics<parallel>], iteration_bounds = array<i64: 2>, scalar_prefetch = 0 : i64, scratch_operands = 2 : i64, tpu.core_type = #tpu.core_type<tc>, window_params = [{transform_indices = @transform_0, window_bounds = array<i64: 1, 4, 8, 150>}, {pipeline_mode = #tpu.pipeline_mode<synchronous>, transform_indices = @transform_1, window_bounds = array<i64: 16, 288>}, {pipeline_mode = #tpu.pipeline_mode<synchronous>, transform_indices = @transform_2, window_bounds = array<i64: 16, 1>}, {transform_indices = @transform_3, window_bounds = array<i64: 1, 4, 8, 140>}, {pipeline_mode = #tpu.pipeline_mode<synchronous>, transform_indices = @transform_4, window_bounds = array<i64: 16, 128>}, {transform_indices = @transform_5, window_bounds = array<i64: 1, 16, 128>}]} {
    %c0 = arith.constant 0 : index
    %c0_0 = arith.constant 0 : index
    %c0_1 = arith.constant 0 : index
    %c0_2 = arith.constant 0 : index
    %0 = vector.load %arg1[%c0, %c0_0, %c0_1, %c0_2] : memref<1x4x8x150xbf16, #tpu.memory_space<vmem>>, vector<1x1x8x128xbf16>
    %1 = vector.shape_cast %0 : vector<1x1x8x128xbf16> to vector<8x128xbf16>
    %c0_3 = arith.constant 0 : index
    %c0_4 = arith.constant 0 : index
    %2 = vector.load %arg7[%c0_3, %c0_4] : memref<288x128xbf16, #tpu.memory_space<vmem>>, vector<8x128xbf16>
    tpu.vector_store %arg7[%c0_3, %c0_4], %1 {strides = array<i32>} : memref<288x128xbf16, #tpu.memory_space<vmem>>, vector<8x128xbf16>,
    %c0_5 = arith.constant 0 : index
    %c1 = arith.constant 1 : index
    %c0_6 = arith.constant 0 : index
    %c0_7 = arith.constant 0 : index
    %3 = vector.load %arg1[%c0_5, %c1, %c0_6, %c0_7] : memref<1x4x8x150xbf16, #tpu.memory_space<vmem>>, vector<1x1x8x128xbf16>
    %4 = vector.shape_cast %3 : vector<1x1x8x128xbf16> to vector<8x128xbf16>
    %c8 = arith.constant 8 : index
    %c0_8 = arith.constant 0 : index
    %5 = vector.load %arg7[%c8, %c0_8] : memref<288x128xbf16, #tpu.memory_space<vmem>>, vector<8x128xbf16>
    tpu.vector_store %arg7[%c8, %c0_8], %4 {strides = array<i32>} : memref<288x128xbf16, #tpu.memory_space<vmem>>, vector<8x128xbf16>,
    %c0_9 = arith.constant 0 : index
    %c0_10 = arith.constant 0 : index
    %c0_11 = arith.constant 0 : index
    %c1_12 = arith.constant 1 : index
    %6 = vector.load %arg1[%c0_9, %c0_10, %c0_11, %c1_12] : memref<1x4x8x150xbf16, #tpu.memory_space<vmem>>, vector<1x1x8x128xbf16>
    %7 = vector.shape_cast %6 : vector<1x1x8x128xbf16> to vector<8x128xbf16>
    %c16 = arith.constant 16 : index
    %c0_13 = arith.constant 0 : index
    %8 = vector.load %arg7[%c16, %c0_13] : memref<288x128xbf16, #tpu.memory_space<vmem>>, vector<8x128xbf16>
    tpu.vector_store %arg7[%c16, %c0_13], %7 {strides = array<i32>} : memref<288x128xbf16, #tpu.memory_space<vmem>>, vector<8x128xbf16>,
    %c0_14 = arith.constant 0 : index
    %c1_15 = arith.constant 1 : index
    %c0_16 = arith.constant 0 : index
    %c1_17 = arith.constant 1 : index
    %9 = vector.load %arg1[%c0_14, %c1_15, %c0_16, %c1_17] : memref<1x4x8x150xbf16, #tpu.memory_space<vmem>>, vector<1x1x8x128xbf16>
    %10 = vector.shape_cast %9 : vector<1x1x8x128xbf16> to vector<8x128xbf16>
    %c24 = arith.constant 24 : index
    %c0_18 = arith.constant 0 : index
    %11 = vector.load %arg7[%c24, %c0_18] : memref<288x128xbf16, #tpu.memory_space<vmem>>, vector<8x128xbf16>
    tpu.vector_store %arg7[%c24, %c0_18], %10 {strides = array<i32>} : memref<288x128xbf16, #tpu.memory_space<vmem>>, vector<8x128xbf16>,
    %c0_19 = arith.constant 0 : index
    %c0_20 = arith.constant 0 : index
    %c0_21 = arith.constant 0 : index
    %c2 = arith.constant 2 : index
    %12 = vector.load %arg1[%c0_19, %c0_20, %c0_21, %c2] : memref<1x4x8x150xbf16, #tpu.memory_space<vmem>>, vector<1x1x8x128xbf16>
    %13 = vector.shape_cast %12 : vector<1x1x8x128xbf16> to vector<8x128xbf16>
    %c32 = arith.constant 32 : index
    %c0_22 = arith.constant 0 : index
    %14 = vector.load %arg7[%c32, %c0_22] : memref<288x128xbf16, #tpu.memory_space<vmem>>, vector<8x128xbf16>
    tpu.vector_store %arg7[%c32, %c0_22], %13 {strides = array<i32>} : memref<288x128xbf16, #tpu.memory_space<vmem>>, vector<8x128xbf16>,
    %c0_23 = arith.constant 0 : index
    %c1_24 = arith.constant 1 : index
    %c0_25 = arith.constant 0 : index
    %c2_26 = arith.constant 2 : index
    %15 = vector.load %arg1[%c0_23, %c1_24, %c0_25, %c2_26] : memref<1x4x8x150xbf16, #tpu.memory_space<vmem>>, vector<1x1x8x128xbf16>
    %16 = vector.shape_cast %15 : vector<1x1x8x128xbf16> to vector<8x128xbf16>
    %c40 = arith.constant 40 : index
    %c0_27 = arith.constant 0 : index
    %17 = vector.load %arg7[%c40, %c0_27] : memref<288x128xbf16, #tpu.memory_space<vmem>>, vector<8x128xbf16>
    tpu.vector_store %arg7[%c40, %c0_27], %16 {strides = array<i32>} : memref<288x128xbf16, #tpu.memory_space<vmem>>, vector<8x128xbf16>,
    %c0_28 = arith.constant 0 : index
    %c2_29 = arith.constant 2 : index
    %c0_30 = arith.constant 0 : index
    %c0_31 = arith.constant 0 : index
    %18 = vector.load %arg1[%c0_28, %c2_29, %c0_30, %c0_31] : memref<1x4x8x150xbf16, #tpu.memory_space<vmem>>, vector<1x1x8x128xbf16>
    %19 = vector.shape_cast %18 : vector<1x1x8x128xbf16> to vector<8x128xbf16>
    %c48 = arith.constant 48 : index
    %c0_32 = arith.constant 0 : index
    %20 = vector.load %arg7[%c48, %c0_32] : memref<288x128xbf16, #tpu.memory_space<vmem>>, vector<8x128xbf16>
    tpu.vector_store %arg7[%c48, %c0_32], %19 {strides = array<i32>} : memref<288x128xbf16, #tpu.memory_space<vmem>>, vector<8x128xbf16>,
    %c0_33 = arith.constant 0 : index
    %c3 = arith.constant 3 : index
    %c0_34 = arith.constant 0 : index
    %c0_35 = arith.constant 0 : index
    %21 = vector.load %arg1[%c0_33, %c3, %c0_34, %c0_35] : memref<1x4x8x150xbf16, #tpu.memory_space<vmem>>, vector<1x1x8x128xbf16>
    %22 = vector.shape_cast %21 : vector<1x1x8x128xbf16> to vector<8x128xbf16>
    %c56 = arith.constant 56 : index
    %c0_36 = arith.constant 0 : index
    %23 = vector.load %arg7[%c56, %c0_36] : memref<288x128xbf16, #tpu.memory_space<vmem>>, vector<8x128xbf16>
    tpu.vector_store %arg7[%c56, %c0_36], %22 {strides = array<i32>} : memref<288x128xbf16, #tpu.memory_space<vmem>>, vector<8x128xbf16>,
    %c0_37 = arith.constant 0 : index
    %c2_38 = arith.constant 2 : index
    %c0_39 = arith.constant 0 : index
    %c1_40 = arith.constant 1 : index
    %24 = vector.load %arg1[%c0_37, %c2_38, %c0_39, %c1_40] : memref<1x4x8x150xbf16, #tpu.memory_space<vmem>>, vector<1x1x8x128xbf16>
    %25 = vector.shape_cast %24 : vector<1x1x8x128xbf16> to vector<8x128xbf16>
    %c64 = arith.constant 64 : index
    %c0_41 = arith.constant 0 : index
    %26 = vector.load %arg7[%c64, %c0_41] : memref<288x128xbf16, #tpu.memory_space<vmem>>, vector<8x128xbf16>
    tpu.vector_store %arg7[%c64, %c0_41], %25 {strides = array<i32>} : memref<288x128xbf16, #tpu.memory_space<vmem>>, vector<8x128xbf16>,
    %c0_42 = arith.constant 0 : index
    %c3_43 = arith.constant 3 : index
    %c0_44 = arith.constant 0 : index
    %c1_45 = arith.constant 1 : index
    %27 = vector.load %arg1[%c0_42, %c3_43, %c0_44, %c1_45] : memref<1x4x8x150xbf16, #tpu.memory_space<vmem>>, vector<1x1x8x128xbf16>
    %28 = vector.shape_cast %27 : vector<1x1x8x128xbf16> to vector<8x128xbf16>
    %c72 = arith.constant 72 : index
    %c0_46 = arith.constant 0 : index
    %29 = vector.load %arg7[%c72, %c0_46] : memref<288x128xbf16, #tpu.memory_space<vmem>>, vector<8x128xbf16>
    tpu.vector_store %arg7[%c72, %c0_46], %28 {strides = array<i32>} : memref<288x128xbf16, #tpu.memory_space<vmem>>, vector<8x128xbf16>,
    %c0_47 = arith.constant 0 : index
    %c2_48 = arith.constant 2 : index
    %c0_49 = arith.constant 0 : index
    %c2_50 = arith.constant 2 : index
    %30 = vector.load %arg1[%c0_47, %c2_48, %c0_49, %c2_50] : memref<1x4x8x150xbf16, #tpu.memory_space<vmem>>, vector<1x1x8x128xbf16>
    %31 = vector.shape_cast %30 : vector<1x1x8x128xbf16> to vector<8x128xbf16>
    %c80 = arith.constant 80 : index
    %c0_51 = arith.constant 0 : index
    %32 = vector.load %arg7[%c80, %c0_51] : memref<288x128xbf16, #tpu.memory_space<vmem>>, vector<8x128xbf16>
    tpu.vector_store %arg7[%c80, %c0_51], %31 {strides = array<i32>} : memref<288x128xbf16, #tpu.memory_space<vmem>>, vector<8x128xbf16>,
    %c0_52 = arith.constant 0 : index
    %c3_53 = arith.constant 3 : index
    %c0_54 = arith.constant 0 : index
    %c2_55 = arith.constant 2 : index
    %33 = vector.load %arg1[%c0_52, %c3_53, %c0_54, %c2_55] : memref<1x4x8x150xbf16, #tpu.memory_space<vmem>>, vector<1x1x8x128xbf16>
    %34 = vector.shape_cast %33 : vector<1x1x8x128xbf16> to vector<8x128xbf16>
    %c88 = arith.constant 88 : index
    %c0_56 = arith.constant 0 : index
    %35 = vector.load %arg7[%c88, %c0_56] : memref<288x128xbf16, #tpu.memory_space<vmem>>, vector<8x128xbf16>
    tpu.vector_store %arg7[%c88, %c0_56], %34 {strides = array<i32>} : memref<288x128xbf16, #tpu.memory_space<vmem>>, vector<8x128xbf16>,
    %c0_57 = arith.constant 0 : index
    %c0_58 = arith.constant 0 : index
    %c0_59 = arith.constant 0 : index
    %c10 = arith.constant 10 : index
    %36 = vector.load %arg1[%c0_57, %c0_58, %c0_59, %c10] : memref<1x4x8x150xbf16, #tpu.memory_space<vmem>>, vector<1x1x8x128xbf16>
    %37 = vector.shape_cast %36 : vector<1x1x8x128xbf16> to vector<8x128xbf16>
    %c96 = arith.constant 96 : index
    %c0_60 = arith.constant 0 : index
    %38 = vector.load %arg7[%c96, %c0_60] : memref<288x128xbf16, #tpu.memory_space<vmem>>, vector<8x128xbf16>
    tpu.vector_store %arg7[%c96, %c0_60], %37 {strides = array<i32>} : memref<288x128xbf16, #tpu.memory_space<vmem>>, vector<8x128xbf16>,
    %c0_61 = arith.constant 0 : index
    %c1_62 = arith.constant 1 : index
    %c0_63 = arith.constant 0 : index
    %c10_64 = arith.constant 10 : index
    %39 = vector.load %arg1[%c0_61, %c1_62, %c0_63, %c10_64] : memref<1x4x8x150xbf16, #tpu.memory_space<vmem>>, vector<1x1x8x128xbf16>
    %40 = vector.shape_cast %39 : vector<1x1x8x128xbf16> to vector<8x128xbf16>
    %c104 = arith.constant 104 : index
    %c0_65 = arith.constant 0 : index
    %41 = vector.load %arg7[%c104, %c0_65] : memref<288x128xbf16, #tpu.memory_space<vmem>>, vector<8x128xbf16>
    tpu.vector_store %arg7[%c104, %c0_65], %40 {strides = array<i32>} : memref<288x128xbf16, #tpu.memory_space<vmem>>, vector<8x128xbf16>,
    %c0_66 = arith.constant 0 : index
    %c0_67 = arith.constant 0 : index
    %c0_68 = arith.constant 0 : index
    %c11 = arith.constant 11 : index
    %42 = vector.load %arg1[%c0_66, %c0_67, %c0_68, %c11] : memref<1x4x8x150xbf16, #tpu.memory_space<vmem>>, vector<1x1x8x128xbf16>
    %43 = vector.shape_cast %42 : vector<1x1x8x128xbf16> to vector<8x128xbf16>
    %c112 = arith.constant 112 : index
    %c0_69 = arith.constant 0 : index
    %44 = vector.load %arg7[%c112, %c0_69] : memref<288x128xbf16, #tpu.memory_space<vmem>>, vector<8x128xbf16>
    tpu.vector_store %arg7[%c112, %c0_69], %43 {strides = array<i32>} : memref<288x128xbf16, #tpu.memory_space<vmem>>, vector<8x128xbf16>,
    %c0_70 = arith.constant 0 : index
    %c1_71 = arith.constant 1 : index
    %c0_72 = arith.constant 0 : index
    %c11_73 = arith.constant 11 : index
    %45 = vector.load %arg1[%c0_70, %c1_71, %c0_72, %c11_73] : memref<1x4x8x150xbf16, #tpu.memory_space<vmem>>, vector<1x1x8x128xbf16>
    %46 = vector.shape_cast %45 : vector<1x1x8x128xbf16> to vector<8x128xbf16>
    %c120 = arith.constant 120 : index
    %c0_74 = arith.constant 0 : index
    %47 = vector.load %arg7[%c120, %c0_74] : memref<288x128xbf16, #tpu.memory_space<vmem>>, vector<8x128xbf16>
    tpu.vector_store %arg7[%c120, %c0_74], %46 {strides = array<i32>} : memref<288x128xbf16, #tpu.memory_space<vmem>>, vector<8x128xbf16>,
    %c0_75 = arith.constant 0 : index
    %c0_76 = arith.constant 0 : index
    %c0_77 = arith.constant 0 : index
    %c12 = arith.constant 12 : index
    %48 = vector.load %arg1[%c0_75, %c0_76, %c0_77, %c12] : memref<1x4x8x150xbf16, #tpu.memory_space<vmem>>, vector<1x1x8x128xbf16>
    %49 = vector.shape_cast %48 : vector<1x1x8x128xbf16> to vector<8x128xbf16>
    %c128 = arith.constant 128 : index
    %c0_78 = arith.constant 0 : index
    %50 = vector.load %arg7[%c128, %c0_78] : memref<288x128xbf16, #tpu.memory_space<vmem>>, vector<8x128xbf16>
    tpu.vector_store %arg7[%c128, %c0_78], %49 {strides = array<i32>} : memref<288x128xbf16, #tpu.memory_space<vmem>>, vector<8x128xbf16>,
    %c0_79 = arith.constant 0 : index
    %c1_80 = arith.constant 1 : index
    %c0_81 = arith.constant 0 : index
    %c12_82 = arith.constant 12 : index
    %51 = vector.load %arg1[%c0_79, %c1_80, %c0_81, %c12_82] : memref<1x4x8x150xbf16, #tpu.memory_space<vmem>>, vector<1x1x8x128xbf16>
    %52 = vector.shape_cast %51 : vector<1x1x8x128xbf16> to vector<8x128xbf16>
    %c136 = arith.constant 136 : index
    %c0_83 = arith.constant 0 : index
    %53 = vector.load %arg7[%c136, %c0_83] : memref<288x128xbf16, #tpu.memory_space<vmem>>, vector<8x128xbf16>
    tpu.vector_store %arg7[%c136, %c0_83], %52 {strides = array<i32>} : memref<288x128xbf16, #tpu.memory_space<vmem>>, vector<8x128xbf16>,
    %c0_84 = arith.constant 0 : index
    %c2_85 = arith.constant 2 : index
    %c0_86 = arith.constant 0 : index
    %c10_87 = arith.constant 10 : index
    %54 = vector.load %arg1[%c0_84, %c2_85, %c0_86, %c10_87] : memref<1x4x8x150xbf16, #tpu.memory_space<vmem>>, vector<1x1x8x128xbf16>
    %55 = vector.shape_cast %54 : vector<1x1x8x128xbf16> to vector<8x128xbf16>
    %c144 = arith.constant 144 : index
    %c0_88 = arith.constant 0 : index
    %56 = vector.load %arg7[%c144, %c0_88] : memref<288x128xbf16, #tpu.memory_space<vmem>>, vector<8x128xbf16>
    tpu.vector_store %arg7[%c144, %c0_88], %55 {strides = array<i32>} : memref<288x128xbf16, #tpu.memory_space<vmem>>, vector<8x128xbf16>,
    %c0_89 = arith.constant 0 : index
    %c3_90 = arith.constant 3 : index
    %c0_91 = arith.constant 0 : index
    %c10_92 = arith.constant 10 : index
    %57 = vector.load %arg1[%c0_89, %c3_90, %c0_91, %c10_92] : memref<1x4x8x150xbf16, #tpu.memory_space<vmem>>, vector<1x1x8x128xbf16>
    %58 = vector.shape_cast %57 : vector<1x1x8x128xbf16> to vector<8x128xbf16>
    %c152 = arith.constant 152 : index
    %c0_93 = arith.constant 0 : index
    %59 = vector.load %arg7[%c152, %c0_93] : memref<288x128xbf16, #tpu.memory_space<vmem>>, vector<8x128xbf16>
    tpu.vector_store %arg7[%c152, %c0_93], %58 {strides = array<i32>} : memref<288x128xbf16, #tpu.memory_space<vmem>>, vector<8x128xbf16>,
    %c0_94 = arith.constant 0 : index
    %c2_95 = arith.constant 2 : index
    %c0_96 = arith.constant 0 : index
    %c11_97 = arith.constant 11 : index
    %60 = vector.load %arg1[%c0_94, %c2_95, %c0_96, %c11_97] : memref<1x4x8x150xbf16, #tpu.memory_space<vmem>>, vector<1x1x8x128xbf16>
    %61 = vector.shape_cast %60 : vector<1x1x8x128xbf16> to vector<8x128xbf16>
    %c160 = arith.constant 160 : index
    %c0_98 = arith.constant 0 : index
    %62 = vector.load %arg7[%c160, %c0_98] : memref<288x128xbf16, #tpu.memory_space<vmem>>, vector<8x128xbf16>
    tpu.vector_store %arg7[%c160, %c0_98], %61 {strides = array<i32>} : memref<288x128xbf16, #tpu.memory_space<vmem>>, vector<8x128xbf16>,
    %c0_99 = arith.constant 0 : index
    %c3_100 = arith.constant 3 : index
    %c0_101 = arith.constant 0 : index
    %c11_102 = arith.constant 11 : index
    %63 = vector.load %arg1[%c0_99, %c3_100, %c0_101, %c11_102] : memref<1x4x8x150xbf16, #tpu.memory_space<vmem>>, vector<1x1x8x128xbf16>
    %64 = vector.shape_cast %63 : vector<1x1x8x128xbf16> to vector<8x128xbf16>
    %c168 = arith.constant 168 : index
    %c0_103 = arith.constant 0 : index
    %65 = vector.load %arg7[%c168, %c0_103] : memref<288x128xbf16, #tpu.memory_space<vmem>>, vector<8x128xbf16>
    tpu.vector_store %arg7[%c168, %c0_103], %64 {strides = array<i32>} : memref<288x128xbf16, #tpu.memory_space<vmem>>, vector<8x128xbf16>,
    %c0_104 = arith.constant 0 : index
    %c2_105 = arith.constant 2 : index
    %c0_106 = arith.constant 0 : index
    %c12_107 = arith.constant 12 : index
    %66 = vector.load %arg1[%c0_104, %c2_105, %c0_106, %c12_107] : memref<1x4x8x150xbf16, #tpu.memory_space<vmem>>, vector<1x1x8x128xbf16>
    %67 = vector.shape_cast %66 : vector<1x1x8x128xbf16> to vector<8x128xbf16>
    %c176 = arith.constant 176 : index
    %c0_108 = arith.constant 0 : index
    %68 = vector.load %arg7[%c176, %c0_108] : memref<288x128xbf16, #tpu.memory_space<vmem>>, vector<8x128xbf16>
    tpu.vector_store %arg7[%c176, %c0_108], %67 {strides = array<i32>} : memref<288x128xbf16, #tpu.memory_space<vmem>>, vector<8x128xbf16>,
    %c0_109 = arith.constant 0 : index
    %c3_110 = arith.constant 3 : index
    %c0_111 = arith.constant 0 : index
    %c12_112 = arith.constant 12 : index
    %69 = vector.load %arg1[%c0_109, %c3_110, %c0_111, %c12_112] : memref<1x4x8x150xbf16, #tpu.memory_space<vmem>>, vector<1x1x8x128xbf16>
    %70 = vector.shape_cast %69 : vector<1x1x8x128xbf16> to vector<8x128xbf16>
    %c184 = arith.constant 184 : index
    %c0_113 = arith.constant 0 : index
    %71 = vector.load %arg7[%c184, %c0_113] : memref<288x128xbf16, #tpu.memory_space<vmem>>, vector<8x128xbf16>
    tpu.vector_store %arg7[%c184, %c0_113], %70 {strides = array<i32>} : memref<288x128xbf16, #tpu.memory_space<vmem>>, vector<8x128xbf16>,
    %c0_114 = arith.constant 0 : index
    %c0_115 = arith.constant 0 : index
    %c0_116 = arith.constant 0 : index
    %c20 = arith.constant 20 : index
    %72 = vector.load %arg1[%c0_114, %c0_115, %c0_116, %c20] : memref<1x4x8x150xbf16, #tpu.memory_space<vmem>>, vector<1x1x8x128xbf16>
    %73 = vector.shape_cast %72 : vector<1x1x8x128xbf16> to vector<8x128xbf16>
    %c192 = arith.constant 192 : index
    %c0_117 = arith.constant 0 : index
    %74 = vector.load %arg7[%c192, %c0_117] : memref<288x128xbf16, #tpu.memory_space<vmem>>, vector<8x128xbf16>
    tpu.vector_store %arg7[%c192, %c0_117], %73 {strides = array<i32>} : memref<288x128xbf16, #tpu.memory_space<vmem>>, vector<8x128xbf16>,
    %c0_118 = arith.constant 0 : index
    %c1_119 = arith.constant 1 : index
    %c0_120 = arith.constant 0 : index
    %c20_121 = arith.constant 20 : index
    %75 = vector.load %arg1[%c0_118, %c1_119, %c0_120, %c20_121] : memref<1x4x8x150xbf16, #tpu.memory_space<vmem>>, vector<1x1x8x128xbf16>
    %76 = vector.shape_cast %75 : vector<1x1x8x128xbf16> to vector<8x128xbf16>
    %c200 = arith.constant 200 : index
    %c0_122 = arith.constant 0 : index
    %77 = vector.load %arg7[%c200, %c0_122] : memref<288x128xbf16, #tpu.memory_space<vmem>>, vector<8x128xbf16>
    tpu.vector_store %arg7[%c200, %c0_122], %76 {strides = array<i32>} : memref<288x128xbf16, #tpu.memory_space<vmem>>, vector<8x128xbf16>,
    %c0_123 = arith.constant 0 : index
    %c0_124 = arith.constant 0 : index
    %c0_125 = arith.constant 0 : index
    %c21 = arith.constant 21 : index
    %78 = vector.load %arg1[%c0_123, %c0_124, %c0_125, %c21] : memref<1x4x8x150xbf16, #tpu.memory_space<vmem>>, vector<1x1x8x128xbf16>
    %79 = vector.shape_cast %78 : vector<1x1x8x128xbf16> to vector<8x128xbf16>
    %c208 = arith.constant 208 : index
    %c0_126 = arith.constant 0 : index
    %80 = vector.load %arg7[%c208, %c0_126] : memref<288x128xbf16, #tpu.memory_space<vmem>>, vector<8x128xbf16>
    tpu.vector_store %arg7[%c208, %c0_126], %79 {strides = array<i32>} : memref<288x128xbf16, #tpu.memory_space<vmem>>, vector<8x128xbf16>,
    %c0_127 = arith.constant 0 : index
    %c1_128 = arith.constant 1 : index
    %c0_129 = arith.constant 0 : index
    %c21_130 = arith.constant 21 : index
    %81 = vector.load %arg1[%c0_127, %c1_128, %c0_129, %c21_130] : memref<1x4x8x150xbf16, #tpu.memory_space<vmem>>, vector<1x1x8x128xbf16>
    %82 = vector.shape_cast %81 : vector<1x1x8x128xbf16> to vector<8x128xbf16>
    %c216 = arith.constant 216 : index
    %c0_131 = arith.constant 0 : index
    %83 = vector.load %arg7[%c216, %c0_131] : memref<288x128xbf16, #tpu.memory_space<vmem>>, vector<8x128xbf16>
    tpu.vector_store %arg7[%c216, %c0_131], %82 {strides = array<i32>} : memref<288x128xbf16, #tpu.memory_space<vmem>>, vector<8x128xbf16>,
    %c0_132 = arith.constant 0 : index
    %c0_133 = arith.constant 0 : index
    %c0_134 = arith.constant 0 : index
    %c22 = arith.constant 22 : index
    %84 = vector.load %arg1[%c0_132, %c0_133, %c0_134, %c22] : memref<1x4x8x150xbf16, #tpu.memory_space<vmem>>, vector<1x1x8x128xbf16>
    %85 = vector.shape_cast %84 : vector<1x1x8x128xbf16> to vector<8x128xbf16>
    %c224 = arith.constant 224 : index
    %c0_135 = arith.constant 0 : index
    %86 = vector.load %arg7[%c224, %c0_135] : memref<288x128xbf16, #tpu.memory_space<vmem>>, vector<8x128xbf16>
    tpu.vector_store %arg7[%c224, %c0_135], %85 {strides = array<i32>} : memref<288x128xbf16, #tpu.memory_space<vmem>>, vector<8x128xbf16>,
    %c0_136 = arith.constant 0 : index
    %c1_137 = arith.constant 1 : index
    %c0_138 = arith.constant 0 : index
    %c22_139 = arith.constant 22 : index
    %87 = vector.load %arg1[%c0_136, %c1_137, %c0_138, %c22_139] : memref<1x4x8x150xbf16, #tpu.memory_space<vmem>>, vector<1x1x8x128xbf16>
    %88 = vector.shape_cast %87 : vector<1x1x8x128xbf16> to vector<8x128xbf16>
    %c232 = arith.constant 232 : index
    %c0_140 = arith.constant 0 : index
    %89 = vector.load %arg7[%c232, %c0_140] : memref<288x128xbf16, #tpu.memory_space<vmem>>, vector<8x128xbf16>
    tpu.vector_store %arg7[%c232, %c0_140], %88 {strides = array<i32>} : memref<288x128xbf16, #tpu.memory_space<vmem>>, vector<8x128xbf16>,
    %c0_141 = arith.constant 0 : index
    %c2_142 = arith.constant 2 : index
    %c0_143 = arith.constant 0 : index
    %c20_144 = arith.constant 20 : index
    %90 = vector.load %arg1[%c0_141, %c2_142, %c0_143, %c20_144] : memref<1x4x8x150xbf16, #tpu.memory_space<vmem>>, vector<1x1x8x128xbf16>
    %91 = vector.shape_cast %90 : vector<1x1x8x128xbf16> to vector<8x128xbf16>
    %c240 = arith.constant 240 : index
    %c0_145 = arith.constant 0 : index
    %92 = vector.load %arg7[%c240, %c0_145] : memref<288x128xbf16, #tpu.memory_space<vmem>>, vector<8x128xbf16>
    tpu.vector_store %arg7[%c240, %c0_145], %91 {strides = array<i32>} : memref<288x128xbf16, #tpu.memory_space<vmem>>, vector<8x128xbf16>,
    %c0_146 = arith.constant 0 : index
    %c3_147 = arith.constant 3 : index
    %c0_148 = arith.constant 0 : index
    %c20_149 = arith.constant 20 : index
    %93 = vector.load %arg1[%c0_146, %c3_147, %c0_148, %c20_149] : memref<1x4x8x150xbf16, #tpu.memory_space<vmem>>, vector<1x1x8x128xbf16>
    %94 = vector.shape_cast %93 : vector<1x1x8x128xbf16> to vector<8x128xbf16>
    %c248 = arith.constant 248 : index
    %c0_150 = arith.constant 0 : index
    %95 = vector.load %arg7[%c248, %c0_150] : memref<288x128xbf16, #tpu.memory_space<vmem>>, vector<8x128xbf16>
    tpu.vector_store %arg7[%c248, %c0_150], %94 {strides = array<i32>} : memref<288x128xbf16, #tpu.memory_space<vmem>>, vector<8x128xbf16>,
    %c0_151 = arith.constant 0 : index
    %c2_152 = arith.constant 2 : index
    %c0_153 = arith.constant 0 : index
    %c21_154 = arith.constant 21 : index
    %96 = vector.load %arg1[%c0_151, %c2_152, %c0_153, %c21_154] : memref<1x4x8x150xbf16, #tpu.memory_space<vmem>>, vector<1x1x8x128xbf16>
    %97 = vector.shape_cast %96 : vector<1x1x8x128xbf16> to vector<8x128xbf16>
    %c256 = arith.constant 256 : index
    %c0_155 = arith.constant 0 : index
    %98 = vector.load %arg7[%c256, %c0_155] : memref<288x128xbf16, #tpu.memory_space<vmem>>, vector<8x128xbf16>
    tpu.vector_store %arg7[%c256, %c0_155], %97 {strides = array<i32>} : memref<288x128xbf16, #tpu.memory_space<vmem>>, vector<8x128xbf16>,
    %c0_156 = arith.constant 0 : index
    %c3_157 = arith.constant 3 : index
    %c0_158 = arith.constant 0 : index
    %c21_159 = arith.constant 21 : index
    %99 = vector.load %arg1[%c0_156, %c3_157, %c0_158, %c21_159] : memref<1x4x8x150xbf16, #tpu.memory_space<vmem>>, vector<1x1x8x128xbf16>
    %100 = vector.shape_cast %99 : vector<1x1x8x128xbf16> to vector<8x128xbf16>
    %c264 = arith.constant 264 : index
    %c0_160 = arith.constant 0 : index
    %101 = vector.load %arg7[%c264, %c0_160] : memref<288x128xbf16, #tpu.memory_space<vmem>>, vector<8x128xbf16>
    tpu.vector_store %arg7[%c264, %c0_160], %100 {strides = array<i32>} : memref<288x128xbf16, #tpu.memory_space<vmem>>, vector<8x128xbf16>,
    %c0_161 = arith.constant 0 : index
    %c2_162 = arith.constant 2 : index
    %c0_163 = arith.constant 0 : index
    %c22_164 = arith.constant 22 : index
    %102 = vector.load %arg1[%c0_161, %c2_162, %c0_163, %c22_164] : memref<1x4x8x150xbf16, #tpu.memory_space<vmem>>, vector<1x1x8x128xbf16>
    %103 = vector.shape_cast %102 : vector<1x1x8x128xbf16> to vector<8x128xbf16>
    %c272 = arith.constant 272 : index
    %c0_165 = arith.constant 0 : index
    %104 = vector.load %arg7[%c272, %c0_165] : memref<288x128xbf16, #tpu.memory_space<vmem>>, vector<8x128xbf16>
    tpu.vector_store %arg7[%c272, %c0_165], %103 {strides = array<i32>} : memref<288x128xbf16, #tpu.memory_space<vmem>>, vector<8x128xbf16>,
    %c0_166 = arith.constant 0 : index
    %c3_167 = arith.constant 3 : index
    %c0_168 = arith.constant 0 : index
    %c22_169 = arith.constant 22 : index
    %105 = vector.load %arg1[%c0_166, %c3_167, %c0_168, %c22_169] : memref<1x4x8x150xbf16, #tpu.memory_space<vmem>>, vector<1x1x8x128xbf16>
    %106 = vector.shape_cast %105 : vector<1x1x8x128xbf16> to vector<8x128xbf16>
    %c280 = arith.constant 280 : index
    %c0_170 = arith.constant 0 : index
    %107 = vector.load %arg7[%c280, %c0_170] : memref<288x128xbf16, #tpu.memory_space<vmem>>, vector<8x128xbf16>
    tpu.vector_store %arg7[%c280, %c0_170], %106 {strides = array<i32>} : memref<288x128xbf16, #tpu.memory_space<vmem>>, vector<8x128xbf16>,
    %c0_171 = arith.constant 0 : index
    %c0_172 = arith.constant 0 : index
    %108 = vector.load %arg2[%c0_171, %c0_172] : memref<16x288xbf16, #tpu.memory_space<vmem>>, vector<16x288xbf16>
    %c0_173 = arith.constant 0 : index
    %c0_174 = arith.constant 0 : index
    %109 = vector.load %arg7[%c0_173, %c0_174] : memref<288x128xbf16, #tpu.memory_space<vmem>>, vector<288x128xbf16>
    %cst = arith.constant dense<0.000000e+00> : vector<16x128xf32>
    %110 = tpu.matmul %108, %109, %cst {dimension_numbers = #tpu.dot_dimension_numbers<[1], [0], [0], [1], [0, 0, 1, 1], [], []>} : vector<16x288xbf16>, vector<288x128xbf16>, vector<16x128xf32> -> vector<16x128xf32>
    %c0_175 = arith.constant 0 : index
    %c0_176 = arith.constant 0 : index
    %111 = vector.load %arg3[%c0_175, %c0_176] : memref<16x1xf32, #tpu.memory_space<vmem>>, vector<16x1xf32>
    %112 = vector.broadcast %111 : vector<16x1xf32> to vector<16x128xf32>
    %113 = arith.addf %110, %112 : vector<16x128xf32>
    %cst_177 = arith.constant 0.000000e+00 : f32
    %114 = vector.broadcast %cst_177 : f32 to vector<16x128xf32>
    %115 = arith.cmpf oge, %113, %114 : vector<16x128xf32>
    %cst_178 = arith.constant 2.000000e-01 : f32
    %116 = vector.broadcast %cst_178 : f32 to vector<16x128xf32>
    %117 = arith.mulf %116, %113 : vector<16x128xf32>
    %118 = arith.select %115, %113, %117 : vector<16x128xi1>, vector<16x128xf32>
    %cst_179 = arith.constant 1.41421354 : f32
    %119 = vector.broadcast %cst_179 : f32 to vector<16x128xf32>
    %120 = arith.mulf %118, %119 : vector<16x128xf32>
    %c0_180 = arith.constant 0 : index
    %c0_181 = arith.constant 0 : index
    %c0_182 = arith.constant 0 : index
    %c0_183 = arith.constant 0 : index
    %121 = vector.load %arg4[%c0_180, %c0_181, %c0_182, %c0_183] : memref<1x4x8x140xbf16, #tpu.memory_space<vmem>>, vector<1x1x8x128xbf16>
    %122 = vector.shape_cast %121 : vector<1x1x8x128xbf16> to vector<8x128xbf16>
    %c0_184 = arith.constant 0 : index
    %c0_185 = arith.constant 0 : index
    %123 = vector.load %arg8[%c0_184, %c0_185] : memref<128x128xbf16, #tpu.memory_space<vmem>>, vector<8x128xbf16>
    tpu.vector_store %arg8[%c0_184, %c0_185], %122 {strides = array<i32>} : memref<128x128xbf16, #tpu.memory_space<vmem>>, vector<8x128xbf16>,
    %c0_186 = arith.constant 0 : index
    %c1_187 = arith.constant 1 : index
    %c0_188 = arith.constant 0 : index
    %c0_189 = arith.constant 0 : index
    %124 = vector.load %arg4[%c0_186, %c1_187, %c0_188, %c0_189] : memref<1x4x8x140xbf16, #tpu.memory_space<vmem>>, vector<1x1x8x128xbf16>
    %125 = vector.shape_cast %124 : vector<1x1x8x128xbf16> to vector<8x128xbf16>
    %c8_190 = arith.constant 8 : index
    %c0_191 = arith.constant 0 : index
    %126 = vector.load %arg8[%c8_190, %c0_191] : memref<128x128xbf16, #tpu.memory_space<vmem>>, vector<8x128xbf16>
    tpu.vector_store %arg8[%c8_190, %c0_191], %125 {strides = array<i32>} : memref<128x128xbf16, #tpu.memory_space<vmem>>, vector<8x128xbf16>,
    %c0_192 = arith.constant 0 : index
    %c0_193 = arith.constant 0 : index
    %c0_194 = arith.constant 0 : index
    %c1_195 = arith.constant 1 : index
    %127 = vector.load %arg4[%c0_192, %c0_193, %c0_194, %c1_195] : memref<1x4x8x140xbf16, #tpu.memory_space<vmem>>, vector<1x1x8x128xbf16>
    %128 = vector.shape_cast %127 : vector<1x1x8x128xbf16> to vector<8x128xbf16>
    %c16_196 = arith.constant 16 : index
    %c0_197 = arith.constant 0 : index
    %129 = vector.load %arg8[%c16_196, %c0_197] : memref<128x128xbf16, #tpu.memory_space<vmem>>, vector<8x128xbf16>
    tpu.vector_store %arg8[%c16_196, %c0_197], %128 {strides = array<i32>} : memref<128x128xbf16, #tpu.memory_space<vmem>>, vector<8x128xbf16>,
    %c0_198 = arith.constant 0 : index
    %c1_199 = arith.constant 1 : index
    %c0_200 = arith.constant 0 : index
    %c1_201 = arith.constant 1 : index
    %130 = vector.load %arg4[%c0_198, %c1_199, %c0_200, %c1_201] : memref<1x4x8x140xbf16, #tpu.memory_space<vmem>>, vector<1x1x8x128xbf16>
    %131 = vector.shape_cast %130 : vector<1x1x8x128xbf16> to vector<8x128xbf16>
    %c24_202 = arith.constant 24 : index
    %c0_203 = arith.constant 0 : index
    %132 = vector.load %arg8[%c24_202, %c0_203] : memref<128x128xbf16, #tpu.memory_space<vmem>>, vector<8x128xbf16>
    tpu.vector_store %arg8[%c24_202, %c0_203], %131 {strides = array<i32>} : memref<128x128xbf16, #tpu.memory_space<vmem>>, vector<8x128xbf16>,
    %c0_204 = arith.constant 0 : index
    %c2_205 = arith.constant 2 : index
    %c0_206 = arith.constant 0 : index
    %c0_207 = arith.constant 0 : index
    %133 = vector.load %arg4[%c0_204, %c2_205, %c0_206, %c0_207] : memref<1x4x8x140xbf16, #tpu.memory_space<vmem>>, vector<1x1x8x128xbf16>
    %134 = vector.shape_cast %133 : vector<1x1x8x128xbf16> to vector<8x128xbf16>
    %c32_208 = arith.constant 32 : index
    %c0_209 = arith.constant 0 : index
    %135 = vector.load %arg8[%c32_208, %c0_209] : memref<128x128xbf16, #tpu.memory_space<vmem>>, vector<8x128xbf16>
    tpu.vector_store %arg8[%c32_208, %c0_209], %134 {strides = array<i32>} : memref<128x128xbf16, #tpu.memory_space<vmem>>, vector<8x128xbf16>,
    %c0_210 = arith.constant 0 : index
    %c3_211 = arith.constant 3 : index
    %c0_212 = arith.constant 0 : index
    %c0_213 = arith.constant 0 : index
    %136 = vector.load %arg4[%c0_210, %c3_211, %c0_212, %c0_213] : memref<1x4x8x140xbf16, #tpu.memory_space<vmem>>, vector<1x1x8x128xbf16>
    %137 = vector.shape_cast %136 : vector<1x1x8x128xbf16> to vector<8x128xbf16>
    %c40_214 = arith.constant 40 : index
    %c0_215 = arith.constant 0 : index
    %138 = vector.load %arg8[%c40_214, %c0_215] : memref<128x128xbf16, #tpu.memory_space<vmem>>, vector<8x128xbf16>
    tpu.vector_store %arg8[%c40_214, %c0_215], %137 {strides = array<i32>} : memref<128x128xbf16, #tpu.memory_space<vmem>>, vector<8x128xbf16>,
    %c0_216 = arith.constant 0 : index
    %c2_217 = arith.constant 2 : index
    %c0_218 = arith.constant 0 : index
    %c1_219 = arith.constant 1 : index
    %139 = vector.load %arg4[%c0_216, %c2_217, %c0_218, %c1_219] : memref<1x4x8x140xbf16, #tpu.memory_space<vmem>>, vector<1x1x8x128xbf16>
    %140 = vector.shape_cast %139 : vector<1x1x8x128xbf16> to vector<8x128xbf16>
    %c48_220 = arith.constant 48 : index
    %c0_221 = arith.constant 0 : index
    %141 = vector.load %arg8[%c48_220, %c0_221] : memref<128x128xbf16, #tpu.memory_space<vmem>>, vector<8x128xbf16>
    tpu.vector_store %arg8[%c48_220, %c0_221], %140 {strides = array<i32>} : memref<128x128xbf16, #tpu.memory_space<vmem>>, vector<8x128xbf16>,
    %c0_222 = arith.constant 0 : index
    %c3_223 = arith.constant 3 : index
    %c0_224 = arith.constant 0 : index
    %c1_225 = arith.constant 1 : index
    %142 = vector.load %arg4[%c0_222, %c3_223, %c0_224, %c1_225] : memref<1x4x8x140xbf16, #tpu.memory_space<vmem>>, vector<1x1x8x128xbf16>
    %143 = vector.shape_cast %142 : vector<1x1x8x128xbf16> to vector<8x128xbf16>
    %c56_226 = arith.constant 56 : index
    %c0_227 = arith.constant 0 : index
    %144 = vector.load %arg8[%c56_226, %c0_227] : memref<128x128xbf16, #tpu.memory_space<vmem>>, vector<8x128xbf16>
    tpu.vector_store %arg8[%c56_226, %c0_227], %143 {strides = array<i32>} : memref<128x128xbf16, #tpu.memory_space<vmem>>, vector<8x128xbf16>,
    %c0_228 = arith.constant 0 : index
    %c0_229 = arith.constant 0 : index
    %c0_230 = arith.constant 0 : index
    %c10_231 = arith.constant 10 : index
    %145 = vector.load %arg4[%c0_228, %c0_229, %c0_230, %c10_231] : memref<1x4x8x140xbf16, #tpu.memory_space<vmem>>, vector<1x1x8x128xbf16>
    %146 = vector.shape_cast %145 : vector<1x1x8x128xbf16> to vector<8x128xbf16>
    %c64_232 = arith.constant 64 : index
    %c0_233 = arith.constant 0 : index
    %147 = vector.load %arg8[%c64_232, %c0_233] : memref<128x128xbf16, #tpu.memory_space<vmem>>, vector<8x128xbf16>
    tpu.vector_store %arg8[%c64_232, %c0_233], %146 {strides = array<i32>} : memref<128x128xbf16, #tpu.memory_space<vmem>>, vector<8x128xbf16>,
    %c0_234 = arith.constant 0 : index
    %c1_235 = arith.constant 1 : index
    %c0_236 = arith.constant 0 : index
    %c10_237 = arith.constant 10 : index
    %148 = vector.load %arg4[%c0_234, %c1_235, %c0_236, %c10_237] : memref<1x4x8x140xbf16, #tpu.memory_space<vmem>>, vector<1x1x8x128xbf16>
    %149 = vector.shape_cast %148 : vector<1x1x8x128xbf16> to vector<8x128xbf16>
    %c72_238 = arith.constant 72 : index
    %c0_239 = arith.constant 0 : index
    %150 = vector.load %arg8[%c72_238, %c0_239] : memref<128x128xbf16, #tpu.memory_space<vmem>>, vector<8x128xbf16>
    tpu.vector_store %arg8[%c72_238, %c0_239], %149 {strides = array<i32>} : memref<128x128xbf16, #tpu.memory_space<vmem>>, vector<8x128xbf16>,
    %c0_240 = arith.constant 0 : index
    %c0_241 = arith.constant 0 : index
    %c0_242 = arith.constant 0 : index
    %c11_243 = arith.constant 11 : index
    %151 = vector.load %arg4[%c0_240, %c0_241, %c0_242, %c11_243] : memref<1x4x8x140xbf16, #tpu.memory_space<vmem>>, vector<1x1x8x128xbf16>
    %152 = vector.shape_cast %151 : vector<1x1x8x128xbf16> to vector<8x128xbf16>
    %c80_244 = arith.constant 80 : index
    %c0_245 = arith.constant 0 : index
    %153 = vector.load %arg8[%c80_244, %c0_245] : memref<128x128xbf16, #tpu.memory_space<vmem>>, vector<8x128xbf16>
    tpu.vector_store %arg8[%c80_244, %c0_245], %152 {strides = array<i32>} : memref<128x128xbf16, #tpu.memory_space<vmem>>, vector<8x128xbf16>,
    %c0_246 = arith.constant 0 : index
    %c1_247 = arith.constant 1 : index
    %c0_248 = arith.constant 0 : index
    %c11_249 = arith.constant 11 : index
    %154 = vector.load %arg4[%c0_246, %c1_247, %c0_248, %c11_249] : memref<1x4x8x140xbf16, #tpu.memory_space<vmem>>, vector<1x1x8x128xbf16>
    %155 = vector.shape_cast %154 : vector<1x1x8x128xbf16> to vector<8x128xbf16>
    %c88_250 = arith.constant 88 : index
    %c0_251 = arith.constant 0 : index
    %156 = vector.load %arg8[%c88_250, %c0_251] : memref<128x128xbf16, #tpu.memory_space<vmem>>, vector<8x128xbf16>
    tpu.vector_store %arg8[%c88_250, %c0_251], %155 {strides = array<i32>} : memref<128x128xbf16, #tpu.memory_space<vmem>>, vector<8x128xbf16>,
    %c0_252 = arith.constant 0 : index
    %c2_253 = arith.constant 2 : index
    %c0_254 = arith.constant 0 : index
    %c10_255 = arith.constant 10 : index
    %157 = vector.load %arg4[%c0_252, %c2_253, %c0_254, %c10_255] : memref<1x4x8x140xbf16, #tpu.memory_space<vmem>>, vector<1x1x8x128xbf16>
    %158 = vector.shape_cast %157 : vector<1x1x8x128xbf16> to vector<8x128xbf16>
    %c96_256 = arith.constant 96 : index
    %c0_257 = arith.constant 0 : index
    %159 = vector.load %arg8[%c96_256, %c0_257] : memref<128x128xbf16, #tpu.memory_space<vmem>>, vector<8x128xbf16>
    tpu.vector_store %arg8[%c96_256, %c0_257], %158 {strides = array<i32>} : memref<128x128xbf16, #tpu.memory_space<vmem>>, vector<8x128xbf16>,
    %c0_258 = arith.constant 0 : index
    %c3_259 = arith.constant 3 : index
    %c0_260 = arith.constant 0 : index
    %c10_261 = arith.constant 10 : index
    %160 = vector.load %arg4[%c0_258, %c3_259, %c0_260, %c10_261] : memref<1x4x8x140xbf16, #tpu.memory_space<vmem>>, vector<1x1x8x128xbf16>
    %161 = vector.shape_cast %160 : vector<1x1x8x128xbf16> to vector<8x128xbf16>
    %c104_262 = arith.constant 104 : index
    %c0_263 = arith.constant 0 : index
    %162 = vector.load %arg8[%c104_262, %c0_263] : memref<128x128xbf16, #tpu.memory_space<vmem>>, vector<8x128xbf16>
    tpu.vector_store %arg8[%c104_262, %c0_263], %161 {strides = array<i32>} : memref<128x128xbf16, #tpu.memory_space<vmem>>, vector<8x128xbf16>,
    %c0_264 = arith.constant 0 : index
    %c2_265 = arith.constant 2 : index
    %c0_266 = arith.constant 0 : index
    %c11_267 = arith.constant 11 : index
    %163 = vector.load %arg4[%c0_264, %c2_265, %c0_266, %c11_267] : memref<1x4x8x140xbf16, #tpu.memory_space<vmem>>, vector<1x1x8x128xbf16>
    %164 = vector.shape_cast %163 : vector<1x1x8x128xbf16> to vector<8x128xbf16>
    %c112_268 = arith.constant 112 : index
    %c0_269 = arith.constant 0 : index
    %165 = vector.load %arg8[%c112_268, %c0_269] : memref<128x128xbf16, #tpu.memory_space<vmem>>, vector<8x128xbf16>
    tpu.vector_store %arg8[%c112_268, %c0_269], %164 {strides = array<i32>} : memref<128x128xbf16, #tpu.memory_space<vmem>>, vector<8x128xbf16>,
    %c0_270 = arith.constant 0 : index
    %c3_271 = arith.constant 3 : index
    %c0_272 = arith.constant 0 : index
    %c11_273 = arith.constant 11 : index
    %166 = vector.load %arg4[%c0_270, %c3_271, %c0_272, %c11_273] : memref<1x4x8x140xbf16, #tpu.memory_space<vmem>>, vector<1x1x8x128xbf16>
    %167 = vector.shape_cast %166 : vector<1x1x8x128xbf16> to vector<8x128xbf16>
    %c120_274 = arith.constant 120 : index
    %c0_275 = arith.constant 0 : index
    %168 = vector.load %arg8[%c120_274, %c0_275] : memref<128x128xbf16, #tpu.memory_space<vmem>>, vector<8x128xbf16>
    tpu.vector_store %arg8[%c120_274, %c0_275], %167 {strides = array<i32>} : memref<128x128xbf16, #tpu.memory_space<vmem>>, vector<8x128xbf16>,
    %c0_276 = arith.constant 0 : index
    %c0_277 = arith.constant 0 : index
    %169 = vector.load %arg5[%c0_276, %c0_277] : memref<16x128xbf16, #tpu.memory_space<vmem>>, vector<16x128xbf16>
    %c0_278 = arith.constant 0 : index
    %c0_279 = arith.constant 0 : index
    %170 = vector.load %arg8[%c0_278, %c0_279] : memref<128x128xbf16, #tpu.memory_space<vmem>>, vector<128x128xbf16>
    %cst_280 = arith.constant dense<0.000000e+00> : vector<16x128xf32>
    %171 = tpu.matmul %169, %170, %cst_280 {dimension_numbers = #tpu.dot_dimension_numbers<[1], [0], [0], [1], [0, 0, 1, 1], [], []>} : vector<16x128xbf16>, vector<128x128xbf16>, vector<16x128xf32> -> vector<16x128xf32>
    %172 = arith.addf %120, %171 : vector<16x128xf32>
    %cst_281 = arith.constant 0.707106769 : f32
    %173 = vector.broadcast %cst_281 : f32 to vector<16x128xf32>
    %174 = arith.mulf %172, %173 : vector<16x128xf32>
    %175 = arith.truncf %174 : vector<16x128xf32> to vector<16x128xbf16>
    %c0_282 = arith.constant 0 : index
    %c0_283 = arith.constant 0 : index
    %c0_284 = arith.constant 0 : index
    %176 = vector.load %arg6[%c0_282, %c0_283, %c0_284] : memref<1x16x128xbf16, #tpu.memory_space<vmem>>, vector<1x16x128xbf16>
    %177 = vector.shape_cast %176 : vector<1x16x128xbf16> to vector<16x128xbf16>
    %178 = vector.shape_cast %175 : vector<16x128xbf16> to vector<1x16x128xbf16>
    tpu.vector_store %arg6[%c0_282, %c0_283, %c0_284], %178 {strides = array<i32>} : memref<1x16x128xbf16, #tpu.memory_space<vmem>>, vector<1x16x128xbf16>,
    return
  }
  func.func @transform_0(%arg0: i32) -> (i32, i32, i32, i32) {
    %c0_i32 = arith.constant 0 : i32
    %c0_i32_0 = arith.constant 0 : i32
    %c0_i32_1 = arith.constant 0 : i32
    %c0_i32_2 = arith.constant 0 : i32
    return %arg0, %c0_i32, %c0_i32_0, %c0_i32_1 : i32, i32, i32, i32
  }
  func.func @transform_1(%arg0: i32) -> (i32, i32) {
    %c0_i32 = arith.constant 0 : i32
    %c0_i32_0 = arith.constant 0 : i32
    %c0_i32_1 = arith.constant 0 : i32
    return %c0_i32, %c0_i32_0 : i32, i32
  }
  func.func @transform_2(%arg0: i32) -> (i32, i32) {
    %c0_i32 = arith.constant 0 : i32
    %c0_i32_0 = arith.constant 0 : i32
    %c0_i32_1 = arith.constant 0 : i32
    return %c0_i32, %c0_i32_0 : i32, i32
  }
  func.func @transform_3(%arg0: i32) -> (i32, i32, i32, i32) {
    %c0_i32 = arith.constant 0 : i32
    %c0_i32_0 = arith.constant 0 : i32
    %c0_i32_1 = arith.constant 0 : i32
    %c0_i32_2 = arith.constant 0 : i32
    return %arg0, %c0_i32, %c0_i32_0, %c0_i32_1 : i32, i32, i32, i32
  }
  func.func @transform_4(%arg0: i32) -> (i32, i32) {
    %c0_i32 = arith.constant 0 : i32
    %c0_i32_0 = arith.constant 0 : i32
    %c0_i32_1 = arith.constant 0 : i32
    return %c0_i32, %c0_i32_0 : i32, i32
  }
  func.func @transform_5(%arg0: i32) -> (i32, i32, i32) {
    %c0_i32 = arith.constant 0 : i32
    %c0_i32_0 = arith.constant 0 : i32
    %c0_i32_1 = arith.constant 0 : i32
    return %arg0, %c0_i32, %c0_i32_0 : i32, i32, i32
  }
}

module attributes {stable_mosaic.version = 11 : i64} {
  func.func @_conv_kernel(%arg0: i32, %arg1: memref<1x1x16x150xbf16, #tpu.memory_space<vmem>>, %arg2: memref<16x144xbf16, #tpu.memory_space<vmem>>, %arg3: memref<16x1xf32, #tpu.memory_space<vmem>>, %arg4: memref<1x16x128xbf16, #tpu.memory_space<vmem>>, %arg5: memref<144x128xbf16, #tpu.memory_space<vmem>>) attributes {dimension_semantics = [#tpu.dimension_semantics<parallel>], iteration_bounds = array<i64: 2>, scalar_prefetch = 0 : i64, scratch_operands = 1 : i64, tpu.core_type = #tpu.core_type<tc>, window_params = [{transform_indices = @transform_0, window_bounds = array<i64: 1, 1, 16, 150>}, {pipeline_mode = #tpu.pipeline_mode<synchronous>, transform_indices = @transform_1, window_bounds = array<i64: 16, 144>}, {pipeline_mode = #tpu.pipeline_mode<synchronous>, transform_indices = @transform_2, window_bounds = array<i64: 16, 1>}, {transform_indices = @transform_3, window_bounds = array<i64: 1, 16, 128>}]} {
    %c0 = arith.constant 0 : index
    %c0_0 = arith.constant 0 : index
    %c0_1 = arith.constant 0 : index
    %c0_2 = arith.constant 0 : index
    %0 = vector.load %arg1[%c0, %c0_0, %c0_1, %c0_2] : memref<1x1x16x150xbf16, #tpu.memory_space<vmem>>, vector<1x1x16x128xbf16>
    %1 = vector.shape_cast %0 : vector<1x1x16x128xbf16> to vector<16x128xbf16>
    %c0_3 = arith.constant 0 : index
    %c0_4 = arith.constant 0 : index
    %2 = vector.load %arg5[%c0_3, %c0_4] : memref<144x128xbf16, #tpu.memory_space<vmem>>, vector<16x128xbf16>
    tpu.vector_store %arg5[%c0_3, %c0_4], %1 {strides = array<i32>} : memref<144x128xbf16, #tpu.memory_space<vmem>>, vector<16x128xbf16>,
    %c0_5 = arith.constant 0 : index
    %c0_6 = arith.constant 0 : index
    %c0_7 = arith.constant 0 : index
    %c1 = arith.constant 1 : index
    %3 = vector.load %arg1[%c0_5, %c0_6, %c0_7, %c1] : memref<1x1x16x150xbf16, #tpu.memory_space<vmem>>, vector<1x1x16x128xbf16>
    %4 = vector.shape_cast %3 : vector<1x1x16x128xbf16> to vector<16x128xbf16>
    %c16 = arith.constant 16 : index
    %c0_8 = arith.constant 0 : index
    %5 = vector.load %arg5[%c16, %c0_8] : memref<144x128xbf16, #tpu.memory_space<vmem>>, vector<16x128xbf16>
    tpu.vector_store %arg5[%c16, %c0_8], %4 {strides = array<i32>} : memref<144x128xbf16, #tpu.memory_space<vmem>>, vector<16x128xbf16>,
    %c0_9 = arith.constant 0 : index
    %c0_10 = arith.constant 0 : index
    %c0_11 = arith.constant 0 : index
    %c2 = arith.constant 2 : index
    %6 = vector.load %arg1[%c0_9, %c0_10, %c0_11, %c2] : memref<1x1x16x150xbf16, #tpu.memory_space<vmem>>, vector<1x1x16x128xbf16>
    %7 = vector.shape_cast %6 : vector<1x1x16x128xbf16> to vector<16x128xbf16>
    %c32 = arith.constant 32 : index
    %c0_12 = arith.constant 0 : index
    %8 = vector.load %arg5[%c32, %c0_12] : memref<144x128xbf16, #tpu.memory_space<vmem>>, vector<16x128xbf16>
    tpu.vector_store %arg5[%c32, %c0_12], %7 {strides = array<i32>} : memref<144x128xbf16, #tpu.memory_space<vmem>>, vector<16x128xbf16>,
    %c0_13 = arith.constant 0 : index
    %c0_14 = arith.constant 0 : index
    %c0_15 = arith.constant 0 : index
    %c10 = arith.constant 10 : index
    %9 = vector.load %arg1[%c0_13, %c0_14, %c0_15, %c10] : memref<1x1x16x150xbf16, #tpu.memory_space<vmem>>, vector<1x1x16x128xbf16>
    %10 = vector.shape_cast %9 : vector<1x1x16x128xbf16> to vector<16x128xbf16>
    %c48 = arith.constant 48 : index
    %c0_16 = arith.constant 0 : index
    %11 = vector.load %arg5[%c48, %c0_16] : memref<144x128xbf16, #tpu.memory_space<vmem>>, vector<16x128xbf16>
    tpu.vector_store %arg5[%c48, %c0_16], %10 {strides = array<i32>} : memref<144x128xbf16, #tpu.memory_space<vmem>>, vector<16x128xbf16>,
    %c0_17 = arith.constant 0 : index
    %c0_18 = arith.constant 0 : index
    %c0_19 = arith.constant 0 : index
    %c11 = arith.constant 11 : index
    %12 = vector.load %arg1[%c0_17, %c0_18, %c0_19, %c11] : memref<1x1x16x150xbf16, #tpu.memory_space<vmem>>, vector<1x1x16x128xbf16>
    %13 = vector.shape_cast %12 : vector<1x1x16x128xbf16> to vector<16x128xbf16>
    %c64 = arith.constant 64 : index
    %c0_20 = arith.constant 0 : index
    %14 = vector.load %arg5[%c64, %c0_20] : memref<144x128xbf16, #tpu.memory_space<vmem>>, vector<16x128xbf16>
    tpu.vector_store %arg5[%c64, %c0_20], %13 {strides = array<i32>} : memref<144x128xbf16, #tpu.memory_space<vmem>>, vector<16x128xbf16>,
    %c0_21 = arith.constant 0 : index
    %c0_22 = arith.constant 0 : index
    %c0_23 = arith.constant 0 : index
    %c12 = arith.constant 12 : index
    %15 = vector.load %arg1[%c0_21, %c0_22, %c0_23, %c12] : memref<1x1x16x150xbf16, #tpu.memory_space<vmem>>, vector<1x1x16x128xbf16>
    %16 = vector.shape_cast %15 : vector<1x1x16x128xbf16> to vector<16x128xbf16>
    %c80 = arith.constant 80 : index
    %c0_24 = arith.constant 0 : index
    %17 = vector.load %arg5[%c80, %c0_24] : memref<144x128xbf16, #tpu.memory_space<vmem>>, vector<16x128xbf16>
    tpu.vector_store %arg5[%c80, %c0_24], %16 {strides = array<i32>} : memref<144x128xbf16, #tpu.memory_space<vmem>>, vector<16x128xbf16>,
    %c0_25 = arith.constant 0 : index
    %c0_26 = arith.constant 0 : index
    %c0_27 = arith.constant 0 : index
    %c20 = arith.constant 20 : index
    %18 = vector.load %arg1[%c0_25, %c0_26, %c0_27, %c20] : memref<1x1x16x150xbf16, #tpu.memory_space<vmem>>, vector<1x1x16x128xbf16>
    %19 = vector.shape_cast %18 : vector<1x1x16x128xbf16> to vector<16x128xbf16>
    %c96 = arith.constant 96 : index
    %c0_28 = arith.constant 0 : index
    %20 = vector.load %arg5[%c96, %c0_28] : memref<144x128xbf16, #tpu.memory_space<vmem>>, vector<16x128xbf16>
    tpu.vector_store %arg5[%c96, %c0_28], %19 {strides = array<i32>} : memref<144x128xbf16, #tpu.memory_space<vmem>>, vector<16x128xbf16>,
    %c0_29 = arith.constant 0 : index
    %c0_30 = arith.constant 0 : index
    %c0_31 = arith.constant 0 : index
    %c21 = arith.constant 21 : index
    %21 = vector.load %arg1[%c0_29, %c0_30, %c0_31, %c21] : memref<1x1x16x150xbf16, #tpu.memory_space<vmem>>, vector<1x1x16x128xbf16>
    %22 = vector.shape_cast %21 : vector<1x1x16x128xbf16> to vector<16x128xbf16>
    %c112 = arith.constant 112 : index
    %c0_32 = arith.constant 0 : index
    %23 = vector.load %arg5[%c112, %c0_32] : memref<144x128xbf16, #tpu.memory_space<vmem>>, vector<16x128xbf16>
    tpu.vector_store %arg5[%c112, %c0_32], %22 {strides = array<i32>} : memref<144x128xbf16, #tpu.memory_space<vmem>>, vector<16x128xbf16>,
    %c0_33 = arith.constant 0 : index
    %c0_34 = arith.constant 0 : index
    %c0_35 = arith.constant 0 : index
    %c22 = arith.constant 22 : index
    %24 = vector.load %arg1[%c0_33, %c0_34, %c0_35, %c22] : memref<1x1x16x150xbf16, #tpu.memory_space<vmem>>, vector<1x1x16x128xbf16>
    %25 = vector.shape_cast %24 : vector<1x1x16x128xbf16> to vector<16x128xbf16>
    %c128 = arith.constant 128 : index
    %c0_36 = arith.constant 0 : index
    %26 = vector.load %arg5[%c128, %c0_36] : memref<144x128xbf16, #tpu.memory_space<vmem>>, vector<16x128xbf16>
    tpu.vector_store %arg5[%c128, %c0_36], %25 {strides = array<i32>} : memref<144x128xbf16, #tpu.memory_space<vmem>>, vector<16x128xbf16>,
    %c0_37 = arith.constant 0 : index
    %c0_38 = arith.constant 0 : index
    %27 = vector.load %arg2[%c0_37, %c0_38] : memref<16x144xbf16, #tpu.memory_space<vmem>>, vector<16x144xbf16>
    %c0_39 = arith.constant 0 : index
    %c0_40 = arith.constant 0 : index
    %28 = vector.load %arg5[%c0_39, %c0_40] : memref<144x128xbf16, #tpu.memory_space<vmem>>, vector<144x128xbf16>
    %cst = arith.constant dense<0.000000e+00> : vector<16x128xf32>
    %29 = tpu.matmul %27, %28, %cst {dimension_numbers = #tpu.dot_dimension_numbers<[1], [0], [0], [1], [0, 0, 1, 1], [], []>} : vector<16x144xbf16>, vector<144x128xbf16>, vector<16x128xf32> -> vector<16x128xf32>
    %c0_41 = arith.constant 0 : index
    %c0_42 = arith.constant 0 : index
    %30 = vector.load %arg3[%c0_41, %c0_42] : memref<16x1xf32, #tpu.memory_space<vmem>>, vector<16x1xf32>
    %31 = vector.broadcast %30 : vector<16x1xf32> to vector<16x128xf32>
    %32 = arith.addf %29, %31 : vector<16x128xf32>
    %cst_43 = arith.constant 0.000000e+00 : f32
    %33 = vector.broadcast %cst_43 : f32 to vector<16x128xf32>
    %34 = arith.cmpf oge, %32, %33 : vector<16x128xf32>
    %cst_44 = arith.constant 2.000000e-01 : f32
    %35 = vector.broadcast %cst_44 : f32 to vector<16x128xf32>
    %36 = arith.mulf %35, %32 : vector<16x128xf32>
    %37 = arith.select %34, %32, %36 : vector<16x128xi1>, vector<16x128xf32>
    %cst_45 = arith.constant 1.41421354 : f32
    %38 = vector.broadcast %cst_45 : f32 to vector<16x128xf32>
    %39 = arith.mulf %37, %38 : vector<16x128xf32>
    %40 = arith.truncf %39 : vector<16x128xf32> to vector<16x128xbf16>
    %c0_46 = arith.constant 0 : index
    %c0_47 = arith.constant 0 : index
    %c0_48 = arith.constant 0 : index
    %41 = vector.load %arg4[%c0_46, %c0_47, %c0_48] : memref<1x16x128xbf16, #tpu.memory_space<vmem>>, vector<1x16x128xbf16>
    %42 = vector.shape_cast %41 : vector<1x16x128xbf16> to vector<16x128xbf16>
    %43 = vector.shape_cast %40 : vector<16x128xbf16> to vector<1x16x128xbf16>
    tpu.vector_store %arg4[%c0_46, %c0_47, %c0_48], %43 {strides = array<i32>} : memref<1x16x128xbf16, #tpu.memory_space<vmem>>, vector<1x16x128xbf16>,
    return
  }
  func.func @transform_0(%arg0: i32) -> (i32, i32, i32, i32) {
    %c0_i32 = arith.constant 0 : i32
    %c0_i32_0 = arith.constant 0 : i32
    %c0_i32_1 = arith.constant 0 : i32
    %c0_i32_2 = arith.constant 0 : i32
    return %arg0, %c0_i32, %c0_i32_0, %c0_i32_1 : i32, i32, i32, i32
  }
  func.func @transform_1(%arg0: i32) -> (i32, i32) {
    %c0_i32 = arith.constant 0 : i32
    %c0_i32_0 = arith.constant 0 : i32
    %c0_i32_1 = arith.constant 0 : i32
    return %c0_i32, %c0_i32_0 : i32, i32
  }
  func.func @transform_2(%arg0: i32) -> (i32, i32) {
    %c0_i32 = arith.constant 0 : i32
    %c0_i32_0 = arith.constant 0 : i32
    %c0_i32_1 = arith.constant 0 : i32
    return %c0_i32, %c0_i32_0 : i32, i32
  }
  func.func @transform_3(%arg0: i32) -> (i32, i32, i32) {
    %c0_i32 = arith.constant 0 : i32
    %c0_i32_0 = arith.constant 0 : i32
    %c0_i32_1 = arith.constant 0 : i32
    return %arg0, %c0_i32, %c0_i32_0 : i32, i32, i32
  }
}

module attributes {stable_mosaic.version = 11 : i64} {
  func.func @_conv_kernel(%arg0: i32, %arg1: memref<1x4x16x144xbf16, #tpu.memory_space<vmem>>, %arg2: memref<32x576xbf16, #tpu.memory_space<vmem>>, %arg3: memref<32x1xf32, #tpu.memory_space<vmem>>, %arg4: memref<1x4x16x138xbf16, #tpu.memory_space<vmem>>, %arg5: memref<32x256xbf16, #tpu.memory_space<vmem>>, %arg6: memref<1x32x128xbf16, #tpu.memory_space<vmem>>, %arg7: memref<576x128xbf16, #tpu.memory_space<vmem>>, %arg8: memref<256x128xbf16, #tpu.memory_space<vmem>>) attributes {dimension_semantics = [#tpu.dimension_semantics<parallel>], iteration_bounds = array<i64: 2>, scalar_prefetch = 0 : i64, scratch_operands = 2 : i64, tpu.core_type = #tpu.core_type<tc>, window_params = [{transform_indices = @transform_0, window_bounds = array<i64: 1, 4, 16, 144>}, {pipeline_mode = #tpu.pipeline_mode<synchronous>, transform_indices = @transform_1, window_bounds = array<i64: 32, 576>}, {pipeline_mode = #tpu.pipeline_mode<synchronous>, transform_indices = @transform_2, window_bounds = array<i64: 32, 1>}, {transform_indices = @transform_3, window_bounds = array<i64: 1, 4, 16, 138>}, {pipeline_mode = #tpu.pipeline_mode<synchronous>, transform_indices = @transform_4, window_bounds = array<i64: 32, 256>}, {transform_indices = @transform_5, window_bounds = array<i64: 1, 32, 128>}]} {
    %c0 = arith.constant 0 : index
    %c0_0 = arith.constant 0 : index
    %c0_1 = arith.constant 0 : index
    %c0_2 = arith.constant 0 : index
    %0 = vector.load %arg1[%c0, %c0_0, %c0_1, %c0_2] : memref<1x4x16x144xbf16, #tpu.memory_space<vmem>>, vector<1x1x16x128xbf16>
    %1 = vector.shape_cast %0 : vector<1x1x16x128xbf16> to vector<16x128xbf16>
    %c0_3 = arith.constant 0 : index
    %c0_4 = arith.constant 0 : index
    %2 = vector.load %arg7[%c0_3, %c0_4] : memref<576x128xbf16, #tpu.memory_space<vmem>>, vector<16x128xbf16>
    tpu.vector_store %arg7[%c0_3, %c0_4], %1 {strides = array<i32>} : memref<576x128xbf16, #tpu.memory_space<vmem>>, vector<16x128xbf16>,
    %c0_5 = arith.constant 0 : index
    %c1 = arith.constant 1 : index
    %c0_6 = arith.constant 0 : index
    %c0_7 = arith.constant 0 : index
    %3 = vector.load %arg1[%c0_5, %c1, %c0_6, %c0_7] : memref<1x4x16x144xbf16, #tpu.memory_space<vmem>>, vector<1x1x16x128xbf16>
    %4 = vector.shape_cast %3 : vector<1x1x16x128xbf16> to vector<16x128xbf16>
    %c16 = arith.constant 16 : index
    %c0_8 = arith.constant 0 : index
    %5 = vector.load %arg7[%c16, %c0_8] : memref<576x128xbf16, #tpu.memory_space<vmem>>, vector<16x128xbf16>
    tpu.vector_store %arg7[%c16, %c0_8], %4 {strides = array<i32>} : memref<576x128xbf16, #tpu.memory_space<vmem>>, vector<16x128xbf16>,
    %c0_9 = arith.constant 0 : index
    %c0_10 = arith.constant 0 : index
    %c0_11 = arith.constant 0 : index
    %c1_12 = arith.constant 1 : index
    %6 = vector.load %arg1[%c0_9, %c0_10, %c0_11, %c1_12] : memref<1x4x16x144xbf16, #tpu.memory_space<vmem>>, vector<1x1x16x128xbf16>
    %7 = vector.shape_cast %6 : vector<1x1x16x128xbf16> to vector<16x128xbf16>
    %c32 = arith.constant 32 : index
    %c0_13 = arith.constant 0 : index
    %8 = vector.load %arg7[%c32, %c0_13] : memref<576x128xbf16, #tpu.memory_space<vmem>>, vector<16x128xbf16>
    tpu.vector_store %arg7[%c32, %c0_13], %7 {strides = array<i32>} : memref<576x128xbf16, #tpu.memory_space<vmem>>, vector<16x128xbf16>,
    %c0_14 = arith.constant 0 : index
    %c1_15 = arith.constant 1 : index
    %c0_16 = arith.constant 0 : index
    %c1_17 = arith.constant 1 : index
    %9 = vector.load %arg1[%c0_14, %c1_15, %c0_16, %c1_17] : memref<1x4x16x144xbf16, #tpu.memory_space<vmem>>, vector<1x1x16x128xbf16>
    %10 = vector.shape_cast %9 : vector<1x1x16x128xbf16> to vector<16x128xbf16>
    %c48 = arith.constant 48 : index
    %c0_18 = arith.constant 0 : index
    %11 = vector.load %arg7[%c48, %c0_18] : memref<576x128xbf16, #tpu.memory_space<vmem>>, vector<16x128xbf16>
    tpu.vector_store %arg7[%c48, %c0_18], %10 {strides = array<i32>} : memref<576x128xbf16, #tpu.memory_space<vmem>>, vector<16x128xbf16>,
    %c0_19 = arith.constant 0 : index
    %c0_20 = arith.constant 0 : index
    %c0_21 = arith.constant 0 : index
    %c2 = arith.constant 2 : index
    %12 = vector.load %arg1[%c0_19, %c0_20, %c0_21, %c2] : memref<1x4x16x144xbf16, #tpu.memory_space<vmem>>, vector<1x1x16x128xbf16>
    %13 = vector.shape_cast %12 : vector<1x1x16x128xbf16> to vector<16x128xbf16>
    %c64 = arith.constant 64 : index
    %c0_22 = arith.constant 0 : index
    %14 = vector.load %arg7[%c64, %c0_22] : memref<576x128xbf16, #tpu.memory_space<vmem>>, vector<16x128xbf16>
    tpu.vector_store %arg7[%c64, %c0_22], %13 {strides = array<i32>} : memref<576x128xbf16, #tpu.memory_space<vmem>>, vector<16x128xbf16>,
    %c0_23 = arith.constant 0 : index
    %c1_24 = arith.constant 1 : index
    %c0_25 = arith.constant 0 : index
    %c2_26 = arith.constant 2 : index
    %15 = vector.load %arg1[%c0_23, %c1_24, %c0_25, %c2_26] : memref<1x4x16x144xbf16, #tpu.memory_space<vmem>>, vector<1x1x16x128xbf16>
    %16 = vector.shape_cast %15 : vector<1x1x16x128xbf16> to vector<16x128xbf16>
    %c80 = arith.constant 80 : index
    %c0_27 = arith.constant 0 : index
    %17 = vector.load %arg7[%c80, %c0_27] : memref<576x128xbf16, #tpu.memory_space<vmem>>, vector<16x128xbf16>
    tpu.vector_store %arg7[%c80, %c0_27], %16 {strides = array<i32>} : memref<576x128xbf16, #tpu.memory_space<vmem>>, vector<16x128xbf16>,
    %c0_28 = arith.constant 0 : index
    %c2_29 = arith.constant 2 : index
    %c0_30 = arith.constant 0 : index
    %c0_31 = arith.constant 0 : index
    %18 = vector.load %arg1[%c0_28, %c2_29, %c0_30, %c0_31] : memref<1x4x16x144xbf16, #tpu.memory_space<vmem>>, vector<1x1x16x128xbf16>
    %19 = vector.shape_cast %18 : vector<1x1x16x128xbf16> to vector<16x128xbf16>
    %c96 = arith.constant 96 : index
    %c0_32 = arith.constant 0 : index
    %20 = vector.load %arg7[%c96, %c0_32] : memref<576x128xbf16, #tpu.memory_space<vmem>>, vector<16x128xbf16>
    tpu.vector_store %arg7[%c96, %c0_32], %19 {strides = array<i32>} : memref<576x128xbf16, #tpu.memory_space<vmem>>, vector<16x128xbf16>,
    %c0_33 = arith.constant 0 : index
    %c3 = arith.constant 3 : index
    %c0_34 = arith.constant 0 : index
    %c0_35 = arith.constant 0 : index
    %21 = vector.load %arg1[%c0_33, %c3, %c0_34, %c0_35] : memref<1x4x16x144xbf16, #tpu.memory_space<vmem>>, vector<1x1x16x128xbf16>
    %22 = vector.shape_cast %21 : vector<1x1x16x128xbf16> to vector<16x128xbf16>
    %c112 = arith.constant 112 : index
    %c0_36 = arith.constant 0 : index
    %23 = vector.load %arg7[%c112, %c0_36] : memref<576x128xbf16, #tpu.memory_space<vmem>>, vector<16x128xbf16>
    tpu.vector_store %arg7[%c112, %c0_36], %22 {strides = array<i32>} : memref<576x128xbf16, #tpu.memory_space<vmem>>, vector<16x128xbf16>,
    %c0_37 = arith.constant 0 : index
    %c2_38 = arith.constant 2 : index
    %c0_39 = arith.constant 0 : index
    %c1_40 = arith.constant 1 : index
    %24 = vector.load %arg1[%c0_37, %c2_38, %c0_39, %c1_40] : memref<1x4x16x144xbf16, #tpu.memory_space<vmem>>, vector<1x1x16x128xbf16>
    %25 = vector.shape_cast %24 : vector<1x1x16x128xbf16> to vector<16x128xbf16>
    %c128 = arith.constant 128 : index
    %c0_41 = arith.constant 0 : index
    %26 = vector.load %arg7[%c128, %c0_41] : memref<576x128xbf16, #tpu.memory_space<vmem>>, vector<16x128xbf16>
    tpu.vector_store %arg7[%c128, %c0_41], %25 {strides = array<i32>} : memref<576x128xbf16, #tpu.memory_space<vmem>>, vector<16x128xbf16>,
    %c0_42 = arith.constant 0 : index
    %c3_43 = arith.constant 3 : index
    %c0_44 = arith.constant 0 : index
    %c1_45 = arith.constant 1 : index
    %27 = vector.load %arg1[%c0_42, %c3_43, %c0_44, %c1_45] : memref<1x4x16x144xbf16, #tpu.memory_space<vmem>>, vector<1x1x16x128xbf16>
    %28 = vector.shape_cast %27 : vector<1x1x16x128xbf16> to vector<16x128xbf16>
    %c144 = arith.constant 144 : index
    %c0_46 = arith.constant 0 : index
    %29 = vector.load %arg7[%c144, %c0_46] : memref<576x128xbf16, #tpu.memory_space<vmem>>, vector<16x128xbf16>
    tpu.vector_store %arg7[%c144, %c0_46], %28 {strides = array<i32>} : memref<576x128xbf16, #tpu.memory_space<vmem>>, vector<16x128xbf16>,
    %c0_47 = arith.constant 0 : index
    %c2_48 = arith.constant 2 : index
    %c0_49 = arith.constant 0 : index
    %c2_50 = arith.constant 2 : index
    %30 = vector.load %arg1[%c0_47, %c2_48, %c0_49, %c2_50] : memref<1x4x16x144xbf16, #tpu.memory_space<vmem>>, vector<1x1x16x128xbf16>
    %31 = vector.shape_cast %30 : vector<1x1x16x128xbf16> to vector<16x128xbf16>
    %c160 = arith.constant 160 : index
    %c0_51 = arith.constant 0 : index
    %32 = vector.load %arg7[%c160, %c0_51] : memref<576x128xbf16, #tpu.memory_space<vmem>>, vector<16x128xbf16>
    tpu.vector_store %arg7[%c160, %c0_51], %31 {strides = array<i32>} : memref<576x128xbf16, #tpu.memory_space<vmem>>, vector<16x128xbf16>,
    %c0_52 = arith.constant 0 : index
    %c3_53 = arith.constant 3 : index
    %c0_54 = arith.constant 0 : index
    %c2_55 = arith.constant 2 : index
    %33 = vector.load %arg1[%c0_52, %c3_53, %c0_54, %c2_55] : memref<1x4x16x144xbf16, #tpu.memory_space<vmem>>, vector<1x1x16x128xbf16>
    %34 = vector.shape_cast %33 : vector<1x1x16x128xbf16> to vector<16x128xbf16>
    %c176 = arith.constant 176 : index
    %c0_56 = arith.constant 0 : index
    %35 = vector.load %arg7[%c176, %c0_56] : memref<576x128xbf16, #tpu.memory_space<vmem>>, vector<16x128xbf16>
    tpu.vector_store %arg7[%c176, %c0_56], %34 {strides = array<i32>} : memref<576x128xbf16, #tpu.memory_space<vmem>>, vector<16x128xbf16>,
    %c0_57 = arith.constant 0 : index
    %c0_58 = arith.constant 0 : index
    %c0_59 = arith.constant 0 : index
    %c6 = arith.constant 6 : index
    %36 = vector.load %arg1[%c0_57, %c0_58, %c0_59, %c6] : memref<1x4x16x144xbf16, #tpu.memory_space<vmem>>, vector<1x1x16x128xbf16>
    %37 = vector.shape_cast %36 : vector<1x1x16x128xbf16> to vector<16x128xbf16>
    %c192 = arith.constant 192 : index
    %c0_60 = arith.constant 0 : index
    %38 = vector.load %arg7[%c192, %c0_60] : memref<576x128xbf16, #tpu.memory_space<vmem>>, vector<16x128xbf16>
    tpu.vector_store %arg7[%c192, %c0_60], %37 {strides = array<i32>} : memref<576x128xbf16, #tpu.memory_space<vmem>>, vector<16x128xbf16>,
    %c0_61 = arith.constant 0 : index
    %c1_62 = arith.constant 1 : index
    %c0_63 = arith.constant 0 : index
    %c6_64 = arith.constant 6 : index
    %39 = vector.load %arg1[%c0_61, %c1_62, %c0_63, %c6_64] : memref<1x4x16x144xbf16, #tpu.memory_space<vmem>>, vector<1x1x16x128xbf16>
    %40 = vector.shape_cast %39 : vector<1x1x16x128xbf16> to vector<16x128xbf16>
    %c208 = arith.constant 208 : index
    %c0_65 = arith.constant 0 : index
    %41 = vector.load %arg7[%c208, %c0_65] : memref<576x128xbf16, #tpu.memory_space<vmem>>, vector<16x128xbf16>
    tpu.vector_store %arg7[%c208, %c0_65], %40 {strides = array<i32>} : memref<576x128xbf16, #tpu.memory_space<vmem>>, vector<16x128xbf16>,
    %c0_66 = arith.constant 0 : index
    %c0_67 = arith.constant 0 : index
    %c0_68 = arith.constant 0 : index
    %c7 = arith.constant 7 : index
    %42 = vector.load %arg1[%c0_66, %c0_67, %c0_68, %c7] : memref<1x4x16x144xbf16, #tpu.memory_space<vmem>>, vector<1x1x16x128xbf16>
    %43 = vector.shape_cast %42 : vector<1x1x16x128xbf16> to vector<16x128xbf16>
    %c224 = arith.constant 224 : index
    %c0_69 = arith.constant 0 : index
    %44 = vector.load %arg7[%c224, %c0_69] : memref<576x128xbf16, #tpu.memory_space<vmem>>, vector<16x128xbf16>
    tpu.vector_store %arg7[%c224, %c0_69], %43 {strides = array<i32>} : memref<576x128xbf16, #tpu.memory_space<vmem>>, vector<16x128xbf16>,
    %c0_70 = arith.constant 0 : index
    %c1_71 = arith.constant 1 : index
    %c0_72 = arith.constant 0 : index
    %c7_73 = arith.constant 7 : index
    %45 = vector.load %arg1[%c0_70, %c1_71, %c0_72, %c7_73] : memref<1x4x16x144xbf16, #tpu.memory_space<vmem>>, vector<1x1x16x128xbf16>
    %46 = vector.shape_cast %45 : vector<1x1x16x128xbf16> to vector<16x128xbf16>
    %c240 = arith.constant 240 : index
    %c0_74 = arith.constant 0 : index
    %47 = vector.load %arg7[%c240, %c0_74] : memref<576x128xbf16, #tpu.memory_space<vmem>>, vector<16x128xbf16>
    tpu.vector_store %arg7[%c240, %c0_74], %46 {strides = array<i32>} : memref<576x128xbf16, #tpu.memory_space<vmem>>, vector<16x128xbf16>,
    %c0_75 = arith.constant 0 : index
    %c0_76 = arith.constant 0 : index
    %c0_77 = arith.constant 0 : index
    %c8 = arith.constant 8 : index
    %48 = vector.load %arg1[%c0_75, %c0_76, %c0_77, %c8] : memref<1x4x16x144xbf16, #tpu.memory_space<vmem>>, vector<1x1x16x128xbf16>
    %49 = vector.shape_cast %48 : vector<1x1x16x128xbf16> to vector<16x128xbf16>
    %c256 = arith.constant 256 : index
    %c0_78 = arith.constant 0 : index
    %50 = vector.load %arg7[%c256, %c0_78] : memref<576x128xbf16, #tpu.memory_space<vmem>>, vector<16x128xbf16>
    tpu.vector_store %arg7[%c256, %c0_78], %49 {strides = array<i32>} : memref<576x128xbf16, #tpu.memory_space<vmem>>, vector<16x128xbf16>,
    %c0_79 = arith.constant 0 : index
    %c1_80 = arith.constant 1 : index
    %c0_81 = arith.constant 0 : index
    %c8_82 = arith.constant 8 : index
    %51 = vector.load %arg1[%c0_79, %c1_80, %c0_81, %c8_82] : memref<1x4x16x144xbf16, #tpu.memory_space<vmem>>, vector<1x1x16x128xbf16>
    %52 = vector.shape_cast %51 : vector<1x1x16x128xbf16> to vector<16x128xbf16>
    %c272 = arith.constant 272 : index
    %c0_83 = arith.constant 0 : index
    %53 = vector.load %arg7[%c272, %c0_83] : memref<576x128xbf16, #tpu.memory_space<vmem>>, vector<16x128xbf16>
    tpu.vector_store %arg7[%c272, %c0_83], %52 {strides = array<i32>} : memref<576x128xbf16, #tpu.memory_space<vmem>>, vector<16x128xbf16>,
    %c0_84 = arith.constant 0 : index
    %c2_85 = arith.constant 2 : index
    %c0_86 = arith.constant 0 : index
    %c6_87 = arith.constant 6 : index
    %54 = vector.load %arg1[%c0_84, %c2_85, %c0_86, %c6_87] : memref<1x4x16x144xbf16, #tpu.memory_space<vmem>>, vector<1x1x16x128xbf16>
    %55 = vector.shape_cast %54 : vector<1x1x16x128xbf16> to vector<16x128xbf16>
    %c288 = arith.constant 288 : index
    %c0_88 = arith.constant 0 : index
    %56 = vector.load %arg7[%c288, %c0_88] : memref<576x128xbf16, #tpu.memory_space<vmem>>, vector<16x128xbf16>
    tpu.vector_store %arg7[%c288, %c0_88], %55 {strides = array<i32>} : memref<576x128xbf16, #tpu.memory_space<vmem>>, vector<16x128xbf16>,
    %c0_89 = arith.constant 0 : index
    %c3_90 = arith.constant 3 : index
    %c0_91 = arith.constant 0 : index
    %c6_92 = arith.constant 6 : index
    %57 = vector.load %arg1[%c0_89, %c3_90, %c0_91, %c6_92] : memref<1x4x16x144xbf16, #tpu.memory_space<vmem>>, vector<1x1x16x128xbf16>
    %58 = vector.shape_cast %57 : vector<1x1x16x128xbf16> to vector<16x128xbf16>
    %c304 = arith.constant 304 : index
    %c0_93 = arith.constant 0 : index
    %59 = vector.load %arg7[%c304, %c0_93] : memref<576x128xbf16, #tpu.memory_space<vmem>>, vector<16x128xbf16>
    tpu.vector_store %arg7[%c304, %c0_93], %58 {strides = array<i32>} : memref<576x128xbf16, #tpu.memory_space<vmem>>, vector<16x128xbf16>,
    %c0_94 = arith.constant 0 : index
    %c2_95 = arith.constant 2 : index
    %c0_96 = arith.constant 0 : index
    %c7_97 = arith.constant 7 : index
    %60 = vector.load %arg1[%c0_94, %c2_95, %c0_96, %c7_97] : memref<1x4x16x144xbf16, #tpu.memory_space<vmem>>, vector<1x1x16x128xbf16>
    %61 = vector.shape_cast %60 : vector<1x1x16x128xbf16> to vector<16x128xbf16>
    %c320 = arith.constant 320 : index
    %c0_98 = arith.constant 0 : index
    %62 = vector.load %arg7[%c320, %c0_98] : memref<576x128xbf16, #tpu.memory_space<vmem>>, vector<16x128xbf16>
    tpu.vector_store %arg7[%c320, %c0_98], %61 {strides = array<i32>} : memref<576x128xbf16, #tpu.memory_space<vmem>>, vector<16x128xbf16>,
    %c0_99 = arith.constant 0 : index
    %c3_100 = arith.constant 3 : index
    %c0_101 = arith.constant 0 : index
    %c7_102 = arith.constant 7 : index
    %63 = vector.load %arg1[%c0_99, %c3_100, %c0_101, %c7_102] : memref<1x4x16x144xbf16, #tpu.memory_space<vmem>>, vector<1x1x16x128xbf16>
    %64 = vector.shape_cast %63 : vector<1x1x16x128xbf16> to vector<16x128xbf16>
    %c336 = arith.constant 336 : index
    %c0_103 = arith.constant 0 : index
    %65 = vector.load %arg7[%c336, %c0_103] : memref<576x128xbf16, #tpu.memory_space<vmem>>, vector<16x128xbf16>
    tpu.vector_store %arg7[%c336, %c0_103], %64 {strides = array<i32>} : memref<576x128xbf16, #tpu.memory_space<vmem>>, vector<16x128xbf16>,
    %c0_104 = arith.constant 0 : index
    %c2_105 = arith.constant 2 : index
    %c0_106 = arith.constant 0 : index
    %c8_107 = arith.constant 8 : index
    %66 = vector.load %arg1[%c0_104, %c2_105, %c0_106, %c8_107] : memref<1x4x16x144xbf16, #tpu.memory_space<vmem>>, vector<1x1x16x128xbf16>
    %67 = vector.shape_cast %66 : vector<1x1x16x128xbf16> to vector<16x128xbf16>
    %c352 = arith.constant 352 : index
    %c0_108 = arith.constant 0 : index
    %68 = vector.load %arg7[%c352, %c0_108] : memref<576x128xbf16, #tpu.memory_space<vmem>>, vector<16x128xbf16>
    tpu.vector_store %arg7[%c352, %c0_108], %67 {strides = array<i32>} : memref<576x128xbf16, #tpu.memory_space<vmem>>, vector<16x128xbf16>,
    %c0_109 = arith.constant 0 : index
    %c3_110 = arith.constant 3 : index
    %c0_111 = arith.constant 0 : index
    %c8_112 = arith.constant 8 : index
    %69 = vector.load %arg1[%c0_109, %c3_110, %c0_111, %c8_112] : memref<1x4x16x144xbf16, #tpu.memory_space<vmem>>, vector<1x1x16x128xbf16>
    %70 = vector.shape_cast %69 : vector<1x1x16x128xbf16> to vector<16x128xbf16>
    %c368 = arith.constant 368 : index
    %c0_113 = arith.constant 0 : index
    %71 = vector.load %arg7[%c368, %c0_113] : memref<576x128xbf16, #tpu.memory_space<vmem>>, vector<16x128xbf16>
    tpu.vector_store %arg7[%c368, %c0_113], %70 {strides = array<i32>} : memref<576x128xbf16, #tpu.memory_space<vmem>>, vector<16x128xbf16>,
    %c0_114 = arith.constant 0 : index
    %c0_115 = arith.constant 0 : index
    %c0_116 = arith.constant 0 : index
    %c12 = arith.constant 12 : index
    %72 = vector.load %arg1[%c0_114, %c0_115, %c0_116, %c12] : memref<1x4x16x144xbf16, #tpu.memory_space<vmem>>, vector<1x1x16x128xbf16>
    %73 = vector.shape_cast %72 : vector<1x1x16x128xbf16> to vector<16x128xbf16>
    %c384 = arith.constant 384 : index
    %c0_117 = arith.constant 0 : index
    %74 = vector.load %arg7[%c384, %c0_117] : memref<576x128xbf16, #tpu.memory_space<vmem>>, vector<16x128xbf16>
    tpu.vector_store %arg7[%c384, %c0_117], %73 {strides = array<i32>} : memref<576x128xbf16, #tpu.memory_space<vmem>>, vector<16x128xbf16>,
    %c0_118 = arith.constant 0 : index
    %c1_119 = arith.constant 1 : index
    %c0_120 = arith.constant 0 : index
    %c12_121 = arith.constant 12 : index
    %75 = vector.load %arg1[%c0_118, %c1_119, %c0_120, %c12_121] : memref<1x4x16x144xbf16, #tpu.memory_space<vmem>>, vector<1x1x16x128xbf16>
    %76 = vector.shape_cast %75 : vector<1x1x16x128xbf16> to vector<16x128xbf16>
    %c400 = arith.constant 400 : index
    %c0_122 = arith.constant 0 : index
    %77 = vector.load %arg7[%c400, %c0_122] : memref<576x128xbf16, #tpu.memory_space<vmem>>, vector<16x128xbf16>
    tpu.vector_store %arg7[%c400, %c0_122], %76 {strides = array<i32>} : memref<576x128xbf16, #tpu.memory_space<vmem>>, vector<16x128xbf16>,
    %c0_123 = arith.constant 0 : index
    %c0_124 = arith.constant 0 : index
    %c0_125 = arith.constant 0 : index
    %c13 = arith.constant 13 : index
    %78 = vector.load %arg1[%c0_123, %c0_124, %c0_125, %c13] : memref<1x4x16x144xbf16, #tpu.memory_space<vmem>>, vector<1x1x16x128xbf16>
    %79 = vector.shape_cast %78 : vector<1x1x16x128xbf16> to vector<16x128xbf16>
    %c416 = arith.constant 416 : index
    %c0_126 = arith.constant 0 : index
    %80 = vector.load %arg7[%c416, %c0_126] : memref<576x128xbf16, #tpu.memory_space<vmem>>, vector<16x128xbf16>
    tpu.vector_store %arg7[%c416, %c0_126], %79 {strides = array<i32>} : memref<576x128xbf16, #tpu.memory_space<vmem>>, vector<16x128xbf16>,
    %c0_127 = arith.constant 0 : index
    %c1_128 = arith.constant 1 : index
    %c0_129 = arith.constant 0 : index
    %c13_130 = arith.constant 13 : index
    %81 = vector.load %arg1[%c0_127, %c1_128, %c0_129, %c13_130] : memref<1x4x16x144xbf16, #tpu.memory_space<vmem>>, vector<1x1x16x128xbf16>
    %82 = vector.shape_cast %81 : vector<1x1x16x128xbf16> to vector<16x128xbf16>
    %c432 = arith.constant 432 : index
    %c0_131 = arith.constant 0 : index
    %83 = vector.load %arg7[%c432, %c0_131] : memref<576x128xbf16, #tpu.memory_space<vmem>>, vector<16x128xbf16>
    tpu.vector_store %arg7[%c432, %c0_131], %82 {strides = array<i32>} : memref<576x128xbf16, #tpu.memory_space<vmem>>, vector<16x128xbf16>,
    %c0_132 = arith.constant 0 : index
    %c0_133 = arith.constant 0 : index
    %c0_134 = arith.constant 0 : index
    %c14 = arith.constant 14 : index
    %84 = vector.load %arg1[%c0_132, %c0_133, %c0_134, %c14] : memref<1x4x16x144xbf16, #tpu.memory_space<vmem>>, vector<1x1x16x128xbf16>
    %85 = vector.shape_cast %84 : vector<1x1x16x128xbf16> to vector<16x128xbf16>
    %c448 = arith.constant 448 : index
    %c0_135 = arith.constant 0 : index
    %86 = vector.load %arg7[%c448, %c0_135] : memref<576x128xbf16, #tpu.memory_space<vmem>>, vector<16x128xbf16>
    tpu.vector_store %arg7[%c448, %c0_135], %85 {strides = array<i32>} : memref<576x128xbf16, #tpu.memory_space<vmem>>, vector<16x128xbf16>,
    %c0_136 = arith.constant 0 : index
    %c1_137 = arith.constant 1 : index
    %c0_138 = arith.constant 0 : index
    %c14_139 = arith.constant 14 : index
    %87 = vector.load %arg1[%c0_136, %c1_137, %c0_138, %c14_139] : memref<1x4x16x144xbf16, #tpu.memory_space<vmem>>, vector<1x1x16x128xbf16>
    %88 = vector.shape_cast %87 : vector<1x1x16x128xbf16> to vector<16x128xbf16>
    %c464 = arith.constant 464 : index
    %c0_140 = arith.constant 0 : index
    %89 = vector.load %arg7[%c464, %c0_140] : memref<576x128xbf16, #tpu.memory_space<vmem>>, vector<16x128xbf16>
    tpu.vector_store %arg7[%c464, %c0_140], %88 {strides = array<i32>} : memref<576x128xbf16, #tpu.memory_space<vmem>>, vector<16x128xbf16>,
    %c0_141 = arith.constant 0 : index
    %c2_142 = arith.constant 2 : index
    %c0_143 = arith.constant 0 : index
    %c12_144 = arith.constant 12 : index
    %90 = vector.load %arg1[%c0_141, %c2_142, %c0_143, %c12_144] : memref<1x4x16x144xbf16, #tpu.memory_space<vmem>>, vector<1x1x16x128xbf16>
    %91 = vector.shape_cast %90 : vector<1x1x16x128xbf16> to vector<16x128xbf16>
    %c480 = arith.constant 480 : index
    %c0_145 = arith.constant 0 : index
    %92 = vector.load %arg7[%c480, %c0_145] : memref<576x128xbf16, #tpu.memory_space<vmem>>, vector<16x128xbf16>
    tpu.vector_store %arg7[%c480, %c0_145], %91 {strides = array<i32>} : memref<576x128xbf16, #tpu.memory_space<vmem>>, vector<16x128xbf16>,
    %c0_146 = arith.constant 0 : index
    %c3_147 = arith.constant 3 : index
    %c0_148 = arith.constant 0 : index
    %c12_149 = arith.constant 12 : index
    %93 = vector.load %arg1[%c0_146, %c3_147, %c0_148, %c12_149] : memref<1x4x16x144xbf16, #tpu.memory_space<vmem>>, vector<1x1x16x128xbf16>
    %94 = vector.shape_cast %93 : vector<1x1x16x128xbf16> to vector<16x128xbf16>
    %c496 = arith.constant 496 : index
    %c0_150 = arith.constant 0 : index
    %95 = vector.load %arg7[%c496, %c0_150] : memref<576x128xbf16, #tpu.memory_space<vmem>>, vector<16x128xbf16>
    tpu.vector_store %arg7[%c496, %c0_150], %94 {strides = array<i32>} : memref<576x128xbf16, #tpu.memory_space<vmem>>, vector<16x128xbf16>,
    %c0_151 = arith.constant 0 : index
    %c2_152 = arith.constant 2 : index
    %c0_153 = arith.constant 0 : index
    %c13_154 = arith.constant 13 : index
    %96 = vector.load %arg1[%c0_151, %c2_152, %c0_153, %c13_154] : memref<1x4x16x144xbf16, #tpu.memory_space<vmem>>, vector<1x1x16x128xbf16>
    %97 = vector.shape_cast %96 : vector<1x1x16x128xbf16> to vector<16x128xbf16>
    %c512 = arith.constant 512 : index
    %c0_155 = arith.constant 0 : index
    %98 = vector.load %arg7[%c512, %c0_155] : memref<576x128xbf16, #tpu.memory_space<vmem>>, vector<16x128xbf16>
    tpu.vector_store %arg7[%c512, %c0_155], %97 {strides = array<i32>} : memref<576x128xbf16, #tpu.memory_space<vmem>>, vector<16x128xbf16>,
    %c0_156 = arith.constant 0 : index
    %c3_157 = arith.constant 3 : index
    %c0_158 = arith.constant 0 : index
    %c13_159 = arith.constant 13 : index
    %99 = vector.load %arg1[%c0_156, %c3_157, %c0_158, %c13_159] : memref<1x4x16x144xbf16, #tpu.memory_space<vmem>>, vector<1x1x16x128xbf16>
    %100 = vector.shape_cast %99 : vector<1x1x16x128xbf16> to vector<16x128xbf16>
    %c528 = arith.constant 528 : index
    %c0_160 = arith.constant 0 : index
    %101 = vector.load %arg7[%c528, %c0_160] : memref<576x128xbf16, #tpu.memory_space<vmem>>, vector<16x128xbf16>
    tpu.vector_store %arg7[%c528, %c0_160], %100 {strides = array<i32>} : memref<576x128xbf16, #tpu.memory_space<vmem>>, vector<16x128xbf16>,
    %c0_161 = arith.constant 0 : index
    %c2_162 = arith.constant 2 : index
    %c0_163 = arith.constant 0 : index
    %c14_164 = arith.constant 14 : index
    %102 = vector.load %arg1[%c0_161, %c2_162, %c0_163, %c14_164] : memref<1x4x16x144xbf16, #tpu.memory_space<vmem>>, vector<1x1x16x128xbf16>
    %103 = vector.shape_cast %102 : vector<1x1x16x128xbf16> to vector<16x128xbf16>
    %c544 = arith.constant 544 : index
    %c0_165 = arith.constant 0 : index
    %104 = vector.load %arg7[%c544, %c0_165] : memref<576x128xbf16, #tpu.memory_space<vmem>>, vector<16x128xbf16>
    tpu.vector_store %arg7[%c544, %c0_165], %103 {strides = array<i32>} : memref<576x128xbf16, #tpu.memory_space<vmem>>, vector<16x128xbf16>,
    %c0_166 = arith.constant 0 : index
    %c3_167 = arith.constant 3 : index
    %c0_168 = arith.constant 0 : index
    %c14_169 = arith.constant 14 : index
    %105 = vector.load %arg1[%c0_166, %c3_167, %c0_168, %c14_169] : memref<1x4x16x144xbf16, #tpu.memory_space<vmem>>, vector<1x1x16x128xbf16>
    %106 = vector.shape_cast %105 : vector<1x1x16x128xbf16> to vector<16x128xbf16>
    %c560 = arith.constant 560 : index
    %c0_170 = arith.constant 0 : index
    %107 = vector.load %arg7[%c560, %c0_170] : memref<576x128xbf16, #tpu.memory_space<vmem>>, vector<16x128xbf16>
    tpu.vector_store %arg7[%c560, %c0_170], %106 {strides = array<i32>} : memref<576x128xbf16, #tpu.memory_space<vmem>>, vector<16x128xbf16>,
    %c0_171 = arith.constant 0 : index
    %c0_172 = arith.constant 0 : index
    %108 = vector.load %arg2[%c0_171, %c0_172] : memref<32x576xbf16, #tpu.memory_space<vmem>>, vector<32x576xbf16>
    %c0_173 = arith.constant 0 : index
    %c0_174 = arith.constant 0 : index
    %109 = vector.load %arg7[%c0_173, %c0_174] : memref<576x128xbf16, #tpu.memory_space<vmem>>, vector<576x128xbf16>
    %cst = arith.constant dense<0.000000e+00> : vector<32x128xf32>
    %110 = tpu.matmul %108, %109, %cst {dimension_numbers = #tpu.dot_dimension_numbers<[1], [0], [0], [1], [0, 0, 1, 1], [], []>} : vector<32x576xbf16>, vector<576x128xbf16>, vector<32x128xf32> -> vector<32x128xf32>
    %c0_175 = arith.constant 0 : index
    %c0_176 = arith.constant 0 : index
    %111 = vector.load %arg3[%c0_175, %c0_176] : memref<32x1xf32, #tpu.memory_space<vmem>>, vector<32x1xf32>
    %112 = vector.broadcast %111 : vector<32x1xf32> to vector<32x128xf32>
    %113 = arith.addf %110, %112 : vector<32x128xf32>
    %cst_177 = arith.constant 0.000000e+00 : f32
    %114 = vector.broadcast %cst_177 : f32 to vector<32x128xf32>
    %115 = arith.cmpf oge, %113, %114 : vector<32x128xf32>
    %cst_178 = arith.constant 2.000000e-01 : f32
    %116 = vector.broadcast %cst_178 : f32 to vector<32x128xf32>
    %117 = arith.mulf %116, %113 : vector<32x128xf32>
    %118 = arith.select %115, %113, %117 : vector<32x128xi1>, vector<32x128xf32>
    %cst_179 = arith.constant 1.41421354 : f32
    %119 = vector.broadcast %cst_179 : f32 to vector<32x128xf32>
    %120 = arith.mulf %118, %119 : vector<32x128xf32>
    %c0_180 = arith.constant 0 : index
    %c0_181 = arith.constant 0 : index
    %c0_182 = arith.constant 0 : index
    %c0_183 = arith.constant 0 : index
    %121 = vector.load %arg4[%c0_180, %c0_181, %c0_182, %c0_183] : memref<1x4x16x138xbf16, #tpu.memory_space<vmem>>, vector<1x1x16x128xbf16>
    %122 = vector.shape_cast %121 : vector<1x1x16x128xbf16> to vector<16x128xbf16>
    %c0_184 = arith.constant 0 : index
    %c0_185 = arith.constant 0 : index
    %123 = vector.load %arg8[%c0_184, %c0_185] : memref<256x128xbf16, #tpu.memory_space<vmem>>, vector<16x128xbf16>
    tpu.vector_store %arg8[%c0_184, %c0_185], %122 {strides = array<i32>} : memref<256x128xbf16, #tpu.memory_space<vmem>>, vector<16x128xbf16>,
    %c0_186 = arith.constant 0 : index
    %c1_187 = arith.constant 1 : index
    %c0_188 = arith.constant 0 : index
    %c0_189 = arith.constant 0 : index
    %124 = vector.load %arg4[%c0_186, %c1_187, %c0_188, %c0_189] : memref<1x4x16x138xbf16, #tpu.memory_space<vmem>>, vector<1x1x16x128xbf16>
    %125 = vector.shape_cast %124 : vector<1x1x16x128xbf16> to vector<16x128xbf16>
    %c16_190 = arith.constant 16 : index
    %c0_191 = arith.constant 0 : index
    %126 = vector.load %arg8[%c16_190, %c0_191] : memref<256x128xbf16, #tpu.memory_space<vmem>>, vector<16x128xbf16>
    tpu.vector_store %arg8[%c16_190, %c0_191], %125 {strides = array<i32>} : memref<256x128xbf16, #tpu.memory_space<vmem>>, vector<16x128xbf16>,
    %c0_192 = arith.constant 0 : index
    %c0_193 = arith.constant 0 : index
    %c0_194 = arith.constant 0 : index
    %c1_195 = arith.constant 1 : index
    %127 = vector.load %arg4[%c0_192, %c0_193, %c0_194, %c1_195] : memref<1x4x16x138xbf16, #tpu.memory_space<vmem>>, vector<1x1x16x128xbf16>
    %128 = vector.shape_cast %127 : vector<1x1x16x128xbf16> to vector<16x128xbf16>
    %c32_196 = arith.constant 32 : index
    %c0_197 = arith.constant 0 : index
    %129 = vector.load %arg8[%c32_196, %c0_197] : memref<256x128xbf16, #tpu.memory_space<vmem>>, vector<16x128xbf16>
    tpu.vector_store %arg8[%c32_196, %c0_197], %128 {strides = array<i32>} : memref<256x128xbf16, #tpu.memory_space<vmem>>, vector<16x128xbf16>,
    %c0_198 = arith.constant 0 : index
    %c1_199 = arith.constant 1 : index
    %c0_200 = arith.constant 0 : index
    %c1_201 = arith.constant 1 : index
    %130 = vector.load %arg4[%c0_198, %c1_199, %c0_200, %c1_201] : memref<1x4x16x138xbf16, #tpu.memory_space<vmem>>, vector<1x1x16x128xbf16>
    %131 = vector.shape_cast %130 : vector<1x1x16x128xbf16> to vector<16x128xbf16>
    %c48_202 = arith.constant 48 : index
    %c0_203 = arith.constant 0 : index
    %132 = vector.load %arg8[%c48_202, %c0_203] : memref<256x128xbf16, #tpu.memory_space<vmem>>, vector<16x128xbf16>
    tpu.vector_store %arg8[%c48_202, %c0_203], %131 {strides = array<i32>} : memref<256x128xbf16, #tpu.memory_space<vmem>>, vector<16x128xbf16>,
    %c0_204 = arith.constant 0 : index
    %c2_205 = arith.constant 2 : index
    %c0_206 = arith.constant 0 : index
    %c0_207 = arith.constant 0 : index
    %133 = vector.load %arg4[%c0_204, %c2_205, %c0_206, %c0_207] : memref<1x4x16x138xbf16, #tpu.memory_space<vmem>>, vector<1x1x16x128xbf16>
    %134 = vector.shape_cast %133 : vector<1x1x16x128xbf16> to vector<16x128xbf16>
    %c64_208 = arith.constant 64 : index
    %c0_209 = arith.constant 0 : index
    %135 = vector.load %arg8[%c64_208, %c0_209] : memref<256x128xbf16, #tpu.memory_space<vmem>>, vector<16x128xbf16>
    tpu.vector_store %arg8[%c64_208, %c0_209], %134 {strides = array<i32>} : memref<256x128xbf16, #tpu.memory_space<vmem>>, vector<16x128xbf16>,
    %c0_210 = arith.constant 0 : index
    %c3_211 = arith.constant 3 : index
    %c0_212 = arith.constant 0 : index
    %c0_213 = arith.constant 0 : index
    %136 = vector.load %arg4[%c0_210, %c3_211, %c0_212, %c0_213] : memref<1x4x16x138xbf16, #tpu.memory_space<vmem>>, vector<1x1x16x128xbf16>
    %137 = vector.shape_cast %136 : vector<1x1x16x128xbf16> to vector<16x128xbf16>
    %c80_214 = arith.constant 80 : index
    %c0_215 = arith.constant 0 : index
    %138 = vector.load %arg8[%c80_214, %c0_215] : memref<256x128xbf16, #tpu.memory_space<vmem>>, vector<16x128xbf16>
    tpu.vector_store %arg8[%c80_214, %c0_215], %137 {strides = array<i32>} : memref<256x128xbf16, #tpu.memory_space<vmem>>, vector<16x128xbf16>,
    %c0_216 = arith.constant 0 : index
    %c2_217 = arith.constant 2 : index
    %c0_218 = arith.constant 0 : index
    %c1_219 = arith.constant 1 : index
    %139 = vector.load %arg4[%c0_216, %c2_217, %c0_218, %c1_219] : memref<1x4x16x138xbf16, #tpu.memory_space<vmem>>, vector<1x1x16x128xbf16>
    %140 = vector.shape_cast %139 : vector<1x1x16x128xbf16> to vector<16x128xbf16>
    %c96_220 = arith.constant 96 : index
    %c0_221 = arith.constant 0 : index
    %141 = vector.load %arg8[%c96_220, %c0_221] : memref<256x128xbf16, #tpu.memory_space<vmem>>, vector<16x128xbf16>
    tpu.vector_store %arg8[%c96_220, %c0_221], %140 {strides = array<i32>} : memref<256x128xbf16, #tpu.memory_space<vmem>>, vector<16x128xbf16>,
    %c0_222 = arith.constant 0 : index
    %c3_223 = arith.constant 3 : index
    %c0_224 = arith.constant 0 : index
    %c1_225 = arith.constant 1 : index
    %142 = vector.load %arg4[%c0_222, %c3_223, %c0_224, %c1_225] : memref<1x4x16x138xbf16, #tpu.memory_space<vmem>>, vector<1x1x16x128xbf16>
    %143 = vector.shape_cast %142 : vector<1x1x16x128xbf16> to vector<16x128xbf16>
    %c112_226 = arith.constant 112 : index
    %c0_227 = arith.constant 0 : index
    %144 = vector.load %arg8[%c112_226, %c0_227] : memref<256x128xbf16, #tpu.memory_space<vmem>>, vector<16x128xbf16>
    tpu.vector_store %arg8[%c112_226, %c0_227], %143 {strides = array<i32>} : memref<256x128xbf16, #tpu.memory_space<vmem>>, vector<16x128xbf16>,
    %c0_228 = arith.constant 0 : index
    %c0_229 = arith.constant 0 : index
    %c0_230 = arith.constant 0 : index
    %c6_231 = arith.constant 6 : index
    %145 = vector.load %arg4[%c0_228, %c0_229, %c0_230, %c6_231] : memref<1x4x16x138xbf16, #tpu.memory_space<vmem>>, vector<1x1x16x128xbf16>
    %146 = vector.shape_cast %145 : vector<1x1x16x128xbf16> to vector<16x128xbf16>
    %c128_232 = arith.constant 128 : index
    %c0_233 = arith.constant 0 : index
    %147 = vector.load %arg8[%c128_232, %c0_233] : memref<256x128xbf16, #tpu.memory_space<vmem>>, vector<16x128xbf16>
    tpu.vector_store %arg8[%c128_232, %c0_233], %146 {strides = array<i32>} : memref<256x128xbf16, #tpu.memory_space<vmem>>, vector<16x128xbf16>,
    %c0_234 = arith.constant 0 : index
    %c1_235 = arith.constant 1 : index
    %c0_236 = arith.constant 0 : index
    %c6_237 = arith.constant 6 : index
    %148 = vector.load %arg4[%c0_234, %c1_235, %c0_236, %c6_237] : memref<1x4x16x138xbf16, #tpu.memory_space<vmem>>, vector<1x1x16x128xbf16>
    %149 = vector.shape_cast %148 : vector<1x1x16x128xbf16> to vector<16x128xbf16>
    %c144_238 = arith.constant 144 : index
    %c0_239 = arith.constant 0 : index
    %150 = vector.load %arg8[%c144_238, %c0_239] : memref<256x128xbf16, #tpu.memory_space<vmem>>, vector<16x128xbf16>
    tpu.vector_store %arg8[%c144_238, %c0_239], %149 {strides = array<i32>} : memref<256x128xbf16, #tpu.memory_space<vmem>>, vector<16x128xbf16>,
    %c0_240 = arith.constant 0 : index
    %c0_241 = arith.constant 0 : index
    %c0_242 = arith.constant 0 : index
    %c7_243 = arith.constant 7 : index
    %151 = vector.load %arg4[%c0_240, %c0_241, %c0_242, %c7_243] : memref<1x4x16x138xbf16, #tpu.memory_space<vmem>>, vector<1x1x16x128xbf16>
    %152 = vector.shape_cast %151 : vector<1x1x16x128xbf16> to vector<16x128xbf16>
    %c160_244 = arith.constant 160 : index
    %c0_245 = arith.constant 0 : index
    %153 = vector.load %arg8[%c160_244, %c0_245] : memref<256x128xbf16, #tpu.memory_space<vmem>>, vector<16x128xbf16>
    tpu.vector_store %arg8[%c160_244, %c0_245], %152 {strides = array<i32>} : memref<256x128xbf16, #tpu.memory_space<vmem>>, vector<16x128xbf16>,
    %c0_246 = arith.constant 0 : index
    %c1_247 = arith.constant 1 : index
    %c0_248 = arith.constant 0 : index
    %c7_249 = arith.constant 7 : index
    %154 = vector.load %arg4[%c0_246, %c1_247, %c0_248, %c7_249] : memref<1x4x16x138xbf16, #tpu.memory_space<vmem>>, vector<1x1x16x128xbf16>
    %155 = vector.shape_cast %154 : vector<1x1x16x128xbf16> to vector<16x128xbf16>
    %c176_250 = arith.constant 176 : index
    %c0_251 = arith.constant 0 : index
    %156 = vector.load %arg8[%c176_250, %c0_251] : memref<256x128xbf16, #tpu.memory_space<vmem>>, vector<16x128xbf16>
    tpu.vector_store %arg8[%c176_250, %c0_251], %155 {strides = array<i32>} : memref<256x128xbf16, #tpu.memory_space<vmem>>, vector<16x128xbf16>,
    %c0_252 = arith.constant 0 : index
    %c2_253 = arith.constant 2 : index
    %c0_254 = arith.constant 0 : index
    %c6_255 = arith.constant 6 : index
    %157 = vector.load %arg4[%c0_252, %c2_253, %c0_254, %c6_255] : memref<1x4x16x138xbf16, #tpu.memory_space<vmem>>, vector<1x1x16x128xbf16>
    %158 = vector.shape_cast %157 : vector<1x1x16x128xbf16> to vector<16x128xbf16>
    %c192_256 = arith.constant 192 : index
    %c0_257 = arith.constant 0 : index
    %159 = vector.load %arg8[%c192_256, %c0_257] : memref<256x128xbf16, #tpu.memory_space<vmem>>, vector<16x128xbf16>
    tpu.vector_store %arg8[%c192_256, %c0_257], %158 {strides = array<i32>} : memref<256x128xbf16, #tpu.memory_space<vmem>>, vector<16x128xbf16>,
    %c0_258 = arith.constant 0 : index
    %c3_259 = arith.constant 3 : index
    %c0_260 = arith.constant 0 : index
    %c6_261 = arith.constant 6 : index
    %160 = vector.load %arg4[%c0_258, %c3_259, %c0_260, %c6_261] : memref<1x4x16x138xbf16, #tpu.memory_space<vmem>>, vector<1x1x16x128xbf16>
    %161 = vector.shape_cast %160 : vector<1x1x16x128xbf16> to vector<16x128xbf16>
    %c208_262 = arith.constant 208 : index
    %c0_263 = arith.constant 0 : index
    %162 = vector.load %arg8[%c208_262, %c0_263] : memref<256x128xbf16, #tpu.memory_space<vmem>>, vector<16x128xbf16>
    tpu.vector_store %arg8[%c208_262, %c0_263], %161 {strides = array<i32>} : memref<256x128xbf16, #tpu.memory_space<vmem>>, vector<16x128xbf16>,
    %c0_264 = arith.constant 0 : index
    %c2_265 = arith.constant 2 : index
    %c0_266 = arith.constant 0 : index
    %c7_267 = arith.constant 7 : index
    %163 = vector.load %arg4[%c0_264, %c2_265, %c0_266, %c7_267] : memref<1x4x16x138xbf16, #tpu.memory_space<vmem>>, vector<1x1x16x128xbf16>
    %164 = vector.shape_cast %163 : vector<1x1x16x128xbf16> to vector<16x128xbf16>
    %c224_268 = arith.constant 224 : index
    %c0_269 = arith.constant 0 : index
    %165 = vector.load %arg8[%c224_268, %c0_269] : memref<256x128xbf16, #tpu.memory_space<vmem>>, vector<16x128xbf16>
    tpu.vector_store %arg8[%c224_268, %c0_269], %164 {strides = array<i32>} : memref<256x128xbf16, #tpu.memory_space<vmem>>, vector<16x128xbf16>,
    %c0_270 = arith.constant 0 : index
    %c3_271 = arith.constant 3 : index
    %c0_272 = arith.constant 0 : index
    %c7_273 = arith.constant 7 : index
    %166 = vector.load %arg4[%c0_270, %c3_271, %c0_272, %c7_273] : memref<1x4x16x138xbf16, #tpu.memory_space<vmem>>, vector<1x1x16x128xbf16>
    %167 = vector.shape_cast %166 : vector<1x1x16x128xbf16> to vector<16x128xbf16>
    %c240_274 = arith.constant 240 : index
    %c0_275 = arith.constant 0 : index
    %168 = vector.load %arg8[%c240_274, %c0_275] : memref<256x128xbf16, #tpu.memory_space<vmem>>, vector<16x128xbf16>
    tpu.vector_store %arg8[%c240_274, %c0_275], %167 {strides = array<i32>} : memref<256x128xbf16, #tpu.memory_space<vmem>>, vector<16x128xbf16>,
    %c0_276 = arith.constant 0 : index
    %c0_277 = arith.constant 0 : index
    %169 = vector.load %arg5[%c0_276, %c0_277] : memref<32x256xbf16, #tpu.memory_space<vmem>>, vector<32x256xbf16>
    %c0_278 = arith.constant 0 : index
    %c0_279 = arith.constant 0 : index
    %170 = vector.load %arg8[%c0_278, %c0_279] : memref<256x128xbf16, #tpu.memory_space<vmem>>, vector<256x128xbf16>
    %cst_280 = arith.constant dense<0.000000e+00> : vector<32x128xf32>
    %171 = tpu.matmul %169, %170, %cst_280 {dimension_numbers = #tpu.dot_dimension_numbers<[1], [0], [0], [1], [0, 0, 1, 1], [], []>} : vector<32x256xbf16>, vector<256x128xbf16>, vector<32x128xf32> -> vector<32x128xf32>
    %172 = arith.addf %120, %171 : vector<32x128xf32>
    %cst_281 = arith.constant 0.707106769 : f32
    %173 = vector.broadcast %cst_281 : f32 to vector<32x128xf32>
    %174 = arith.mulf %172, %173 : vector<32x128xf32>
    %175 = arith.truncf %174 : vector<32x128xf32> to vector<32x128xbf16>
    %c0_282 = arith.constant 0 : index
    %c0_283 = arith.constant 0 : index
    %c0_284 = arith.constant 0 : index
    %176 = vector.load %arg6[%c0_282, %c0_283, %c0_284] : memref<1x32x128xbf16, #tpu.memory_space<vmem>>, vector<1x32x128xbf16>
    %177 = vector.shape_cast %176 : vector<1x32x128xbf16> to vector<32x128xbf16>
    %178 = vector.shape_cast %175 : vector<32x128xbf16> to vector<1x32x128xbf16>
    tpu.vector_store %arg6[%c0_282, %c0_283, %c0_284], %178 {strides = array<i32>} : memref<1x32x128xbf16, #tpu.memory_space<vmem>>, vector<1x32x128xbf16>,
    return
  }
  func.func @transform_0(%arg0: i32) -> (i32, i32, i32, i32) {
    %c0_i32 = arith.constant 0 : i32
    %c0_i32_0 = arith.constant 0 : i32
    %c0_i32_1 = arith.constant 0 : i32
    %c0_i32_2 = arith.constant 0 : i32
    return %arg0, %c0_i32, %c0_i32_0, %c0_i32_1 : i32, i32, i32, i32
  }
  func.func @transform_1(%arg0: i32) -> (i32, i32) {
    %c0_i32 = arith.constant 0 : i32
    %c0_i32_0 = arith.constant 0 : i32
    %c0_i32_1 = arith.constant 0 : i32
    return %c0_i32, %c0_i32_0 : i32, i32
  }
  func.func @transform_2(%arg0: i32) -> (i32, i32) {
    %c0_i32 = arith.constant 0 : i32
    %c0_i32_0 = arith.constant 0 : i32
    %c0_i32_1 = arith.constant 0 : i32
    return %c0_i32, %c0_i32_0 : i32, i32
  }
  func.func @transform_3(%arg0: i32) -> (i32, i32, i32, i32) {
    %c0_i32 = arith.constant 0 : i32
    %c0_i32_0 = arith.constant 0 : i32
    %c0_i32_1 = arith.constant 0 : i32
    %c0_i32_2 = arith.constant 0 : i32
    return %arg0, %c0_i32, %c0_i32_0, %c0_i32_1 : i32, i32, i32, i32
  }
  func.func @transform_4(%arg0: i32) -> (i32, i32) {
    %c0_i32 = arith.constant 0 : i32
    %c0_i32_0 = arith.constant 0 : i32
    %c0_i32_1 = arith.constant 0 : i32
    return %c0_i32, %c0_i32_0 : i32, i32
  }
  func.func @transform_5(%arg0: i32) -> (i32, i32, i32) {
    %c0_i32 = arith.constant 0 : i32
    %c0_i32_0 = arith.constant 0 : i32
    %c0_i32_1 = arith.constant 0 : i32
    return %arg0, %c0_i32, %c0_i32_0 : i32, i32, i32
  }
}

module attributes {stable_mosaic.version = 11 : i64} {
  func.func @_stddev_kernel(%arg0: i32, %arg1: memref<2x1x512xbf16, #tpu.memory_space<vmem>>, %arg2: memref<1x1xf32, #tpu.memory_space<vmem>>) attributes {dimension_semantics = [#tpu.dimension_semantics<arbitrary>], iteration_bounds = array<i64: 1>, scalar_prefetch = 0 : i64, scratch_operands = 0 : i64, tpu.core_type = #tpu.core_type<tc>, window_params = [{pipeline_mode = #tpu.pipeline_mode<synchronous>, transform_indices = @transform_0, window_bounds = array<i64: 2, 1, 512>}, {pipeline_mode = #tpu.pipeline_mode<synchronous>, transform_indices = @transform_1, window_bounds = array<i64: 1, 1>}]} {
    %c0 = arith.constant 0 : index
    %c0_0 = arith.constant 0 : index
    %c0_1 = arith.constant 0 : index
    %0 = vector.load %arg1[%c0, %c0_0, %c0_1] : memref<2x1x512xbf16, #tpu.memory_space<vmem>>, vector<2x1x512xbf16>
    %1 = arith.extf %0 : vector<2x1x512xbf16> to vector<2x1x512xf32>
    %cst = arith.constant dense<0.000000e+00> : vector<1x512xf32>
    %2 = vector.multi_reduction <add>, %1, %cst [0] : vector<2x1x512xf32> to vector<1x512xf32>
    %3 = vector.shape_cast %2 : vector<1x512xf32> to vector<1x1x512xf32>
    %cst_2 = arith.constant 2.000000e+00 : f32
    %4 = vector.broadcast %cst_2 : f32 to vector<1x1x512xf32>
    %5 = arith.divf %3, %4 : vector<1x1x512xf32>
    %6 = vector.broadcast %5 : vector<1x1x512xf32> to vector<2x1x512xf32>
    %7 = arith.subf %1, %6 : vector<2x1x512xf32>
    %8 = arith.mulf %7, %7 : vector<2x1x512xf32>
    %cst_3 = arith.constant dense<0.000000e+00> : vector<1x512xf32>
    %9 = vector.multi_reduction <add>, %8, %cst_3 [0] : vector<2x1x512xf32> to vector<1x512xf32>
    %cst_4 = arith.constant 2.000000e+00 : f32
    %10 = vector.broadcast %cst_4 : f32 to vector<1x512xf32>
    %11 = arith.divf %9, %10 : vector<1x512xf32>
    %cst_5 = arith.constant 9.99999993E-9 : f32
    %12 = vector.broadcast %cst_5 : f32 to vector<1x512xf32>
    %13 = arith.addf %11, %12 : vector<1x512xf32>
    %14 = math.sqrt %13 : vector<1x512xf32>
    %cst_6 = arith.constant dense<0.000000e+00> : vector<1xf32>
    %15 = vector.multi_reduction <add>, %14, %cst_6 [1] : vector<1x512xf32> to vector<1xf32>
    %16 = vector.shape_cast %15 : vector<1xf32> to vector<1x1xf32>
    %cst_7 = arith.constant 5.120000e+02 : f32
    %17 = vector.broadcast %cst_7 : f32 to vector<1x1xf32>
    %18 = arith.divf %16, %17 : vector<1x1xf32>
    %c0_8 = arith.constant 0 : index
    %c0_9 = arith.constant 0 : index
    %19 = vector.load %arg2[%c0_8, %c0_9] : memref<1x1xf32, #tpu.memory_space<vmem>>, vector<1x1xf32>
    tpu.vector_store %arg2[%c0_8, %c0_9], %18 {strides = array<i32>} : memref<1x1xf32, #tpu.memory_space<vmem>>, vector<1x1xf32>,
    return
  }
  func.func @transform_0(%arg0: i32) -> (i32, i32, i32) {
    %c0_i32 = arith.constant 0 : i32
    %c0_i32_0 = arith.constant 0 : i32
    %c0_i32_1 = arith.constant 0 : i32
    %c0_i32_2 = arith.constant 0 : i32
    return %c0_i32, %c0_i32_0, %c0_i32_1 : i32, i32, i32
  }
  func.func @transform_1(%arg0: i32) -> (i32, i32) {
    %c0_i32 = arith.constant 0 : i32
    %c0_i32_0 = arith.constant 0 : i32
    %c0_i32_1 = arith.constant 0 : i32
    return %c0_i32, %c0_i32_0 : i32, i32
  }
}

module attributes {stable_mosaic.version = 11 : i64} {
  func.func @_conv_kernel(%arg0: i32, %arg1: memref<1x1x40x144xbf16, #tpu.memory_space<vmem>>, %arg2: memref<32x360xbf16, #tpu.memory_space<vmem>>, %arg3: memref<32x1xf32, #tpu.memory_space<vmem>>, %arg4: memref<1x32x128xbf16, #tpu.memory_space<vmem>>, %arg5: memref<360x128xbf16, #tpu.memory_space<vmem>>) attributes {dimension_semantics = [#tpu.dimension_semantics<parallel>], iteration_bounds = array<i64: 2>, scalar_prefetch = 0 : i64, scratch_operands = 1 : i64, tpu.core_type = #tpu.core_type<tc>, window_params = [{transform_indices = @transform_0, window_bounds = array<i64: 1, 1, 40, 144>}, {pipeline_mode = #tpu.pipeline_mode<synchronous>, transform_indices = @transform_1, window_bounds = array<i64: 32, 360>}, {pipeline_mode = #tpu.pipeline_mode<synchronous>, transform_indices = @transform_2, window_bounds = array<i64: 32, 1>}, {transform_indices = @transform_3, window_bounds = array<i64: 1, 32, 128>}]} {
    %c0 = arith.constant 0 : index
    %c0_0 = arith.constant 0 : index
    %c0_1 = arith.constant 0 : index
    %c0_2 = arith.constant 0 : index
    %0 = vector.load %arg1[%c0, %c0_0, %c0_1, %c0_2] : memref<1x1x40x144xbf16, #tpu.memory_space<vmem>>, vector<1x1x40x128xbf16>
    %1 = vector.shape_cast %0 : vector<1x1x40x128xbf16> to vector<40x128xbf16>
    %c0_3 = arith.constant 0 : index
    %c0_4 = arith.constant 0 : index
    %2 = vector.load %arg5[%c0_3, %c0_4] : memref<360x128xbf16, #tpu.memory_space<vmem>>, vector<40x128xbf16>
    tpu.vector_store %arg5[%c0_3, %c0_4], %1 {strides = array<i32>} : memref<360x128xbf16, #tpu.memory_space<vmem>>, vector<40x128xbf16>,
    %c0_5 = arith.constant 0 : index
    %c0_6 = arith.constant 0 : index
    %c0_7 = arith.constant 0 : index
    %c1 = arith.constant 1 : index
    %3 = vector.load %arg1[%c0_5, %c0_6, %c0_7, %c1] : memref<1x1x40x144xbf16, #tpu.memory_space<vmem>>, vector<1x1x40x128xbf16>
    %4 = vector.shape_cast %3 : vector<1x1x40x128xbf16> to vector<40x128xbf16>
    %c40 = arith.constant 40 : index
    %c0_8 = arith.constant 0 : index
    %5 = vector.load %arg5[%c40, %c0_8] : memref<360x128xbf16, #tpu.memory_space<vmem>>, vector<40x128xbf16>
    tpu.vector_store %arg5[%c40, %c0_8], %4 {strides = array<i32>} : memref<360x128xbf16, #tpu.memory_space<vmem>>, vector<40x128xbf16>,
    %c0_9 = arith.constant 0 : index
    %c0_10 = arith.constant 0 : index
    %c0_11 = arith.constant 0 : index
    %c2 = arith.constant 2 : index
    %6 = vector.load %arg1[%c0_9, %c0_10, %c0_11, %c2] : memref<1x1x40x144xbf16, #tpu.memory_space<vmem>>, vector<1x1x40x128xbf16>
    %7 = vector.shape_cast %6 : vector<1x1x40x128xbf16> to vector<40x128xbf16>
    %c80 = arith.constant 80 : index
    %c0_12 = arith.constant 0 : index
    %8 = vector.load %arg5[%c80, %c0_12] : memref<360x128xbf16, #tpu.memory_space<vmem>>, vector<40x128xbf16>
    tpu.vector_store %arg5[%c80, %c0_12], %7 {strides = array<i32>} : memref<360x128xbf16, #tpu.memory_space<vmem>>, vector<40x128xbf16>,
    %c0_13 = arith.constant 0 : index
    %c0_14 = arith.constant 0 : index
    %c0_15 = arith.constant 0 : index
    %c6 = arith.constant 6 : index
    %9 = vector.load %arg1[%c0_13, %c0_14, %c0_15, %c6] : memref<1x1x40x144xbf16, #tpu.memory_space<vmem>>, vector<1x1x40x128xbf16>
    %10 = vector.shape_cast %9 : vector<1x1x40x128xbf16> to vector<40x128xbf16>
    %c120 = arith.constant 120 : index
    %c0_16 = arith.constant 0 : index
    %11 = vector.load %arg5[%c120, %c0_16] : memref<360x128xbf16, #tpu.memory_space<vmem>>, vector<40x128xbf16>
    tpu.vector_store %arg5[%c120, %c0_16], %10 {strides = array<i32>} : memref<360x128xbf16, #tpu.memory_space<vmem>>, vector<40x128xbf16>,
    %c0_17 = arith.constant 0 : index
    %c0_18 = arith.constant 0 : index
    %c0_19 = arith.constant 0 : index
    %c7 = arith.constant 7 : index
    %12 = vector.load %arg1[%c0_17, %c0_18, %c0_19, %c7] : memref<1x1x40x144xbf16, #tpu.memory_space<vmem>>, vector<1x1x40x128xbf16>
    %13 = vector.shape_cast %12 : vector<1x1x40x128xbf16> to vector<40x128xbf16>
    %c160 = arith.constant 160 : index
    %c0_20 = arith.constant 0 : index
    %14 = vector.load %arg5[%c160, %c0_20] : memref<360x128xbf16, #tpu.memory_space<vmem>>, vector<40x128xbf16>
    tpu.vector_store %arg5[%c160, %c0_20], %13 {strides = array<i32>} : memref<360x128xbf16, #tpu.memory_space<vmem>>, vector<40x128xbf16>,
    %c0_21 = arith.constant 0 : index
    %c0_22 = arith.constant 0 : index
    %c0_23 = arith.constant 0 : index
    %c8 = arith.constant 8 : index
    %15 = vector.load %arg1[%c0_21, %c0_22, %c0_23, %c8] : memref<1x1x40x144xbf16, #tpu.memory_space<vmem>>, vector<1x1x40x128xbf16>
    %16 = vector.shape_cast %15 : vector<1x1x40x128xbf16> to vector<40x128xbf16>
    %c200 = arith.constant 200 : index
    %c0_24 = arith.constant 0 : index
    %17 = vector.load %arg5[%c200, %c0_24] : memref<360x128xbf16, #tpu.memory_space<vmem>>, vector<40x128xbf16>
    tpu.vector_store %arg5[%c200, %c0_24], %16 {strides = array<i32>} : memref<360x128xbf16, #tpu.memory_space<vmem>>, vector<40x128xbf16>,
    %c0_25 = arith.constant 0 : index
    %c0_26 = arith.constant 0 : index
    %c0_27 = arith.constant 0 : index
    %c12 = arith.constant 12 : index
    %18 = vector.load %arg1[%c0_25, %c0_26, %c0_27, %c12] : memref<1x1x40x144xbf16, #tpu.memory_space<vmem>>, vector<1x1x40x128xbf16>
    %19 = vector.shape_cast %18 : vector<1x1x40x128xbf16> to vector<40x128xbf16>
    %c240 = arith.constant 240 : index
    %c0_28 = arith.constant 0 : index
    %20 = vector.load %arg5[%c240, %c0_28] : memref<360x128xbf16, #tpu.memory_space<vmem>>, vector<40x128xbf16>
    tpu.vector_store %arg5[%c240, %c0_28], %19 {strides = array<i32>} : memref<360x128xbf16, #tpu.memory_space<vmem>>, vector<40x128xbf16>,
    %c0_29 = arith.constant 0 : index
    %c0_30 = arith.constant 0 : index
    %c0_31 = arith.constant 0 : index
    %c13 = arith.constant 13 : index
    %21 = vector.load %arg1[%c0_29, %c0_30, %c0_31, %c13] : memref<1x1x40x144xbf16, #tpu.memory_space<vmem>>, vector<1x1x40x128xbf16>
    %22 = vector.shape_cast %21 : vector<1x1x40x128xbf16> to vector<40x128xbf16>
    %c280 = arith.constant 280 : index
    %c0_32 = arith.constant 0 : index
    %23 = vector.load %arg5[%c280, %c0_32] : memref<360x128xbf16, #tpu.memory_space<vmem>>, vector<40x128xbf16>
    tpu.vector_store %arg5[%c280, %c0_32], %22 {strides = array<i32>} : memref<360x128xbf16, #tpu.memory_space<vmem>>, vector<40x128xbf16>,
    %c0_33 = arith.constant 0 : index
    %c0_34 = arith.constant 0 : index
    %c0_35 = arith.constant 0 : index
    %c14 = arith.constant 14 : index
    %24 = vector.load %arg1[%c0_33, %c0_34, %c0_35, %c14] : memref<1x1x40x144xbf16, #tpu.memory_space<vmem>>, vector<1x1x40x128xbf16>
    %25 = vector.shape_cast %24 : vector<1x1x40x128xbf16> to vector<40x128xbf16>
    %c320 = arith.constant 320 : index
    %c0_36 = arith.constant 0 : index
    %26 = vector.load %arg5[%c320, %c0_36] : memref<360x128xbf16, #tpu.memory_space<vmem>>, vector<40x128xbf16>
    tpu.vector_store %arg5[%c320, %c0_36], %25 {strides = array<i32>} : memref<360x128xbf16, #tpu.memory_space<vmem>>, vector<40x128xbf16>,
    %c0_37 = arith.constant 0 : index
    %c0_38 = arith.constant 0 : index
    %27 = vector.load %arg2[%c0_37, %c0_38] : memref<32x360xbf16, #tpu.memory_space<vmem>>, vector<32x360xbf16>
    %c0_39 = arith.constant 0 : index
    %c0_40 = arith.constant 0 : index
    %28 = vector.load %arg5[%c0_39, %c0_40] : memref<360x128xbf16, #tpu.memory_space<vmem>>, vector<360x128xbf16>
    %cst = arith.constant dense<0.000000e+00> : vector<32x128xf32>
    %29 = tpu.matmul %27, %28, %cst {dimension_numbers = #tpu.dot_dimension_numbers<[1], [0], [0], [1], [0, 0, 1, 1], [], []>} : vector<32x360xbf16>, vector<360x128xbf16>, vector<32x128xf32> -> vector<32x128xf32>
    %c0_41 = arith.constant 0 : index
    %c0_42 = arith.constant 0 : index
    %30 = vector.load %arg3[%c0_41, %c0_42] : memref<32x1xf32, #tpu.memory_space<vmem>>, vector<32x1xf32>
    %31 = vector.broadcast %30 : vector<32x1xf32> to vector<32x128xf32>
    %32 = arith.addf %29, %31 : vector<32x128xf32>
    %cst_43 = arith.constant 0.000000e+00 : f32
    %33 = vector.broadcast %cst_43 : f32 to vector<32x128xf32>
    %34 = arith.cmpf oge, %32, %33 : vector<32x128xf32>
    %cst_44 = arith.constant 2.000000e-01 : f32
    %35 = vector.broadcast %cst_44 : f32 to vector<32x128xf32>
    %36 = arith.mulf %35, %32 : vector<32x128xf32>
    %37 = arith.select %34, %32, %36 : vector<32x128xi1>, vector<32x128xf32>
    %cst_45 = arith.constant 1.41421354 : f32
    %38 = vector.broadcast %cst_45 : f32 to vector<32x128xf32>
    %39 = arith.mulf %37, %38 : vector<32x128xf32>
    %40 = arith.truncf %39 : vector<32x128xf32> to vector<32x128xbf16>
    %c0_46 = arith.constant 0 : index
    %c0_47 = arith.constant 0 : index
    %c0_48 = arith.constant 0 : index
    %41 = vector.load %arg4[%c0_46, %c0_47, %c0_48] : memref<1x32x128xbf16, #tpu.memory_space<vmem>>, vector<1x32x128xbf16>
    %42 = vector.shape_cast %41 : vector<1x32x128xbf16> to vector<32x128xbf16>
    %43 = vector.shape_cast %40 : vector<32x128xbf16> to vector<1x32x128xbf16>
    tpu.vector_store %arg4[%c0_46, %c0_47, %c0_48], %43 {strides = array<i32>} : memref<1x32x128xbf16, #tpu.memory_space<vmem>>, vector<1x32x128xbf16>,
    return
  }
  func.func @transform_0(%arg0: i32) -> (i32, i32, i32, i32) {
    %c0_i32 = arith.constant 0 : i32
    %c0_i32_0 = arith.constant 0 : i32
    %c0_i32_1 = arith.constant 0 : i32
    %c0_i32_2 = arith.constant 0 : i32
    return %arg0, %c0_i32, %c0_i32_0, %c0_i32_1 : i32, i32, i32, i32
  }
  func.func @transform_1(%arg0: i32) -> (i32, i32) {
    %c0_i32 = arith.constant 0 : i32
    %c0_i32_0 = arith.constant 0 : i32
    %c0_i32_1 = arith.constant 0 : i32
    return %c0_i32, %c0_i32_0 : i32, i32
  }
  func.func @transform_2(%arg0: i32) -> (i32, i32) {
    %c0_i32 = arith.constant 0 : i32
    %c0_i32_0 = arith.constant 0 : i32
    %c0_i32_1 = arith.constant 0 : i32
    return %c0_i32, %c0_i32_0 : i32, i32
  }
  func.func @transform_3(%arg0: i32) -> (i32, i32, i32) {
    %c0_i32 = arith.constant 0 : i32
    %c0_i32_0 = arith.constant 0 : i32
    %c0_i32_1 = arith.constant 0 : i32
    return %arg0, %c0_i32, %c0_i32_0 : i32, i32, i32
  }
}

module attributes {stable_mosaic.version = 11 : i64} {
  func.func @_mm_kernel(%arg0: i32, %arg1: i32, %arg2: i32, %arg3: memref<8x128xbf16, #tpu.memory_space<vmem>>, %arg4: memref<128x128xbf16, #tpu.memory_space<vmem>>, %arg5: memref<1x128xf32, #tpu.memory_space<vmem>>, %arg6: memref<8x128xf32, #tpu.memory_space<vmem>>, %arg7: memref<8x128xf32, #tpu.memory_space<vmem>>) attributes {dimension_semantics = [#tpu.dimension_semantics<parallel>, #tpu.dimension_semantics<parallel>, #tpu.dimension_semantics<arbitrary>], iteration_bounds = array<i64: 1, 1, 1>, scalar_prefetch = 0 : i64, scratch_operands = 1 : i64, tpu.core_type = #tpu.core_type<tc>, window_params = [{transform_indices = @transform_0, window_bounds = array<i64: 8, 128>}, {transform_indices = @transform_1, window_bounds = array<i64: 128, 128>}, {transform_indices = @transform_2, window_bounds = array<i64: 1, 128>}, {transform_indices = @transform_3, window_bounds = array<i64: 8, 128>}]} {
    %c0_i32 = arith.constant 0 : i32
    %0 = arith.cmpi eq, %arg2, %c0_i32 : i32
    %1 = arith.extui %0 : i1 to i32
    %c0_i32_0 = arith.constant 0 : i32
    %2 = arith.cmpi ne, %1, %c0_i32_0 : i32
    scf.if %2 {
      %cst_10 = arith.constant 0.000000e+00 : f32
      %12 = vector.broadcast %cst_10 : f32 to vector<8x128xf32>
      %c0_11 = arith.constant 0 : index
      %c0_12 = arith.constant 0 : index
      %13 = vector.load %arg7[%c0_11, %c0_12] : memref<8x128xf32, #tpu.memory_space<vmem>>, vector<8x128xf32>
      tpu.vector_store %arg7[%c0_11, %c0_12], %12 {strides = array<i32>} : memref<8x128xf32, #tpu.memory_space<vmem>>, vector<8x128xf32>,
    } else {
    }
    %c0 = arith.constant 0 : index
    %c0_1 = arith.constant 0 : index
    %3 = vector.load %arg7[%c0, %c0_1] : memref<8x128xf32, #tpu.memory_space<vmem>>, vector<8x128xf32>
    %c0_2 = arith.constant 0 : index
    %c0_3 = arith.constant 0 : index
    %4 = vector.load %arg3[%c0_2, %c0_3] : memref<8x128xbf16, #tpu.memory_space<vmem>>, vector<8x128xbf16>
    %c0_4 = arith.constant 0 : index
    %c0_5 = arith.constant 0 : index
    %5 = vector.load %arg4[%c0_4, %c0_5] : memref<128x128xbf16, #tpu.memory_space<vmem>>, vector<128x128xbf16>
    %cst = arith.constant dense<0.000000e+00> : vector<8x128xf32>
    %6 = tpu.matmul %4, %5, %cst {dimension_numbers = #tpu.dot_dimension_numbers<[1], [0], [0], [1], [0, 0, 1, 1], [], []>} : vector<8x128xbf16>, vector<128x128xbf16>, vector<8x128xf32> -> vector<8x128xf32>
    %7 = arith.addf %3, %6 : vector<8x128xf32>
    %c0_6 = arith.constant 0 : index
    %c0_7 = arith.constant 0 : index
    %8 = vector.load %arg7[%c0_6, %c0_7] : memref<8x128xf32, #tpu.memory_space<vmem>>, vector<8x128xf32>
    tpu.vector_store %arg7[%c0_6, %c0_7], %7 {strides = array<i32>} : memref<8x128xf32, #tpu.memory_space<vmem>>, vector<8x128xf32>,
    %c0_i32_8 = arith.constant 0 : i32
    %9 = arith.cmpi eq, %arg2, %c0_i32_8 : i32
    %10 = arith.extui %9 : i1 to i32
    %c0_i32_9 = arith.constant 0 : i32
    %11 = arith.cmpi ne, %10, %c0_i32_9 : i32
    scf.if %11 {
      %c0_10 = arith.constant 0 : index
      %c0_11 = arith.constant 0 : index
      %12 = vector.load %arg7[%c0_10, %c0_11] : memref<8x128xf32, #tpu.memory_space<vmem>>, vector<8x128xf32>
      %c0_12 = arith.constant 0 : index
      %c0_13 = arith.constant 0 : index
      %13 = vector.load %arg5[%c0_12, %c0_13] : memref<1x128xf32, #tpu.memory_space<vmem>>, vector<1x128xf32>
      %14 = vector.broadcast %13 : vector<1x128xf32> to vector<8x128xf32>
      %15 = arith.addf %12, %14 : vector<8x128xf32>
      %c0_14 = arith.constant 0 : index
      %c0_15 = arith.constant 0 : index
      %16 = vector.load %arg6[%c0_14, %c0_15] : memref<8x128xf32, #tpu.memory_space<vmem>>, vector<8x128xf32>
      tpu.vector_store %arg6[%c0_14, %c0_15], %15 {strides = array<i32>} : memref<8x128xf32, #tpu.memory_space<vmem>>, vector<8x128xf32>,
    } else {
    }
    return
  }
  func.func @transform_0(%arg0: i32, %arg1: i32, %arg2: i32) -> (i32, i32) {
    %c0_i32 = arith.constant 0 : i32
    return %arg0, %arg2 : i32, i32
  }
  func.func @transform_1(%arg0: i32, %arg1: i32, %arg2: i32) -> (i32, i32) {
    %c0_i32 = arith.constant 0 : i32
    return %arg2, %arg1 : i32, i32
  }
  func.func @transform_2(%arg0: i32, %arg1: i32, %arg2: i32) -> (i32, i32) {
    %c0_i32 = arith.constant 0 : i32
    %c0_i32_0 = arith.constant 0 : i32
    return %c0_i32, %arg1 : i32, i32
  }
  func.func @transform_3(%arg0: i32, %arg1: i32, %arg2: i32) -> (i32, i32) {
    %c0_i32 = arith.constant 0 : i32
    return %arg0, %arg1 : i32, i32
  }
}

module attributes {stable_mosaic.version = 11 : i64} {
  func.func @_mm_kernel(%arg0: i32, %arg1: i32, %arg2: i32, %arg3: memref<8x512xbf16, #tpu.memory_space<vmem>>, %arg4: memref<512x128xbf16, #tpu.memory_space<vmem>>, %arg5: memref<1x128xf32, #tpu.memory_space<vmem>>, %arg6: memref<8x128xf32, #tpu.memory_space<vmem>>, %arg7: memref<8x128xf32, #tpu.memory_space<vmem>>) attributes {dimension_semantics = [#tpu.dimension_semantics<parallel>, #tpu.dimension_semantics<parallel>, #tpu.dimension_semantics<arbitrary>], iteration_bounds = array<i64: 1, 1, 1>, scalar_prefetch = 0 : i64, scratch_operands = 1 : i64, tpu.core_type = #tpu.core_type<tc>, window_params = [{transform_indices = @transform_0, window_bounds = array<i64: 8, 512>}, {transform_indices = @transform_1, window_bounds = array<i64: 512, 128>}, {transform_indices = @transform_2, window_bounds = array<i64: 1, 128>}, {transform_indices = @transform_3, window_bounds = array<i64: 8, 128>}]} {
    %c0_i32 = arith.constant 0 : i32
    %0 = arith.cmpi eq, %arg2, %c0_i32 : i32
    %1 = arith.extui %0 : i1 to i32
    %c0_i32_0 = arith.constant 0 : i32
    %2 = arith.cmpi ne, %1, %c0_i32_0 : i32
    scf.if %2 {
      %cst_10 = arith.constant 0.000000e+00 : f32
      %12 = vector.broadcast %cst_10 : f32 to vector<8x128xf32>
      %c0_11 = arith.constant 0 : index
      %c0_12 = arith.constant 0 : index
      %13 = vector.load %arg7[%c0_11, %c0_12] : memref<8x128xf32, #tpu.memory_space<vmem>>, vector<8x128xf32>
      tpu.vector_store %arg7[%c0_11, %c0_12], %12 {strides = array<i32>} : memref<8x128xf32, #tpu.memory_space<vmem>>, vector<8x128xf32>,
    } else {
    }
    %c0 = arith.constant 0 : index
    %c0_1 = arith.constant 0 : index
    %3 = vector.load %arg7[%c0, %c0_1] : memref<8x128xf32, #tpu.memory_space<vmem>>, vector<8x128xf32>
    %c0_2 = arith.constant 0 : index
    %c0_3 = arith.constant 0 : index
    %4 = vector.load %arg3[%c0_2, %c0_3] : memref<8x512xbf16, #tpu.memory_space<vmem>>, vector<8x512xbf16>
    %c0_4 = arith.constant 0 : index
    %c0_5 = arith.constant 0 : index
    %5 = vector.load %arg4[%c0_4, %c0_5] : memref<512x128xbf16, #tpu.memory_space<vmem>>, vector<512x128xbf16>
    %cst = arith.constant dense<0.000000e+00> : vector<8x128xf32>
    %6 = tpu.matmul %4, %5, %cst {dimension_numbers = #tpu.dot_dimension_numbers<[1], [0], [0], [1], [0, 0, 1, 1], [], []>} : vector<8x512xbf16>, vector<512x128xbf16>, vector<8x128xf32> -> vector<8x128xf32>
    %7 = arith.addf %3, %6 : vector<8x128xf32>
    %c0_6 = arith.constant 0 : index
    %c0_7 = arith.constant 0 : index
    %8 = vector.load %arg7[%c0_6, %c0_7] : memref<8x128xf32, #tpu.memory_space<vmem>>, vector<8x128xf32>
    tpu.vector_store %arg7[%c0_6, %c0_7], %7 {strides = array<i32>} : memref<8x128xf32, #tpu.memory_space<vmem>>, vector<8x128xf32>,
    %c0_i32_8 = arith.constant 0 : i32
    %9 = arith.cmpi eq, %arg2, %c0_i32_8 : i32
    %10 = arith.extui %9 : i1 to i32
    %c0_i32_9 = arith.constant 0 : i32
    %11 = arith.cmpi ne, %10, %c0_i32_9 : i32
    scf.if %11 {
      %c0_10 = arith.constant 0 : index
      %c0_11 = arith.constant 0 : index
      %12 = vector.load %arg7[%c0_10, %c0_11] : memref<8x128xf32, #tpu.memory_space<vmem>>, vector<8x128xf32>
      %c0_12 = arith.constant 0 : index
      %c0_13 = arith.constant 0 : index
      %13 = vector.load %arg5[%c0_12, %c0_13] : memref<1x128xf32, #tpu.memory_space<vmem>>, vector<1x128xf32>
      %14 = vector.broadcast %13 : vector<1x128xf32> to vector<8x128xf32>
      %15 = arith.addf %12, %14 : vector<8x128xf32>
      %cst_14 = arith.constant 0.000000e+00 : f32
      %16 = vector.broadcast %cst_14 : f32 to vector<8x128xf32>
      %17 = arith.cmpf oge, %15, %16 : vector<8x128xf32>
      %cst_15 = arith.constant 2.000000e-01 : f32
      %18 = vector.broadcast %cst_15 : f32 to vector<8x128xf32>
      %19 = arith.mulf %18, %15 : vector<8x128xf32>
      %20 = arith.select %17, %15, %19 : vector<8x128xi1>, vector<8x128xf32>
      %cst_16 = arith.constant 1.41421354 : f32
      %21 = vector.broadcast %cst_16 : f32 to vector<8x128xf32>
      %22 = arith.mulf %20, %21 : vector<8x128xf32>
      %c0_17 = arith.constant 0 : index
      %c0_18 = arith.constant 0 : index
      %23 = vector.load %arg6[%c0_17, %c0_18] : memref<8x128xf32, #tpu.memory_space<vmem>>, vector<8x128xf32>
      tpu.vector_store %arg6[%c0_17, %c0_18], %22 {strides = array<i32>} : memref<8x128xf32, #tpu.memory_space<vmem>>, vector<8x128xf32>,
    } else {
    }
    return
  }
  func.func @transform_0(%arg0: i32, %arg1: i32, %arg2: i32) -> (i32, i32) {
    %c0_i32 = arith.constant 0 : i32
    return %arg0, %arg2 : i32, i32
  }
  func.func @transform_1(%arg0: i32, %arg1: i32, %arg2: i32) -> (i32, i32) {
    %c0_i32 = arith.constant 0 : i32
    return %arg2, %arg1 : i32, i32
  }
  func.func @transform_2(%arg0: i32, %arg1: i32, %arg2: i32) -> (i32, i32) {
    %c0_i32 = arith.constant 0 : i32
    %c0_i32_0 = arith.constant 0 : i32
    return %c0_i32, %arg1 : i32, i32
  }
  func.func @transform_3(%arg0: i32, %arg1: i32, %arg2: i32) -> (i32, i32) {
    %c0_i32 = arith.constant 0 : i32
    return %arg0, %arg1 : i32, i32
  }
}

</mosaic_0001>

<bundles_post_ra>
// kernel: encoder_forward.9
= control target key start
LH: loop header
LB: loop body
LE: loop exit
PB: predicated region body
PF: predicated region fallthrough
CT: control target
= control target key end

     0   :  { %s446_s12 = smov 0   ;;  %s473_s0 = inlined_call_operand.vmem [shape: bf16[2,1,8,396], index: 0, kind: input, shape index: {}]   ;;  %s474_s1 = inlined_call_operand.vmem [shape: bf16[8,8], index: 1, kind: input, shape index: {}]   ;;  %s475_s2 = inlined_call_operand.vmem [shape: f32[8,1], index: 2, kind: input, shape index: {}]   ;;  %s476_s3 = inlined_call_operand.vmem [shape: bf16[2,8,384], index: 3, kind: output, shape index: {}]  }
   0x1 LB: > { %s370_s13 = sadd.s32 4294967295, %s421_s12   ;;  %p374_p0 = scmp.ge.s32.totalorder %s421_s12, 1  ;;  %s421_s12 = sphi %s446_s12, %s13_s12  }
   0x2   : > { %p137_p1 = scmp.lt.s32.totalorder %s421_s12, 3 }
   0x4   : > { %p138_p2 = pnand %p374_p0, %p137_p1 }
   0x5   : > { %p161_p3 = scmp.lt.s32.totalorder (!%p138_p2), %s370_s13, 1  ;;  %v179_v0 = vld [vmem:[%s475_s2] sm:$0xff] (!%p138_p2)  ;;  %v423_v1 = vmov (!%p138_p2), 0.0   ;;  %v424_v2 = vmov (!%p138_p2), 0   ;;  %vm425_vm0 = vmmov (!%p138_p2), 0   ;;  %vm197_vm1 = vcmask (!%p138_p2), 1043456  }
   0x6   : > { %141 = sbr.rel (%p138_p2) target bundleno = 251 (0xfb), region = 32  ;;  %393 = vmatprep.subr.bf16.mxu1 (!%p138_p2), %v423_v1  ;;  %239 = vmatprep.mubr.bf16.mxu0 (!%p138_p2), %v424_v2  ;;  %v176_v8 = vld [vmem:[%s474_s1] sm:$0xf] (!%p138_p2)  ;;  %vm193_vm2 = vcmask (!%p138_p2), 64512  }
   0x7   : > { %395 = vmatprep.mubr.msk.bf16.mxu1 (!%p138_p2), %vm425_vm0, %v423_v1  ;;  %411 = vset.pattern.permute.xlu0 (!%p138_p2), %v424_v2 }
   0x8   : > { %182 = vperm.xlu0 (!%p138_p2), %411, %v179_v0  }
   0xd   : > { %s478_s13 = smov (!%p161_p3, %s370_s13), 1 }
   0xe   : > { %s388_s16 = sshll.u32 %s478_s13, 4  ;;  %s399_s22 = smul.u32 12, %s478_s13 }
   0xf   : > { %s165_s19 = scalar_lea.vmem %s473_s0, %s388_s16 }
  0x10   : > { %v172_v3 = vld [vmem:[%s165_s19] sm:$0xff]  ;;  %v173_v4 = vld [vmem:[%s165_s19 + $0x8] sm:$0xf]  ;;  %s170_s25 = scalar_lea.vmem %s476_s3, %s399_s22 }
  0x11   : > { %v379_v5 = vcombine.high %v172_v3, %v172_v3  ;;  %v378_v6 = vcombine.low %v172_v3, %v172_v3  ;;  %175 = vst [vmem:[#allocation2 + $0x8] sm:$0xf] %v173_v4 }
  0x13   : > { %381 = vmatprep.subr.msk.bf16.mxu0 %vm197_vm1, %v379_v5  ;;  %v199_v7 = vsel %vm197_vm1, %v378_v6, 0 }
  0x14   : > { %208 = vmatpush1.bf16.msra.mxu0 %v199_v7 }
  0x17   : > { %382 = vmatmul.mubr.msk.bf16.vlgmr.msra.gmra.mrb[0].mxu0 %vm193_vm2, %v176_v8 }
  0x18   : > { %v414_v9 = vld [vmem:[#allocation2 + $0x8] ss:$0 sps:$4 sm:$0xff]  }
  0x19   : > { %v205_v10 = vsel %vm197_vm1, %v414_v9, 0 }
  0x1a   : > { %394 = vmatpush3.bf16.msra.mxu1 %v205_v10 }
  0x1d   : > { %396 = vmatmul.mubr.msk.bf16.vlgmr.msra.gmra.mrb[0].mxu1 %vm193_vm2, %v176_v8 }
  0x87   : > { %v183_v11 = vpop.permute.xlu0 %182 }
  0xea   : > { %v241_v12 = vpop.f32.mrb[0].mxu0 }
  0xeb   : > { %v242_v13 = vadd.f32 %v241_v12, %v183_v11  ;;  %v243_v14 = vpop.f32.mrb[1].mxu0 }
  0xec   : > { %v244_v15 = vadd.f32 %v243_v14, %v183_v11  ;;  %v245_v16 = vpop.f32.mrb[2].mxu0 }
  0xed   : > { %vm288_vm3 = vcmp.ge.f32.partialorder %v242_v13, 0.0  ;;  %v291_v17 = vmul.f32 0.2, %v242_v13  ;;  %v246_v18 = vpop.f32.mrb[3].mxu0 }
  0xee   : > { %vm289_vm4 = vcmp.ge.f32.partialorder %v244_v15, 0.0  ;;  %v292_v19 = vmul.f32 0.2, %v244_v15 }
  0xef   : > { %v294_v20 = vsel %vm288_vm3, %v242_v13, %v291_v17 }
  0xf0   : > { %v297_v21 = vmul.f32 1.4142135, %v294_v20  ;;  %v295_v22 = vsel %vm289_vm4, %v244_v15, %v292_v19  ;;  %v282_v23 = vpop.f32.mrb[0].mxu1 }
  0xf1   : > { %v298_v24 = vmul.f32 1.4142135, %v295_v22  ;;  %v283_v25 = vadd.f32 %v282_v23, %v183_v11  ;;  %v397_v26 = vpop.f32.mrb[1].mxu1 }
  0xf2   : > { %v285_v28 = vpop.f32.mrb[2].mxu1 }
  0xf3   : > { %v389_v27 = vpack.c.bf16 %v298_v24, %v297_v21  ;;  %vm290_vm5 = vcmp.ge.f32.partialorder %v283_v25, 0.0  ;;  %v293_v29 = vmul.f32 0.2, %v283_v25  ;;  %v398_v30 = vpop.f32.mrb[3].mxu1 }
  0xf5   : > { %313 = vst [vmem:[%s170_s25] sm:$0xff] %v389_v27  ;;  %v296_v31 = vsel %vm290_vm5, %v283_v25, %v293_v29 }
  0xf6   : > { %v299_v32 = vmul.f32 1.4142135, %v296_v31 }
  0xf8   : > { %v390_v33 = vpack.c.bf16 %v299_v32, %v299_v32 }
  0xfa   : > { %314 = vst [vmem:[%s170_s25 + $0x8] sm:$0xf] %v390_v33 }
  0xfb PF: > { %s13_s12 = sadd.s32 1, %s421_s12  }
  0xfc   : > { %p10_p4 = scmp.ge.s32.totalorder %s13_s12, 4  }
  0xfe   :  { %12 = sbr.rel (!%p10_p4) target bundleno = 1 (0x1), region = 62 }

// kernel: encoder_forward.10
= control target key start
LH: loop header
LB: loop body
LE: loop exit
PB: predicated region body
PF: predicated region fallthrough
CT: control target
= control target key end

     0   :  { %s713_s12 = smov 0   ;;  %s769_s0 = inlined_call_operand.vmem [shape: bf16[2,1,8,432], index: 0, kind: input, shape index: {}]   ;;  %s770_s1 = inlined_call_operand.vmem [shape: bf16[8,72], index: 1, kind: input, shape index: {}]   ;;  %s771_s2 = inlined_call_operand.vmem [shape: f32[8,1], index: 2, kind: input, shape index: {}]   ;;  %s772_s3 = inlined_call_operand.vmem [shape: bf16[2,8,384], index: 3, kind: output, shape index: {}]  }
   0x1 LB: > { %s595_s13 = sadd.s32 4294967295, %s680_s12   ;;  %p599_p0 = scmp.ge.s32.totalorder %s680_s12, 1  ;;  %s680_s12 = sphi %s713_s12, %s13_s12  }
   0x2   : > { %p137_p1 = scmp.lt.s32.totalorder %s680_s12, 3 }
   0x4   : > { %p138_p2 = pnand %p599_p0, %p137_p1 }
   0x5   : > { %p161_p3 = scmp.lt.s32.totalorder (!%p138_p2), %s595_s13, 1  ;;  %s682_s18 = smov (!%p138_p2), 126   ;;  %v684_v3 = vmov (!%p138_p2), 0.0   ;;  %v690_v4 = vmov (!%p138_p2), 0   ;;  %vm692_vm0 = vmmov (!%p138_p2), 0   ;;  %v340_v5 = vld [vmem:[%s771_s2] sm:$0xff] (!%p138_p2) }
   0x6   : > { %141 = sbr.rel (%p138_p2) target bundleno = 397 (0x18d), region = 32  ;;  %s683_s19 = smov (!%p138_p2), 127   ;;  %634 = vmatprep.subr.bf16.mxu1 (!%p138_p2), %v684_v3  ;;  %464 = vmatprep.mubr.bf16.mxu0 (!%p138_p2), %v690_v4  ;;  %vm186_vm1 = vcmask (!%p138_p2), 1043456   ;;  %vm206_vm2 = vcmask (!%p138_p2), 1031168   ;;  %vm188_vm3 = vcmask (!%p138_p2), 1039360   ;;  %vm224_vm4 = vcmask (!%p138_p2), 900096  }
   0x7   : > { %s685_s20 = smov (!%p138_p2), 110   ;;  %s686_s21 = smov (!%p138_p2), 109   ;;  %668 = vset.pattern.permute.xlu0 (!%p138_p2), %v690_v4  ;;  %644 = vmatprep.mubr.msk.bf16.mxu1 (!%p138_p2), %vm692_vm0, %v684_v3  ;;  %vm242_vm5 = vcmask (!%p138_p2), 891904   ;;  %vm260_vm6 = vcmask (!%p138_p2), 883712   ;;  %vm278_vm7 = vcmask (!%p138_p2), 752640   ;;  %vm296_vm8 = vcmask (!%p138_p2), 744448  }
   0x8   : > { %s687_s22 = smov (!%p138_p2), 108   ;;  %s688_s23 = smov (!%p138_p2), 92   ;;  %vm314_vm9 = vcmask (!%p138_p2), 736256   ;;  %vm418_vm10 = vcmask (!%p138_p2), 588800  }
   0x9   : > { %s689_s24 = smov (!%p138_p2), 91   ;;  %s691_s25 = smov (!%p138_p2), 90  }
   0xd   : > { %s774_s13 = smov (!%p161_p3, %s595_s13), 1 }
   0xe   : > { %s625_s14 = sshll.u32 %s774_s13, 4  ;;  %s648_s30 = smul.u32 12, %s774_s13 }
   0xf   : > { %s165_s17 = scalar_lea.vmem %s769_s0, %s625_s14 }
  0x10   : > { %v727_v0 = vld [vmem:[%s165_s17] sm:$0xff]  ;;  %v173_v1 = vld [vmem:[%s165_s17 + $0x8] sm:$0xf]  ;;  %s170_s6 = scalar_lea.vmem %s772_s3, %s648_s30 }
  0x11   : > { %199 = vrot.lane.b32.xlu1 %v727_v0, %s682_s18  ;;  %180 = vrot.lane.b32.xlu0 %v727_v0, %s683_s19  ;;  %175 = vst [vmem:[#allocation2 + $0x8] sm:$0xf] %v173_v1  ;;  %v196_v2 = vld [vmem:[%s165_s17 + $0x8] sm:$0xff] }
  0x15   : > { %201 = vrot.lane.b32.xlu1 %v196_v2, %s682_s18  ;;  %182 = vrot.lane.b32.xlu0 %v196_v2, %s683_s19 }
  0x19   : > { %219 = vrot.lane.b32.xlu1 %v196_v2, %s685_s20  ;;  %217 = vrot.lane.b32.xlu0 %v727_v0, %s685_s20 }
  0x1d   : > { %237 = vrot.lane.b32.xlu1 %v196_v2, %s686_s21  ;;  %235 = vrot.lane.b32.xlu0 %v727_v0, %s686_s21 }
  0x21   : > { %255 = vrot.lane.b32.xlu1 %v196_v2, %s687_s22  ;;  %253 = vrot.lane.b32.xlu0 %v727_v0, %s687_s22 }
  0x25   : > { %273 = vrot.lane.b32.xlu1 %v196_v2, %s688_s23  ;;  %271 = vrot.lane.b32.xlu0 %v727_v0, %s688_s23 }
  0x29   : > { %291 = vrot.lane.b32.xlu1 %v196_v2, %s689_s24  ;;  %289 = vrot.lane.b32.xlu0 %v727_v0, %s689_s24 }
  0x2d   : > { %309 = vrot.lane.b32.xlu1 %v196_v2, %s691_s25  ;;  %307 = vrot.lane.b32.xlu0 %v727_v0, %s691_s25 }
  0x31   : > { %343 = vperm.xlu0 %668, %v340_v5  }
  0x83   : > { %v200_v6 = vpop.permute.xlu1 %199  ;;  %v181_v7 = vpop.permute.xlu0 %180 }
  0x84   : > { %v184_v8 = vrot.slane %v181_v7, 4  ;;  %v203_v11 = vrot.slane %v200_v6, 4 }
  0x87   : > { %v202_v9 = vpop.permute.xlu1 %201  ;;  %v183_v10 = vpop.permute.xlu0 %182 }
  0x88   : > { %v204_v12 = vrot.slane %v202_v9, 4  ;;  %v185_v13 = vrot.slane %v183_v10, 4 }
  0x8a   : > { %v205_v14 = vsel %vm186_vm1, %v203_v11, %v204_v12  ;;  %v208_v15 = vsel %vm206_vm2, %v202_v9, %v204_v12  ;;  %v187_v16 = vsel %vm186_vm1, %v184_v8, %v185_v13  ;;  %v190_v17 = vsel %vm188_vm3, %v183_v10, %v185_v13 }
  0x8b   : > { %v207_v18 = vsel %vm206_vm2, %v200_v6, %v205_v14  ;;  %212 = vst [vmem:[#allocation2 + $0x20] sm:$0xf] %v208_v15  ;;  %v189_v19 = vsel %vm188_vm3, %v181_v7, %v187_v16  ;;  %194 = vst [vmem:[#allocation2 + $0x14] sm:$0xf] %v190_v17  ;;  %v220_v20 = vpop.permute.xlu1 %219  ;;  %v218_v21 = vpop.permute.xlu0 %217  ;;  %v321_v14 = vld [vmem:[%s770_s1] sm:$0xf] }
  0x8c   : > { %v222_v22 = vrot.slane %v220_v20, 4  ;;  %v221_v23 = vrot.slane %v218_v21, 4  ;;  %v604_v24 = vcombine.high %v727_v0, %v189_v19  ;;  %v603_v25 = vcombine.low %v727_v0, %v189_v19 }
  0x8e   : > { %v226_v26 = vsel %vm224_vm4, %v220_v20, %v222_v22  ;;  %v223_v27 = vsel %vm186_vm1, %v221_v23, %v222_v22  ;;  %432 = vmatprep.subr.bf16.mxu0 %v604_v24 }
  0x8f   : > { %230 = vst [vmem:[#allocation2 + $0x2c] sm:$0xf] %v226_v26  ;;  %v225_v28 = vsel %vm224_vm4, %v218_v21, %v223_v27  ;;  %v238_v29 = vpop.permute.xlu1 %237  ;;  %v236_v30 = vpop.permute.xlu0 %235  ;;  %433 = vmatpush1.bf16.msra.mxu0 %v603_v25 }
  0x90   : > { %v240_v31 = vrot.slane %v238_v29, 4  ;;  %v239_v32 = vrot.slane %v236_v30, 4  ;;  %v607_v33 = vcombine.high %v207_v18, %v225_v28  ;;  %v606_v34 = vcombine.low %v207_v18, %v225_v28 }
  0x92   : > { %v244_v35 = vsel %vm242_vm5, %v238_v29, %v240_v31  ;;  %v241_v36 = vsel %vm186_vm1, %v239_v32, %v240_v31  ;;  %v669_v37 = vld [vmem:[#allocation2 + $0x8] ss:$12 sps:$4 sm:$0xff]   ;;  %434 = vmatprep.subr.bf16.mxu0 %v607_v33 }
  0x93   : > { %248 = vst [vmem:[#allocation2 + $0x38] sm:$0xf] %v244_v35  ;;  %v243_v38 = vsel %vm242_vm5, %v236_v30, %v241_v36  ;;  %v256_v39 = vpop.permute.xlu1 %255  ;;  %v254_v40 = vpop.permute.xlu0 %253  ;;  %435 = vmatpush1.bf16.msra.mxu0 %v606_v34  ;;  %635 = vmatpush3.bf16.msra.mxu1 %v669_v37 }
  0x94   : > { %v258_v41 = vrot.slane %v256_v39, 4  ;;  %v257_v42 = vrot.slane %v254_v40, 4  ;;  %636 = vmatprep.subr.bf16.mxu1 %v684_v3 }
  0x96   : > { %v262_v43 = vsel %vm260_vm6, %v256_v39, %v258_v41  ;;  %v259_v44 = vsel %vm186_vm1, %v257_v42, %v258_v41  ;;  %v670_v45 = vld [vmem:[#allocation2 + $0x20] ss:$12 sps:$4 sm:$0xff]  }
  0x97   : > { %266 = vst [vmem:[#allocation2 + $0x44] sm:$0xf] %v262_v43  ;;  %v261_v46 = vsel %vm260_vm6, %v254_v40, %v259_v44  ;;  %v274_v47 = vpop.permute.xlu1 %273  ;;  %v272_v48 = vpop.permute.xlu0 %271  ;;  %637 = vmatpush3.bf16.msra.mxu1 %v670_v45 }
  0x98   : > { %v276_v49 = vrot.slane %v274_v47, 4  ;;  %v275_v50 = vrot.slane %v272_v48, 4  ;;  %v610_v51 = vcombine.high %v243_v38, %v261_v46  ;;  %v609_v52 = vcombine.low %v243_v38, %v261_v46  ;;  %638 = vmatprep.subr.bf16.mxu1 %v684_v3 }
  0x9a   : > { %v280_v53 = vsel %vm278_vm7, %v274_v47, %v276_v49  ;;  %v277_v54 = vsel %vm186_vm1, %v275_v50, %v276_v49  ;;  %436 = vmatprep.subr.bf16.mxu0 %v610_v51 }
  0x9b   : > { %284 = vst [vmem:[#allocation2 + $0x50] sm:$0xf] %v280_v53  ;;  %v279_v55 = vsel %vm278_vm7, %v272_v48, %v277_v54  ;;  %v292_v56 = vpop.permute.xlu1 %291  ;;  %v290_v57 = vpop.permute.xlu0 %289  ;;  %437 = vmatpush1.bf16.msra.mxu0 %v609_v52 }
  0x9c   : > { %v294_v58 = vrot.slane %v292_v56, 4  ;;  %v293_v59 = vrot.slane %v290_v57, 4 }
  0x9e   : > { %v298_v60 = vsel %vm296_vm8, %v292_v56, %v294_v58  ;;  %v295_v61 = vsel %vm186_vm1, %v293_v59, %v294_v58  ;;  %v671_v62 = vld [vmem:[#allocation2 + $0x38] ss:$12 sps:$4 sm:$0xff]  }
  0x9f   : > { %302 = vst [vmem:[#allocation2 + $0x5c] sm:$0xf] %v298_v60  ;;  %v297_v63 = vsel %vm296_vm8, %v290_v57, %v295_v61  ;;  %v310_v0 = vpop.permute.xlu1 %309  ;;  %v308_v1 = vpop.permute.xlu0 %307  ;;  %639 = vmatpush3.bf16.msra.mxu1 %v671_v62 }
  0xa0   : > { %v312_v2 = vrot.slane %v310_v0, 4  ;;  %v311_v4 = vrot.slane %v308_v1, 4  ;;  %v613_v5 = vcombine.high %v279_v55, %v297_v63  ;;  %v612_v6 = vcombine.low %v279_v55, %v297_v63  ;;  %640 = vmatprep.subr.bf16.mxu1 %v684_v3 }
  0xa2   : > { %v316_v7 = vsel %vm314_vm9, %v310_v0, %v312_v2  ;;  %v313_v8 = vsel %vm186_vm1, %v311_v4, %v312_v2  ;;  %438 = vmatprep.subr.bf16.mxu0 %v613_v5 }
  0xa3   : > { %320 = vst [vmem:[#allocation2 + $0x68] sm:$0xf] %v316_v7  ;;  %v315_v9 = vsel %vm314_vm9, %v308_v1, %v313_v8  ;;  %439 = vmatpush1.bf16.msra.mxu0 %v612_v6 }
  0xa4   : > { %v616_v10 = vcombine.high %v315_v9, %v315_v9  ;;  %v615_v11 = vcombine.low %v315_v9, %v315_v9 }
  0xa6   : > { %v672_v12 = vld [vmem:[#allocation2 + $0x50] ss:$12 sps:$4 sm:$0xff]   ;;  %618 = vmatprep.subr.msk.bf16.mxu0 %vm186_vm1, %v616_v10  ;;  %v424_v13 = vsel %vm186_vm1, %v615_v11, 0 }
  0xa7   : > { %441 = vmatpush1.bf16.msra.mxu0 %v424_v13  ;;  %641 = vmatpush3.bf16.msra.mxu1 %v672_v12 }
  0xa8   : > { %642 = vmatprep.subr.bf16.mxu1 %v684_v3 }
  0xaa   : > { %v673_v15 = vld [vmem:[#allocation2 + $0x68] ss:$0 sps:$4 sm:$0xff]   ;;  %619 = vmatmul.mubr.msk.bf16.vlgmr.msra.gmra.mrb[0].mxu0 %vm418_vm10, %v321_v14 }
  0xab   : > { %v430_v16 = vsel %vm186_vm1, %v673_v15, 0 }
  0xac   : > { %643 = vmatpush3.bf16.msra.mxu1 %v430_v16 }
  0xaf   : > { %645 = vmatmul.mubr.msk.bf16.vlgmr.msra.gmra.mrb[0].mxu1 %vm418_vm10, %v321_v14 }
  0xb0   : > { %v344_v17 = vpop.permute.xlu0 %343 }
 0x17d   : > { %v466_v18 = vpop.f32.mrb[0].mxu0 }
 0x17e   : > { %v467_v19 = vadd.f32 %v466_v18, %v344_v17  ;;  %v468_v20 = vpop.f32.mrb[1].mxu0 }
 0x17f   : > { %v469_v21 = vadd.f32 %v468_v20, %v344_v17  ;;  %v470_v22 = vpop.f32.mrb[2].mxu0 }
 0x180   : > { %vm513_vm11 = vcmp.ge.f32.partialorder %v467_v19, 0.0  ;;  %v516_v23 = vmul.f32 0.2, %v467_v19  ;;  %v471_v24 = vpop.f32.mrb[3].mxu0 }
 0x181   : > { %vm514_vm12 = vcmp.ge.f32.partialorder %v469_v21, 0.0  ;;  %v517_v25 = vmul.f32 0.2, %v469_v21 }
 0x182   : > { %v519_v26 = vsel %vm513_vm11, %v467_v19, %v516_v23  ;;  %v507_v3 = vpop.f32.mrb[0].mxu1 }
 0x183   : > { %v522_v27 = vmul.f32 1.4142135, %v519_v26  ;;  %v520_v28 = vsel %vm514_vm12, %v469_v21, %v517_v25  ;;  %v508_v29 = vadd.f32 %v507_v3, %v344_v17  ;;  %v646_v30 = vpop.f32.mrb[1].mxu1 }
 0x184   : > { %v523_v31 = vmul.f32 1.4142135, %v520_v28  ;;  %v510_v32 = vpop.f32.mrb[2].mxu1 }
 0x185   : > { %vm515_vm13 = vcmp.ge.f32.partialorder %v508_v29, 0.0  ;;  %v518_v33 = vmul.f32 0.2, %v508_v29  ;;  %v647_v35 = vpop.f32.mrb[3].mxu1 }
 0x186   : > { %v626_v34 = vpack.c.bf16 %v523_v31, %v522_v27 }
 0x187   : > { %v521_v36 = vsel %vm515_vm13, %v508_v29, %v518_v33 }
 0x188   : > { %538 = vst [vmem:[%s170_s6] sm:$0xff] %v626_v34  ;;  %v524_v37 = vmul.f32 1.4142135, %v521_v36 }
 0x18a   : > { %v627_v38 = vpack.c.bf16 %v524_v37, %v524_v37 }
 0x18c   : > { %539 = vst [vmem:[%s170_s6 + $0x8] sm:$0xf] %v627_v38 }
 0x18d PF: > { %s13_s12 = sadd.s32 1, %s680_s12  }
 0x18e   : > { %p10_p4 = scmp.ge.s32.totalorder %s13_s12, 4  }
 0x190   :  { %12 = sbr.rel (!%p10_p4) target bundleno = 1 (0x1), region = 62 }

// kernel: encoder_forward.11
= control target key start
LH: loop header
LB: loop body
LE: loop exit
PB: predicated region body
PF: predicated region fallthrough
CT: control target
= control target key end

     0   :  { %s1463_s18 = smov 0   ;;  %s1791_s0 = inlined_call_operand.vmem [shape: bf16[2,4,8,150], index: 0, kind: input, shape index: {}]   ;;  %s1792_s1 = inlined_call_operand.vmem [shape: bf16[16,288], index: 1, kind: input, shape index: {}]   ;;  %s1793_s2 = inlined_call_operand.vmem [shape: f32[16,1], index: 2, kind: input, shape index: {}]   ;;  %s1794_s3 = inlined_call_operand.vmem [shape: bf16[2,4,8,140], index: 3, kind: input, shape index: {}]   ;;  %s1795_s4 = inlined_call_operand.vmem [shape: bf16[16,128], index: 4, kind: input, shape index: {}]   ;;  %s1796_s5 = inlined_call_operand.vmem [shape: bf16[2,16,128], index: 5, kind: output, shape index: {}]  }
   0x1 LB: > { %s1145_s19 = sadd.s32 4294967295, %s1420_s18   ;;  %p1149_p0 = scmp.ge.s32.totalorder %s1420_s18, 1  ;;  %s1420_s18 = sphi %s1463_s18, %s15_s18  }
   0x2   : > { %p197_p1 = scmp.lt.s32.totalorder %s1420_s18, 3 }
   0x4   : > { %p198_p2 = pnand %p1149_p0, %p197_p1 }
   0x5   : > { %p230_p3 = scmp.lt.s32.totalorder (!%p198_p2), %s1145_s19, 1  ;;  %s1422_s24 = smov (!%p198_p2), 116   ;;  %v1426_v14 = vmov (!%p198_p2), 0.0   ;;  %vm1431_vm0 = vmmov (!%p198_p2), 0   ;;  %vm435_vm1 = vcmask (!%p198_p2), 949248   ;;  %vm381_vm2 = vcmask (!%p198_p2), 965632  }
   0x6   : > { %201 = sbr.rel (%p198_p2) target bundleno = 540 (0x21c), region = 40  ;;  %s1423_s28 = smov (!%p198_p2), 118   ;;  %1340 = vmatprep.subr.bf16.mxu1 (!%p198_p2), %v1426_v14  ;;  %1344 = vmatprep.mubr.msk.bf16.mxu1 (!%p198_p2), %vm1431_vm0, %v1426_v14  ;;  %vm265_vm3 = vcmask (!%p198_p2), 1039360   ;;  %vm567_vm4 = vcmask (!%p198_p2), 875520   ;;  %v1412_v54 = vld [vmem:[%s1792_s1 + $0x4] ss:$12 sps:$4 sm:$0xff] (!%p198_p2)  }
   0x7   : > { %s1424_s29 = smov (!%p198_p2), 127   ;;  %s1425_s30 = smov (!%p198_p2), 107   ;;  %774 = vmatprep.mubr.bf16.mxu0 (!%p198_p2), %v1412_v54  ;;  %vm408_vm5 = vcmask (!%p198_p2), 957440   ;;  %vm292_vm6 = vcmask (!%p198_p2), 1031168   ;;  %vm594_vm7 = vcmask (!%p198_p2), 867328   ;;  %vm540_vm8 = vcmask (!%p198_p2), 883712  }
   0x8   : > { %s1427_s6 = smov (!%p198_p2), 117   ;;  %s1428_s7 = smov (!%p198_p2), 126   ;;  %vm738_vm9 = vcmask (!%p198_p2), 261120  }
   0x9   : > { %s1429_s8 = smov (!%p198_p2), 106   ;;  %s1430_s9 = smov (!%p198_p2), 108  }
   0xd   : > { %s1798_s19 = smov (!%p230_p3, %s1145_s19), 1 }
   0xe   : > { %s1296_s20 = sshll.u32 %s1798_s19, 5 }
   0xf   : > { %s1477_s23 = scalar_lea.vmem %s1791_s0, %s1296_s20  ;;  %s1498_s27 = scalar_lea.vmem %s1794_s3, %s1296_s20 }
  0x10   : > { %v1195_v0 = vld [vmem:[%s1477_s23 + $0x8] sm:$0xff]  ;;  %v425_v1 = vld [vmem:[%s1477_s23] sm:$0xff]  ;;  %v1198_v4 = vld [vmem:[%s1477_s23 + $0x10] sm:$0xff] }
  0x11   : > { %v1481_v2 = vcombine.low %v1195_v0, %v1195_v0  ;;  %v1483_v3 = vcombine.low %v425_v1, %v425_v1  ;;  %v246_v5 = vld [vmem:[%s1477_s23] sm:$0xf]  ;;  %v1487_v6 = vcombine.high %v1195_v0, %v1195_v0  ;;  %v1491_v7 = vcombine.high %v425_v1, %v425_v1  ;;  %v1405_v8 = vld [vmem:[%s1477_s23 + $0x8] ss:$0 sps:$4 sm:$0xff]   ;;  %v1201_v11 = vld [vmem:[%s1477_s23 + $0x18] sm:$0xff] }
  0x12   : > { %247 = vst [vmem:[#allocation2] sm:$0xf] %v246_v5  ;;  %254 = vst [vmem:[#allocation2] sm:$0xf0] %v1405_v8  ;;  %v1505_v9 = vcombine.high %v1198_v4, %v1198_v4  ;;  %v1507_v10 = vcombine.low %v1198_v4, %v1198_v4  ;;  %v1514_v12 = vcombine.high %v1201_v11, %v1201_v11  ;;  %v1406_v15 = vld [vmem:[%s1477_s23 + $0x18] ss:$0 sps:$4 sm:$0xff]  }
  0x13   : > { %445 = vrot.lane.b32.xlu1 %v1481_v2, %s1422_s24  ;;  %431 = vrot.lane.b32.xlu0 %v1483_v3, %s1422_s24  ;;  %v1516_v13 = vcombine.low %v1201_v11, %v1201_v11  ;;  %v1168_v16 = vld [vmem:[%s1477_s23 + $0x10] sm:$0xf]  ;;  %318 = vst [vmem:[#allocation2 + $0x18] sm:$0xf0] %v1406_v15  ;;  %v1408_v17 = vld [vmem:[%s1498_s27 + $0x8] ss:$0 sps:$4 sm:$0xff]  }
  0x14   : > { %311 = vst [vmem:[#allocation2 + $0x18] sm:$0xf] %v1168_v16  ;;  %v832_v18 = vld [vmem:[%s1498_s27] sm:$0xf]  ;;  %840 = vst [vmem:[#allocation3] sm:$0xf0] %v1408_v17 }
  0x15   : > { %833 = vst [vmem:[#allocation3] sm:$0xf] %v832_v18  ;;  %v841_v19 = vld [vmem:[%s1498_s27] sm:$0xff]  ;;  %v1257_v22 = vld [vmem:[%s1498_s27 + $0x8] sm:$0xff]  ;;  %v1409_v25 = vld [vmem:[%s1498_s27 + $0x18] ss:$0 sps:$4 sm:$0xff]  }
  0x16   : > { %v1592_v20 = vcombine.high %v841_v19, %v841_v19  ;;  %v1594_v21 = vcombine.low %v841_v19, %v841_v19  ;;  %v1603_v23 = vcombine.high %v1257_v22, %v1257_v22  ;;  %v1605_v24 = vcombine.low %v1257_v22, %v1257_v22  ;;  %v1260_v26 = vld [vmem:[%s1498_s27 + $0x10] sm:$0xf]  ;;  %876 = vst [vmem:[#allocation3 + $0x10] sm:$0xf0] %v1409_v25  ;;  %v1266_v32 = vld [vmem:[%s1498_s27 + $0x18] sm:$0xff] }
  0x17   : > { %447 = vrot.lane.b32.xlu1 %v1487_v6, %s1422_s24  ;;  %433 = vrot.lane.b32.xlu0 %v1491_v7, %s1422_s24  ;;  %869 = vst [vmem:[#allocation3 + $0x10] sm:$0xf] %v1260_v26  ;;  %v1263_v27 = vld [vmem:[%s1498_s27 + $0x10] sm:$0xff]  ;;  %v1657_v37 = vcombine.high %v1266_v32, %v1266_v32  ;;  %v1659_v38 = vcombine.low %v1266_v32, %v1266_v32 }
  0x18   : > { %v1646_v30 = vcombine.high %v1263_v27, %v1263_v27  ;;  %v1648_v31 = vcombine.low %v1263_v27, %v1263_v27  ;;  %v711_v27 = vld [vmem:[%s1793_s2] sm:$0xff] }
  0x19   : > { %v693_v44 = vld [vmem:[#allocation2] sm:$0xff] }
  0x1b   : > { %460 = vrot.lane.b32.xlu1 %v1505_v9, %s1423_s28  ;;  %458 = vrot.lane.b32.xlu0 %v1507_v10, %s1423_s28 }
  0x1f   : > { %473 = vrot.lane.b32.xlu1 %v1514_v12, %s1423_s28  ;;  %471 = vrot.lane.b32.xlu0 %v1516_v13, %s1423_s28 }
  0x23   : > { %263 = vrot.lane.b32.xlu1 %v1491_v7, %s1424_s29  ;;  %261 = vrot.lane.b32.xlu0 %v1483_v3, %s1424_s29 }
  0x27   : > { %277 = vrot.lane.b32.xlu1 %v1487_v6, %s1424_s29  ;;  %275 = vrot.lane.b32.xlu0 %v1481_v2, %s1424_s29 }
  0x2b   : > { %645 = vrot.lane.b32.xlu1 %v1505_v9, %s1425_s30  ;;  %643 = vrot.lane.b32.xlu0 %v1507_v10, %s1425_s30 }
  0x2f   : > { %658 = vrot.lane.b32.xlu1 %v1514_v12, %s1425_s30  ;;  %656 = vrot.lane.b32.xlu0 %v1516_v13, %s1425_s30 }
  0x33   : > { %486 = vrot.lane.b32.xlu1 %v1505_v9, %s1427_s6  ;;  %484 = vrot.lane.b32.xlu0 %v1507_v10, %s1427_s6 }
  0x37   : > { %499 = vrot.lane.b32.xlu1 %v1514_v12, %s1427_s6  ;;  %497 = vrot.lane.b32.xlu0 %v1516_v13, %s1427_s6 }
  0x3b   : > { %290 = vrot.lane.b32.xlu1 %v1491_v7, %s1428_s7  ;;  %288 = vrot.lane.b32.xlu0 %v1483_v3, %s1428_s7 }
  0x3f   : > { %304 = vrot.lane.b32.xlu1 %v1487_v6, %s1428_s7  ;;  %302 = vrot.lane.b32.xlu0 %v1481_v2, %s1428_s7 }
  0x43   : > { %671 = vrot.lane.b32.xlu1 %v1505_v9, %s1429_s8  ;;  %669 = vrot.lane.b32.xlu0 %v1507_v10, %s1429_s8 }
  0x47   : > { %684 = vrot.lane.b32.xlu1 %v1514_v12, %s1429_s8  ;;  %682 = vrot.lane.b32.xlu0 %v1516_v13, %s1429_s8 }
  0x4b   : > { %512 = vrot.lane.b32.xlu1 %v1505_v9, %s1422_s24  ;;  %510 = vrot.lane.b32.xlu0 %v1507_v10, %s1422_s24 }
  0x4f   : > { %525 = vrot.lane.b32.xlu1 %v1514_v12, %s1422_s24  ;;  %523 = vrot.lane.b32.xlu0 %v1516_v13, %s1422_s24  ;;  %s1298_s24 = sshll.u32 %s1798_s19, 3 }
  0x50   : > { %s244_s27 = scalar_lea.vmem %s1796_s5, %s1298_s24 }
  0x53   : > { %538 = vrot.lane.b32.xlu1 %v1491_v7, %s1430_s9  ;;  %536 = vrot.lane.b32.xlu0 %v1483_v3, %s1430_s9 }
  0x57   : > { %552 = vrot.lane.b32.xlu1 %v1487_v6, %s1430_s9  ;;  %550 = vrot.lane.b32.xlu0 %v1481_v2, %s1430_s9 }
  0x5b   : > { %327 = vrot.lane.b32.xlu1 %v1505_v9, %s1424_s29  ;;  %325 = vrot.lane.b32.xlu0 %v1507_v10, %s1424_s29 }
  0x5f   : > { %340 = vrot.lane.b32.xlu1 %v1514_v12, %s1424_s29  ;;  %338 = vrot.lane.b32.xlu0 %v1516_v13, %s1424_s29 }
  0x63   : > { %849 = vrot.lane.b32.xlu1 %v1592_v20, %s1424_s29  ;;  %847 = vrot.lane.b32.xlu0 %v1594_v21, %s1424_s29 }
  0x67   : > { %862 = vrot.lane.b32.xlu1 %v1603_v23, %s1424_s29  ;;  %860 = vrot.lane.b32.xlu0 %v1605_v24, %s1424_s29 }
  0x6b   : > { %565 = vrot.lane.b32.xlu1 %v1491_v7, %s1425_s30  ;;  %563 = vrot.lane.b32.xlu0 %v1483_v3, %s1425_s30 }
  0x6f   : > { %579 = vrot.lane.b32.xlu1 %v1487_v6, %s1425_s30  ;;  %577 = vrot.lane.b32.xlu0 %v1481_v2, %s1425_s30 }
  0x73   : > { %353 = vrot.lane.b32.xlu1 %v1505_v9, %s1428_s7  ;;  %351 = vrot.lane.b32.xlu0 %v1507_v10, %s1428_s7 }
  0x77   : > { %366 = vrot.lane.b32.xlu1 %v1514_v12, %s1428_s7  ;;  %364 = vrot.lane.b32.xlu0 %v1516_v13, %s1428_s7 }
  0x7b   : > { %592 = vrot.lane.b32.xlu1 %v1491_v7, %s1429_s8  ;;  %590 = vrot.lane.b32.xlu0 %v1483_v3, %s1429_s8 }
  0x7f   : > { %606 = vrot.lane.b32.xlu1 %v1487_v6, %s1429_s8  ;;  %604 = vrot.lane.b32.xlu0 %v1481_v2, %s1429_s8 }
  0x83   : > { %379 = vrot.lane.b32.xlu1 %v1491_v7, %s1423_s28  ;;  %377 = vrot.lane.b32.xlu0 %v1483_v3, %s1423_s28 }
  0x85   : > { %v446_v28 = vpop.permute.xlu1 %445  ;;  %v432_v29 = vpop.permute.xlu0 %431 }
  0x87   : > { %393 = vrot.lane.b32.xlu1 %v1487_v6, %s1423_s28  ;;  %391 = vrot.lane.b32.xlu0 %v1481_v2, %s1423_s28 }
  0x89   : > { %v448_v33 = vpop.permute.xlu1 %447  ;;  %v434_v34 = vpop.permute.xlu0 %433 }
  0x8a   : > { %v449_v35 = vsel %vm435_vm1, %v446_v28, %v448_v33  ;;  %v436_v36 = vsel %vm435_vm1, %v432_v29, %v434_v34 }
  0x8b   : > { %451 = vst [vmem:[#allocation2 + $0x40] sm:$0xf0] %v449_v35  ;;  %438 = vst [vmem:[#allocation2 + $0x40] sm:$0xf] %v436_v36  ;;  %885 = vrot.lane.b32.xlu1 %v1646_v30, %s1424_s29  ;;  %883 = vrot.lane.b32.xlu0 %v1648_v31, %s1424_s29 }
  0x8d   : > { %v461_v39 = vpop.permute.xlu1 %460  ;;  %v459_v40 = vpop.permute.xlu0 %458 }
  0x8e   : > { %v462_v41 = vsel %vm381_vm2, %v459_v40, %v461_v39 }
  0x8f   : > { %464 = vst [vmem:[#allocation2 + $0x48] sm:$0xf] %v462_v41  ;;  %898 = vrot.lane.b32.xlu1 %v1657_v37, %s1424_s29  ;;  %896 = vrot.lane.b32.xlu0 %v1659_v38, %s1424_s29 }
  0x91   : > { %v474_v42 = vpop.permute.xlu1 %473  ;;  %v472_v43 = vpop.permute.xlu0 %471 }
  0x92   : > { %v475_v45 = vsel %vm381_vm2, %v472_v43, %v474_v42  ;;  %v701_v46 = vld [vmem:[#allocation2 + $0x40] sm:$0xff] }
  0x93   : > { %477 = vst [vmem:[#allocation2 + $0x48] sm:$0xf0] %v475_v45  ;;  %1306 = vmatprep.subr.bf16.mxu0 %v701_v46  ;;  %619 = vrot.lane.b32.xlu1 %v1505_v9, %s1430_s9 }
  0x94   : > { %617 = vrot.lane.b32.xlu0 %v1507_v10, %s1430_s9  ;;  %1307 = vmatpush3.bf16.msra.mxu0 %v693_v44 }
  0x95   : > { %v264_v47 = vpop.permute.xlu1 %263  ;;  %v262_v48 = vpop.permute.xlu0 %261 }
  0x96   : > { %v266_v49 = vsel %vm265_vm3, %v262_v48, %v264_v47 }
  0x97   : > { %268 = vst [vmem:[#allocation2 + $0x8] sm:$0xf] %v266_v49  ;;  %632 = vrot.lane.b32.xlu1 %v1514_v12, %s1430_s9 }
  0x98   : > { %630 = vrot.lane.b32.xlu0 %v1516_v13, %s1430_s9 }
  0x99   : > { %v278_v50 = vpop.permute.xlu1 %277  ;;  %v276_v51 = vpop.permute.xlu0 %275 }
  0x9a   : > { %v279_v52 = vsel %vm265_vm3, %v276_v51, %v278_v50  ;;  %v702_v53 = vld [vmem:[#allocation2 + $0x48] sm:$0xff] }
  0x9b   : > { %281 = vst [vmem:[#allocation2 + $0x8] sm:$0xf0] %v279_v52  ;;  %406 = vrot.lane.b32.xlu1 %v1491_v7, %s1427_s6  ;;  %1308 = vmatprep.subr.bf16.mxu0 %v702_v53 }
  0x9c   : > { %404 = vrot.lane.b32.xlu0 %v1483_v3, %s1427_s6 }
  0x9d   : > { %v646_v55 = vpop.permute.xlu1 %645  ;;  %v644_v56 = vpop.permute.xlu0 %643 }
  0x9e   : > { %v647_v57 = vsel %vm567_vm4, %v644_v56, %v646_v55 }
  0x9f   : > { %649 = vst [vmem:[#allocation2 + $0x80] sm:$0xf] %v647_v57  ;;  %420 = vrot.lane.b32.xlu1 %v1487_v6, %s1427_s6 }
  0xa0   : > { %418 = vrot.lane.b32.xlu0 %v1481_v2, %s1427_s6 }
  0xa1   : > { %v659_v58 = vpop.permute.xlu1 %658  ;;  %v657_v59 = vpop.permute.xlu0 %656 }
  0xa2   : > { %v660_v60 = vsel %vm567_vm4, %v657_v59, %v659_v58  ;;  %v694_v61 = vld [vmem:[#allocation2 + $0x8] sm:$0xff] }
  0xa3   : > { %662 = vst [vmem:[#allocation2 + $0x80] sm:$0xf0] %v660_v60  ;;  %911 = vrot.lane.b32.xlu1 %v1592_v20, %s1423_s28  ;;  %1309 = vmatpush3.bf16.msra.mxu0 %v694_v61  ;;  %v1011_v61 = vld [vmem:[#allocation3 + $0x10] sm:$0xff] }
  0xa4   : > { %909 = vrot.lane.b32.xlu0 %v1594_v21, %s1423_s28 }
  0xa5   : > { %v487_v62 = vpop.permute.xlu1 %486  ;;  %v485_v63 = vpop.permute.xlu0 %484 }
  0xa6   : > { %v488_v0 = vsel %vm408_vm5, %v485_v63, %v487_v62 }
  0xa7   : > { %490 = vst [vmem:[#allocation2 + $0x50] sm:$0xf] %v488_v0  ;;  %924 = vrot.lane.b32.xlu1 %v1603_v23, %s1423_s28 }
  0xa8   : > { %922 = vrot.lane.b32.xlu0 %v1605_v24, %s1423_s28 }
  0xa9   : > { %v500_v1 = vpop.permute.xlu1 %499  ;;  %v498_v2 = vpop.permute.xlu0 %497 }
  0xaa   : > { %v501_v3 = vsel %vm408_vm5, %v498_v2, %v500_v1  ;;  %v709_v4 = vld [vmem:[#allocation2 + $0x80] sm:$0xff] }
  0xab   : > { %503 = vst [vmem:[#allocation2 + $0x50] sm:$0xf0] %v501_v3  ;;  %937 = vrot.lane.b32.xlu1 %v1592_v20, %s1427_s6  ;;  %1341 = vmatpush3.bf16.msra.mxu1 %v709_v4 }
  0xac   : > { %935 = vrot.lane.b32.xlu0 %v1594_v21, %s1427_s6  ;;  %1342 = vmatprep.subr.bf16.mxu1 %v1426_v14 }
  0xad   : > { %v291_v5 = vpop.permute.xlu1 %290  ;;  %v289_v6 = vpop.permute.xlu0 %288 }
  0xae   : > { %v293_v7 = vsel %vm292_vm6, %v289_v6, %v291_v5 }
  0xaf   : > { %295 = vst [vmem:[#allocation2 + $0x10] sm:$0xf] %v293_v7  ;;  %950 = vrot.lane.b32.xlu1 %v1603_v23, %s1427_s6  ;;  %v1432_v23 = vmov 0  }
  0xb0   : > { %948 = vrot.lane.b32.xlu0 %v1605_v24, %s1427_s6  ;;  %1388 = vset.pattern.permute.xlu1 %v1432_v23  ;;  %v712_v24 = vld [vmem:[%s1793_s2 + $0x8] sm:$0xff] }
  0xb1   : > { %v305_v8 = vpop.permute.xlu1 %304  ;;  %v303_v9 = vpop.permute.xlu0 %302  ;;  %1387 = vset.pattern.permute.xlu0 %v1432_v23 }
  0xb2   : > { %v306_v10 = vsel %vm292_vm6, %v303_v9, %v305_v8  ;;  %v703_v11 = vld [vmem:[#allocation2 + $0x50] sm:$0xff] }
  0xb3   : > { %308 = vst [vmem:[#allocation2 + $0x10] sm:$0xf0] %v306_v10  ;;  %963 = vrot.lane.b32.xlu1 %v1646_v30, %s1423_s28  ;;  %1310 = vmatprep.subr.bf16.mxu0 %v703_v11 }
  0xb4   : > { %961 = vrot.lane.b32.xlu0 %v1648_v31, %s1423_s28 }
  0xb5   : > { %v672_v12 = vpop.permute.xlu1 %671  ;;  %v670_v13 = vpop.permute.xlu0 %669 }
  0xb6   : > { %v673_v15 = vsel %vm594_vm7, %v670_v13, %v672_v12 }
  0xb7   : > { %675 = vst [vmem:[#allocation2 + $0x88] sm:$0xf] %v673_v15  ;;  %976 = vrot.lane.b32.xlu1 %v1657_v37, %s1423_s28 }
  0xb8   : > { %974 = vrot.lane.b32.xlu0 %v1659_v38, %s1423_s28 }
  0xb9   : > { %v685_v16 = vpop.permute.xlu1 %684  ;;  %v683_v17 = vpop.permute.xlu0 %682 }
  0xba   : > { %v686_v18 = vsel %vm594_vm7, %v683_v17, %v685_v16  ;;  %v695_v19 = vld [vmem:[#allocation2 + $0x10] sm:$0xff] }
  0xbb   : > { %688 = vst [vmem:[#allocation2 + $0x88] sm:$0xf0] %v686_v18  ;;  %989 = vrot.lane.b32.xlu1 %v1646_v30, %s1427_s6  ;;  %1311 = vmatpush3.bf16.msra.mxu0 %v695_v19  ;;  %v1407_v30 = vld [vmem:[%s1792_s1 + $0x8] ss:$12 sps:$4 sm:$0xff]  }
  0xbc   : > { %987 = vrot.lane.b32.xlu0 %v1648_v31, %s1427_s6  ;;  %v1009_v31 = vld [vmem:[#allocation3] sm:$0xff] }
  0xbd   : > { %v513_v20 = vpop.permute.xlu1 %512  ;;  %v511_v21 = vpop.permute.xlu0 %510 }
  0xbe   : > { %v514_v22 = vsel %vm435_vm1, %v511_v21, %v513_v20 }
  0xbf   : > { %516 = vst [vmem:[#allocation2 + $0x58] sm:$0xf] %v514_v22  ;;  %1002 = vrot.lane.b32.xlu1 %v1657_v37, %s1427_s6  ;;  %v696_v37 = vld [vmem:[#allocation2 + $0x18] sm:$0xff] }
  0xc0   : > { %1000 = vrot.lane.b32.xlu0 %v1659_v38, %s1427_s6 }
  0xc1   : > { %v526_v25 = vpop.permute.xlu1 %525  ;;  %v524_v26 = vpop.permute.xlu0 %523 }
  0xc2   : > { %v527_v28 = vsel %vm435_vm1, %v524_v26, %v526_v25  ;;  %v710_v29 = vld [vmem:[#allocation2 + $0x88] sm:$0xff] }
  0xc3   : > { %529 = vst [vmem:[#allocation2 + $0x58] sm:$0xf0] %v527_v28  ;;  %1343 = vmatpush3.bf16.msra.mxu1 %v710_v29  ;;  %720 = vperm.xlu1 %1388, %v712_v24  }
  0xc4   : > { %1348 = vmatprep.subr.bf16.mxu1 %v1426_v14  ;;  %715 = vperm.xlu0 %1387, %v711_v27  }
  0xc5   : > { %v539_v32 = vpop.permute.xlu1 %538  ;;  %v537_v33 = vpop.permute.xlu0 %536 }
  0xc6   : > { %v541_v34 = vsel %vm540_vm8, %v537_v33, %v539_v32  ;;  %1345 = vmatmul.mubr.msk.bf16.vlgmr.msra.gmra.mrb[0].mxu1 %vm738_vm9, %v1407_v30 }
  0xc7   : > { %543 = vst [vmem:[#allocation2 + $0x60] sm:$0xf] %v541_v34  ;;  %1349 = vmatpush3.bf16.msra.mxu1 %v1009_v31  ;;  %1364 = vmatprep.mubr.msk.bf16.mxu1 %vm1431_vm0, %v1426_v14 }
  0xc8   : > { %1350 = vmatprep.subr.bf16.mxu1 %v1426_v14 }
  0xc9   : > { %v553_v35 = vpop.permute.xlu1 %552  ;;  %v551_v36 = vpop.permute.xlu0 %550 }
  0xca   : > { %v554_v38 = vsel %vm540_vm8, %v551_v36, %v553_v35  ;;  %v704_v39 = vld [vmem:[#allocation2 + $0x58] sm:$0xff] }
  0xcb   : > { %556 = vst [vmem:[#allocation2 + $0x60] sm:$0xf0] %v554_v38  ;;  %1312 = vmatprep.subr.bf16.mxu0 %v704_v39 }
  0xcc   : > { %1313 = vmatpush3.bf16.msra.mxu0 %v696_v37 }
  0xcd   : > { %v328_v40 = vpop.permute.xlu1 %327  ;;  %v326_v41 = vpop.permute.xlu0 %325 }
  0xce   : > { %v329_v42 = vsel %vm265_vm3, %v326_v41, %v328_v40 }
  0xcf   : > { %331 = vst [vmem:[#allocation2 + $0x20] sm:$0xf] %v329_v42 }
  0xd1   : > { %v341_v43 = vpop.permute.xlu1 %340  ;;  %v339_v44 = vpop.permute.xlu0 %338 }
  0xd2   : > { %v342_v45 = vsel %vm265_vm3, %v339_v44, %v341_v43  ;;  %v705_v46 = vld [vmem:[#allocation2 + $0x60] sm:$0xff] }
  0xd3   : > { %344 = vst [vmem:[#allocation2 + $0x20] sm:$0xf0] %v342_v45  ;;  %1314 = vmatprep.subr.bf16.mxu0 %v705_v46 }
  0xd5   : > { %v850_v47 = vpop.permute.xlu1 %849  ;;  %v848_v48 = vpop.permute.xlu0 %847 }
  0xd6   : > { %v851_v49 = vsel %vm265_vm3, %v848_v48, %v850_v47  ;;  %v1410_v48 = vld [vmem:[%s1792_s1] ss:$12 sps:$4 sm:$0xff]  }
  0xd7   : > { %853 = vst [vmem:[#allocation3 + $0x8] sm:$0xf] %v851_v49 }
  0xd9   : > { %v863_v50 = vpop.permute.xlu1 %862  ;;  %v861_v51 = vpop.permute.xlu0 %860 }
  0xda   : > { %v864_v52 = vsel %vm265_vm3, %v861_v51, %v863_v50  ;;  %v697_v53 = vld [vmem:[#allocation2 + $0x20] sm:$0xff] }
  0xdb   : > { %866 = vst [vmem:[#allocation3 + $0x8] sm:$0xf0] %v864_v52  ;;  %1315 = vmatpush3.bf16.msra.mxu0 %v697_v53 }
  0xdd   : > { %v566_v54 = vpop.permute.xlu1 %565  ;;  %v564_v55 = vpop.permute.xlu0 %563 }
  0xde   : > { %v568_v56 = vsel %vm567_vm4, %v564_v55, %v566_v54 }
  0xdf   : > { %570 = vst [vmem:[#allocation2 + $0x68] sm:$0xf] %v568_v56 }
  0xe1   : > { %v580_v57 = vpop.permute.xlu1 %579  ;;  %v578_v58 = vpop.permute.xlu0 %577 }
  0xe2   : > { %v581_v59 = vsel %vm567_vm4, %v578_v58, %v580_v57  ;;  %v1010_v60 = vld [vmem:[#allocation3 + $0x8] sm:$0xff] }
  0xe3   : > { %583 = vst [vmem:[#allocation2 + $0x68] sm:$0xf0] %v581_v59  ;;  %1351 = vmatpush3.bf16.msra.mxu1 %v1010_v60 }
  0xe4   : > { %1352 = vmatprep.subr.bf16.mxu1 %v1426_v14 }
  0xe5   : > { %v354_v62 = vpop.permute.xlu1 %353  ;;  %v352_v63 = vpop.permute.xlu0 %351 }
  0xe6   : > { %v355_v0 = vsel %vm292_vm6, %v352_v63, %v354_v62 }
  0xe7   : > { %357 = vst [vmem:[#allocation2 + $0x28] sm:$0xf] %v355_v0  ;;  %1353 = vmatpush3.bf16.msra.mxu1 %v1011_v61 }
  0xe8   : > { %1354 = vmatprep.subr.bf16.mxu1 %v1426_v14 }
  0xe9   : > { %v367_v1 = vpop.permute.xlu1 %366  ;;  %v365_v2 = vpop.permute.xlu0 %364 }
  0xea   : > { %v368_v3 = vsel %vm292_vm6, %v365_v2, %v367_v1  ;;  %v706_v4 = vld [vmem:[#allocation2 + $0x68] sm:$0xff] }
  0xeb   : > { %370 = vst [vmem:[#allocation2 + $0x28] sm:$0xf0] %v368_v3  ;;  %1316 = vmatprep.subr.bf16.mxu0 %v706_v4 }
  0xed   : > { %v593_v5 = vpop.permute.xlu1 %592  ;;  %v591_v6 = vpop.permute.xlu0 %590 }
  0xee   : > { %v595_v7 = vsel %vm594_vm7, %v591_v6, %v593_v5 }
  0xef   : > { %597 = vst [vmem:[#allocation2 + $0x70] sm:$0xf] %v595_v7  ;;  %v1413_v7 = vld [vmem:[%s1795_s4] sm:$0xff]  }
  0xf1   : > { %v607_v8 = vpop.permute.xlu1 %606  ;;  %v605_v9 = vpop.permute.xlu0 %604 }
  0xf2   : > { %v608_v10 = vsel %vm594_vm7, %v605_v9, %v607_v8  ;;  %v698_v11 = vld [vmem:[#allocation2 + $0x28] sm:$0xff] }
  0xf3   : > { %610 = vst [vmem:[#allocation2 + $0x70] sm:$0xf0] %v608_v10  ;;  %1317 = vmatpush3.bf16.msra.mxu0 %v698_v11 }
  0xf5   : > { %v380_v12 = vpop.permute.xlu1 %379  ;;  %v378_v13 = vpop.permute.xlu0 %377 }
  0xf6   : > { %v382_v15 = vsel %vm381_vm2, %v378_v13, %v380_v12 }
  0xf7   : > { %384 = vst [vmem:[#allocation2 + $0x30] sm:$0xf] %v382_v15 }
  0xf9   : > { %v394_v16 = vpop.permute.xlu1 %393  ;;  %v392_v17 = vpop.permute.xlu0 %391 }
  0xfa   : > { %v395_v18 = vsel %vm381_vm2, %v392_v17, %v394_v16  ;;  %v707_v19 = vld [vmem:[#allocation2 + $0x70] sm:$0xff] }
  0xfb   : > { %397 = vst [vmem:[#allocation2 + $0x30] sm:$0xf0] %v395_v18  ;;  %1318 = vmatprep.subr.bf16.mxu0 %v707_v19 }
  0xfd   : > { %v886_v20 = vpop.permute.xlu1 %885  ;;  %v884_v21 = vpop.permute.xlu0 %883 }
  0xfe   : > { %v887_v22 = vsel %vm265_vm3, %v884_v21, %v886_v20 }
  0xff   : > { %889 = vst [vmem:[#allocation3 + $0x18] sm:$0xf] %v887_v22 }
 0x101   : > { %v899_v23 = vpop.permute.xlu1 %898  ;;  %v897_v24 = vpop.permute.xlu0 %896 }
 0x102   : > { %v900_v25 = vsel %vm265_vm3, %v897_v24, %v899_v23  ;;  %v699_v26 = vld [vmem:[#allocation2 + $0x30] sm:$0xff] }
 0x103   : > { %902 = vst [vmem:[#allocation3 + $0x18] sm:$0xf0] %v900_v25  ;;  %1319 = vmatpush3.bf16.msra.mxu0 %v699_v26 }
 0x105   : > { %v620_v27 = vpop.permute.xlu1 %619 }
 0x106   : > { %v618_v28 = vpop.permute.xlu0 %617 }
 0x107   : > { %v621_v29 = vsel %vm540_vm8, %v618_v28, %v620_v27 }
 0x108   : > { %623 = vst [vmem:[#allocation2 + $0x78] sm:$0xf] %v621_v29 }
 0x109   : > { %v633_v30 = vpop.permute.xlu1 %632 }
 0x10a   : > { %v631_v31 = vpop.permute.xlu0 %630  ;;  %v1012_v32 = vld [vmem:[#allocation3 + $0x18] sm:$0xff] }
 0x10b   : > { %v634_v33 = vsel %vm540_vm8, %v631_v31, %v633_v30  ;;  %1355 = vmatpush3.bf16.msra.mxu1 %v1012_v32 }
 0x10c   : > { %636 = vst [vmem:[#allocation2 + $0x78] sm:$0xf0] %v634_v33  ;;  %1356 = vmatprep.subr.bf16.mxu1 %v1426_v14 }
 0x10d   : > { %v407_v34 = vpop.permute.xlu1 %406 }
 0x10e   : > { %v405_v35 = vpop.permute.xlu0 %404 }
 0x10f   : > { %v409_v36 = vsel %vm408_vm5, %v405_v35, %v407_v34 }
 0x110   : > { %411 = vst [vmem:[#allocation2 + $0x38] sm:$0xf] %v409_v36 }
 0x111   : > { %v421_v37 = vpop.permute.xlu1 %420 }
 0x112   : > { %v419_v38 = vpop.permute.xlu0 %418 }
 0x113   : > { %v422_v39 = vsel %vm408_vm5, %v419_v38, %v421_v37  ;;  %v708_v40 = vld [vmem:[#allocation2 + $0x78] sm:$0xff] }
 0x114   : > { %424 = vst [vmem:[#allocation2 + $0x38] sm:$0xf0] %v422_v39  ;;  %1320 = vmatprep.subr.bf16.mxu0 %v708_v40 }
 0x115   : > { %v912_v41 = vpop.permute.xlu1 %911 }
 0x116   : > { %v910_v42 = vpop.permute.xlu0 %909 }
 0x117   : > { %v913_v43 = vsel %vm381_vm2, %v910_v42, %v912_v41 }
 0x118   : > { %915 = vst [vmem:[#allocation3 + $0x20] sm:$0xf] %v913_v43 }
 0x119   : > { %v925_v44 = vpop.permute.xlu1 %924 }
 0x11a   : > { %v923_v45 = vpop.permute.xlu0 %922 }
 0x11b   : > { %v926_v46 = vsel %vm381_vm2, %v923_v45, %v925_v44  ;;  %v700_v47 = vld [vmem:[#allocation2 + $0x38] sm:$0xff] }
 0x11c   : > { %928 = vst [vmem:[#allocation3 + $0x20] sm:$0xf0] %v926_v46  ;;  %1321 = vmatpush3.bf16.msra.mxu0 %v700_v47 }
 0x11d   : > { %v938_v49 = vpop.permute.xlu1 %937 }
 0x11e   : > { %v936_v50 = vpop.permute.xlu0 %935 }
 0x11f   : > { %v939_v51 = vsel %vm408_vm5, %v936_v50, %v938_v49  ;;  %775 = vmatmul.mubr.bf16.vlgmr.msra.gmra.mrb[0].mxu0 %v1410_v48 }
 0x120   : > { %941 = vst [vmem:[#allocation3 + $0x28] sm:$0xf] %v939_v51 }
 0x121   : > { %v951_v52 = vpop.permute.xlu1 %950 }
 0x122   : > { %v949_v53 = vpop.permute.xlu0 %948 }
 0x123   : > { %v952_v54 = vsel %vm408_vm5, %v949_v53, %v951_v52  ;;  %v1013_v55 = vld [vmem:[#allocation3 + $0x20] sm:$0xff] }
 0x124   : > { %954 = vst [vmem:[#allocation3 + $0x28] sm:$0xf0] %v952_v54  ;;  %1357 = vmatpush3.bf16.msra.mxu1 %v1013_v55 }
 0x125   : > { %v964_v56 = vpop.permute.xlu1 %963  ;;  %1358 = vmatprep.subr.bf16.mxu1 %v1426_v14 }
 0x126   : > { %v962_v57 = vpop.permute.xlu0 %961 }
 0x127   : > { %v965_v58 = vsel %vm381_vm2, %v962_v57, %v964_v56 }
 0x128   : > { %967 = vst [vmem:[#allocation3 + $0x30] sm:$0xf] %v965_v58 }
 0x129   : > { %v977_v59 = vpop.permute.xlu1 %976 }
 0x12a   : > { %v975_v60 = vpop.permute.xlu0 %974 }
 0x12b   : > { %v978_v61 = vsel %vm381_vm2, %v975_v60, %v977_v59  ;;  %v1014_v62 = vld [vmem:[#allocation3 + $0x28] sm:$0xff] }
 0x12c   : > { %980 = vst [vmem:[#allocation3 + $0x30] sm:$0xf0] %v978_v61  ;;  %1359 = vmatpush3.bf16.msra.mxu1 %v1014_v62 }
 0x12d   : > { %v990_v63 = vpop.permute.xlu1 %989  ;;  %1360 = vmatprep.subr.bf16.mxu1 %v1426_v14 }
 0x12e   : > { %v988_v0 = vpop.permute.xlu0 %987 }
 0x12f   : > { %v991_v1 = vsel %vm408_vm5, %v988_v0, %v990_v63 }
 0x130   : > { %993 = vst [vmem:[#allocation3 + $0x38] sm:$0xf] %v991_v1 }
 0x131   : > { %v1003_v2 = vpop.permute.xlu1 %1002 }
 0x132   : > { %v1001_v3 = vpop.permute.xlu0 %1000 }
 0x133   : > { %v1004_v4 = vsel %vm408_vm5, %v1001_v3, %v1003_v2  ;;  %v1015_v5 = vld [vmem:[#allocation3 + $0x30] sm:$0xff] }
 0x134   : > { %1006 = vst [vmem:[#allocation3 + $0x38] sm:$0xf0] %v1004_v4  ;;  %1361 = vmatpush3.bf16.msra.mxu1 %v1015_v5 }
 0x135   : > { %1362 = vmatprep.subr.bf16.mxu1 %v1426_v14 }
 0x13b   : > { %v1016_v6 = vld [vmem:[#allocation3 + $0x38] sm:$0xff] }
 0x13c   : > { %1363 = vmatpush3.bf16.msra.mxu1 %v1016_v6 }
 0x13f   : > { %1365 = vmatmul.mubr.bf16.vlgmr.msra.gmra.mrb[4].mxu1 %v1413_v7 }
 0x142   : > { %v721_v19 = vpop.permute.xlu1 %720 }
 0x143   : > { %v716_v15 = vpop.permute.xlu0 %715 }
 0x199   : > { %v817_v8 = vpop.f32.mrb[0].mxu1 }
 0x19a   : > { %v1346_v9 = vpop.f32.mrb[1].mxu1 }
 0x19b   : > { %v820_v10 = vpop.f32.mrb[2].mxu1 }
 0x19c   : > { %v1347_v11 = vpop.f32.mrb[3].mxu1 }
 0x1f2   : > { %v1322_v12 = vpop.f32.mrb[0].mxu0 }
 0x1f3   : > { %v1323_v13 = vpop.f32.mrb[1].mxu0 }
 0x1f4   : > { %v1324_v16 = vadd.f32 %v1323_v13, %v1322_v12  ;;  %v1325_v17 = vpop.f32.mrb[2].mxu0 }
 0x1f5   : > { %v1326_v18 = vpop.f32.mrb[3].mxu0 }
 0x1f6   : > { %v777_v20 = vadd.f32 %v1324_v16, %v716_v15  ;;  %v1327_v14 = vadd.f32 %v1326_v18, %v1325_v17 }
 0x1f8   : > { %v818_v21 = vadd.f32 %v817_v8, %v777_v20  ;;  %v780_v22 = vadd.f32 %v1327_v14, %v721_v19 }
 0x1fa   : > { %v821_v23 = vadd.f32 %v820_v10, %v780_v22  ;;  %v826_v24 = vmul.f32 0.2, %v818_v21  ;;  %vm824_vm10 = vcmp.ge.f32.partialorder %v818_v21, 0.0 }
 0x1fc   : > { %v827_v25 = vmul.f32 0.2, %v821_v23  ;;  %vm825_vm11 = vcmp.ge.f32.partialorder %v821_v23, 0.0  ;;  %v828_v26 = vsel %vm824_vm10, %v818_v21, %v826_v24 }
 0x1fd   : > { %v830_v28 = vmul.f32 1.4142135, %v828_v26 }
 0x1fe   : > { %v829_v27 = vsel %vm825_vm11, %v821_v23, %v827_v25 }
 0x1ff   : > { %v831_v32 = vmul.f32 1.4142135, %v829_v27 }
 0x212   : > { %v1057_v29 = vpop.f32.mrb[4].mxu1 }
 0x213   : > { %v1064_v30 = vadd.f32 %v1057_v29, %v830_v28  ;;  %v1366_v31 = vpop.f32.mrb[5].mxu1 }
 0x214   : > { %v1060_v33 = vpop.f32.mrb[6].mxu1 }
 0x215   : > { %v1065_v34 = vadd.f32 %v1060_v33, %v831_v32  ;;  %v1367_v35 = vpop.f32.mrb[7].mxu1  ;;  %v1066_v36 = vmul.f32 0.70710677, %v1064_v30 }
 0x217   : > { %v1067_v37 = vmul.f32 0.70710677, %v1065_v34 }
 0x219   : > { %v1304_v38 = vpack.c.bf16 %v1067_v37, %v1066_v36 }
 0x21b   : > { %1305 = vst [vmem:[%s244_s27] sm:$0xff] %v1304_v38  }
 0x21c PF: > { %s15_s18 = sadd.s32 1, %s1420_s18  }
 0x21d   : > { %p12_p4 = scmp.ge.s32.totalorder %s15_s18, 4  }
 0x21f   :  { %14 = sbr.rel (!%p12_p4) target bundleno = 1 (0x1), region = 79 }

// kernel: encoder_forward.12
= control target key start
LH: loop header
LB: loop body
LE: loop exit
PB: predicated region body
PF: predicated region fallthrough
CT: control target
= control target key end

     0   :  { %s580_s12 = smov 0   ;;  %s624_s0 = inlined_call_operand.vmem [shape: bf16[2,1,16,150], index: 0, kind: input, shape index: {}]   ;;  %s625_s1 = inlined_call_operand.vmem [shape: bf16[16,144], index: 1, kind: input, shape index: {}]   ;;  %s626_s2 = inlined_call_operand.vmem [shape: f32[16,1], index: 2, kind: input, shape index: {}]   ;;  %s627_s3 = inlined_call_operand.vmem [shape: bf16[2,16,128], index: 3, kind: output, shape index: {}]  }
   0x1 LB: > { %s475_s13 = sadd.s32 4294967295, %s549_s12   ;;  %p479_p0 = scmp.ge.s32.totalorder %s549_s12, 1  ;;  %s549_s12 = sphi %s580_s12, %s13_s12  }
   0x2   : > { %p137_p1 = scmp.lt.s32.totalorder %s549_s12, 3 }
   0x4   : > { %p138_p2 = pnand %p479_p0, %p137_p1 }
   0x5   : > { %p161_p3 = scmp.lt.s32.totalorder (!%p138_p2), %s475_s13, 1  ;;  %v551_v0 = vmov (!%p138_p2), 0   ;;  %s552_s18 = smov (!%p138_p2), 126   ;;  %v542_v4 = vld [vmem:[%s625_s1 + $0x4] ss:$8 sps:$4 sm:$0xff] (!%p138_p2)   ;;  %vm357_vm0 = vcmask (!%p138_p2), 130048  }
   0x6   : > { %141 = sbr.rel (%p138_p2) target bundleno = 392 (0x188), region = 32  ;;  %361 = vmatprep.subr.bf16.mxu0 (!%p138_p2), %v551_v0  ;;  %534 = vset.pattern.permute.xlu0 (!%p138_p2), %v551_v0  ;;  %s553_s19 = smov (!%p138_p2), 127   ;;  %v336_v5 = vld [vmem:[%s626_s2] sm:$0xff] (!%p138_p2)  ;;  %v337_v6 = vld [vmem:[%s626_s2 + $0x8] sm:$0xff] (!%p138_p2)  ;;  %vm195_vm1 = vcmask (!%p138_p2), 1039360   ;;  %vm213_vm2 = vcmask (!%p138_p2), 1031168  }
   0x7   : > { %535 = vset.pattern.permute.xlu1 (!%p138_p2), %v551_v0  ;;  %s554_s20 = smov (!%p138_p2), 118   ;;  %s555_s21 = smov (!%p138_p2), 117   ;;  %503 = vmatprep.mubr.msk.bf16.mxu0 (!%p138_p2), %vm357_vm0, %v542_v4  ;;  %vm231_vm3 = vcmask (!%p138_p2), 965632   ;;  %vm249_vm4 = vcmask (!%p138_p2), 957440   ;;  %vm267_vm5 = vcmask (!%p138_p2), 949248   ;;  %vm285_vm6 = vcmask (!%p138_p2), 883712  }
   0x8   : > { %s556_s22 = smov (!%p138_p2), 116   ;;  %s557_s23 = smov (!%p138_p2), 108   ;;  %vm303_vm7 = vcmask (!%p138_p2), 875520   ;;  %vm321_vm8 = vcmask (!%p138_p2), 867328   ;;  %v540_v31 = vld [vmem:[%s625_s1] ss:$8 sps:$4 sm:$0xff] (!%p138_p2)  }
   0x9   : > { %s558_s26 = smov (!%p138_p2), 107   ;;  %s559_s27 = smov (!%p138_p2), 106  }
   0xd   : > { %s629_s13 = smov (!%p161_p3, %s475_s13), 1 }
   0xe   : > { %s508_s14 = sshll.u32 %s629_s13, 4  ;;  %s509_s7 = sshll.u32 %s629_s13, 3 }
   0xf   : > { %s165_s17 = scalar_lea.vmem %s624_s0, %s508_s14  ;;  %s170_s10 = scalar_lea.vmem %s627_s3, %s509_s7 }
  0x10   : > { %v536_v1 = vld [vmem:[%s165_s17] ss:$8 sps:$4 sm:$0xff]   ;;  %v538_v2 = vld [vmem:[%s165_s17 + $0x4] ss:$8 sps:$4 sm:$0xff]  }
  0x11   : > { %209 = vrot.lane.b32.xlu1 %v536_v1, %s552_s18  ;;  %191 = vrot.lane.b32.xlu0 %v536_v1, %s553_s19  ;;  %v539_v3 = vld [vmem:[%s165_s17] ss:$8 sps:$4 sm:$0xff]  }
  0x12   : > { %362 = vmatpush1.bf16.msra.mxu0 %v539_v3 }
  0x13   : > { %363 = vmatprep.subr.bf16.mxu0 %v551_v0 }
  0x15   : > { %211 = vrot.lane.b32.xlu1 %v538_v2, %s552_s18  ;;  %193 = vrot.lane.b32.xlu0 %v538_v2, %s553_s19 }
  0x19   : > { %229 = vrot.lane.b32.xlu1 %v538_v2, %s554_s20  ;;  %227 = vrot.lane.b32.xlu0 %v536_v1, %s554_s20 }
  0x1d   : > { %247 = vrot.lane.b32.xlu1 %v538_v2, %s555_s21  ;;  %245 = vrot.lane.b32.xlu0 %v536_v1, %s555_s21 }
  0x21   : > { %265 = vrot.lane.b32.xlu1 %v538_v2, %s556_s22  ;;  %263 = vrot.lane.b32.xlu0 %v536_v1, %s556_s22 }
  0x25   : > { %283 = vrot.lane.b32.xlu1 %v538_v2, %s557_s23  ;;  %281 = vrot.lane.b32.xlu0 %v536_v1, %s557_s23 }
  0x29   : > { %301 = vrot.lane.b32.xlu1 %v538_v2, %s558_s26  ;;  %299 = vrot.lane.b32.xlu0 %v536_v1, %s558_s26 }
  0x2d   : > { %319 = vrot.lane.b32.xlu1 %v538_v2, %s559_s27  ;;  %317 = vrot.lane.b32.xlu0 %v536_v1, %s559_s27 }
  0x31   : > { %340 = vperm.xlu0 %534, %v336_v5   ;;  %345 = vperm.xlu1 %535, %v337_v6  }
  0x83   : > { %v210_v7 = vpop.permute.xlu1 %209  ;;  %v192_v8 = vpop.permute.xlu0 %191 }
  0x87   : > { %v212_v9 = vpop.permute.xlu1 %211  ;;  %v194_v10 = vpop.permute.xlu0 %193 }
  0x88   : > { %v196_v11 = vsel %vm195_vm1, %v192_v8, %v194_v10  ;;  %v214_v14 = vsel %vm213_vm2, %v210_v7, %v212_v9 }
  0x89   : > { %364 = vmatpush1.bf16.msra.mxu0 %v196_v11 }
  0x8a   : > { %365 = vmatprep.subr.bf16.mxu0 %v551_v0 }
  0x8b   : > { %v230_v12 = vpop.permute.xlu1 %229  ;;  %v228_v13 = vpop.permute.xlu0 %227 }
  0x8c   : > { %v232_v15 = vsel %vm231_vm3, %v228_v13, %v230_v12 }
  0x8d   : > { %366 = vmatpush1.bf16.msra.mxu0 %v214_v14 }
  0x8e   : > { %367 = vmatprep.subr.bf16.mxu0 %v551_v0 }
  0x8f   : > { %v248_v16 = vpop.permute.xlu1 %247  ;;  %v246_v17 = vpop.permute.xlu0 %245 }
  0x90   : > { %v250_v18 = vsel %vm249_vm4, %v246_v17, %v248_v16 }
  0x91   : > { %368 = vmatpush1.bf16.msra.mxu0 %v232_v15 }
  0x92   : > { %369 = vmatprep.subr.bf16.mxu0 %v551_v0 }
  0x93   : > { %v266_v19 = vpop.permute.xlu1 %265  ;;  %v264_v20 = vpop.permute.xlu0 %263 }
  0x94   : > { %v268_v21 = vsel %vm267_vm5, %v264_v20, %v266_v19 }
  0x95   : > { %370 = vmatpush1.bf16.msra.mxu0 %v250_v18 }
  0x96   : > { %371 = vmatprep.subr.bf16.mxu0 %v551_v0 }
  0x97   : > { %v284_v22 = vpop.permute.xlu1 %283  ;;  %v282_v23 = vpop.permute.xlu0 %281 }
  0x98   : > { %v286_v24 = vsel %vm285_vm6, %v282_v23, %v284_v22 }
  0x99   : > { %372 = vmatpush1.bf16.msra.mxu0 %v268_v21 }
  0x9a   : > { %373 = vmatprep.subr.bf16.mxu0 %v551_v0 }
  0x9b   : > { %v302_v25 = vpop.permute.xlu1 %301  ;;  %v300_v26 = vpop.permute.xlu0 %299 }
  0x9c   : > { %v304_v27 = vsel %vm303_vm7, %v300_v26, %v302_v25 }
  0x9d   : > { %374 = vmatpush1.bf16.msra.mxu0 %v286_v24 }
  0x9e   : > { %375 = vmatprep.subr.bf16.mxu0 %v551_v0 }
  0x9f   : > { %v320_v28 = vpop.permute.xlu1 %319  ;;  %v318_v29 = vpop.permute.xlu0 %317 }
  0xa0   : > { %v322_v30 = vsel %vm321_vm8, %v318_v29, %v320_v28 }
  0xa1   : > { %376 = vmatpush1.bf16.msra.mxu0 %v304_v27 }
  0xa2   : > { %377 = vmatprep.subr.bf16.mxu0 %v551_v0 }
  0xa5   : > { %378 = vmatpush1.bf16.msra.mxu0 %v322_v30 }
  0xa8   : > { %394 = vmatmul.mubr.bf16.vlgmr.msra.gmra.mrb[0].mxu0 %v540_v31 }
  0xb0   : > { %v341_v32 = vpop.permute.xlu0 %340  ;;  %v346_v34 = vpop.permute.xlu1 %345 }
 0x17b   : > { %v395_v33 = vpop.f32.mrb[0].mxu0 }
 0x17c   : > { %v396_v35 = vadd.f32 %v395_v33, %v341_v32  ;;  %v397_v36 = vpop.f32.mrb[1].mxu0 }
 0x17d   : > { %v398_v37 = vpop.f32.mrb[2].mxu0 }
 0x17e   : > { %vm402_vm9 = vcmp.ge.f32.partialorder %v396_v35, 0.0  ;;  %v404_v38 = vmul.f32 0.2, %v396_v35  ;;  %v399_v39 = vadd.f32 %v398_v37, %v346_v34  ;;  %v400_v40 = vpop.f32.mrb[3].mxu0 }
 0x180   : > { %v406_v41 = vsel %vm402_vm9, %v396_v35, %v404_v38  ;;  %vm403_vm10 = vcmp.ge.f32.partialorder %v399_v39, 0.0  ;;  %v405_v42 = vmul.f32 0.2, %v399_v39 }
 0x181   : > { %v408_v44 = vmul.f32 1.4142135, %v406_v41 }
 0x182   : > { %v407_v43 = vsel %vm403_vm10, %v399_v39, %v405_v42 }
 0x183   : > { %v409_v45 = vmul.f32 1.4142135, %v407_v43 }
 0x185   : > { %v515_v46 = vpack.c.bf16 %v409_v45, %v408_v44 }
 0x187   : > { %516 = vst [vmem:[%s170_s10] sm:$0xff] %v515_v46  }
 0x188 PF: > { %s13_s12 = sadd.s32 1, %s549_s12  }
 0x189   : > { %p10_p4 = scmp.ge.s32.totalorder %s13_s12, 4  }
 0x18b   :  { %12 = sbr.rel (!%p10_p4) target bundleno = 1 (0x1), region = 62 }

// kernel: encoder_forward.14
= control target key start
LH: loop header
LB: loop body
LE: loop exit
PB: predicated region body
PF: predicated region fallthrough
CT: control target
= control target key end

     0   :  { %v15_v1 = vlaneseq  ;;  %s303_s0 = inlined_call_operand.vmem [shape: bf16[2,1,512], index: 0, kind: input, shape index: {}]   ;;  %s304_s1 = inlined_call_operand.hbm [shape: f32[1,1], index: 1, kind: output, shape index: {}]  }
   0x1   :  { %v217_v0 = vld [vmem:[%s303_s0] sm:$0xff]  }
   0x2   :  { %6 = vsyncpa [#allocation3], 0  ;;  %v254_v2 = vmov 1983009808   ;;  %v218_v4 = vunpack.c.l.bf16 %v217_v0  ;;  %v16_v5 = vshrl.u32 %v15_v1, 7  ;;  %v219_v6 = vunpack.c.h.bf16 %v217_v0  ;;  %s255_s0 = smov [#allocation2]  }
   0x3   :  { %v80_v3 = vunpack.c.l.s4 %v254_v2  ;;  %vm55_vm0 = vcmask 1040384   ;;  %s208_s8 = sshll.u32 %s255_s0, 4  ;;  %vm200_vm9 = vcmask 0   ;;  %s209_s8 = int_to_ptr.vmem [resolvable:$true] %s208_s8 }
   0x4   :  { %v17_v7 = vsub.s32 0, %v16_v5  ;;  %v21_v8 = vsub.s32 2, %v16_v5  ;;  %v25_v9 = vsub.s32 4, %v16_v5  ;;  %v29_v10 = vsub.s32 6, %v16_v5  ;;  %s230_s9 = scalar_lea.vmem %s209_s8, 16  ;;  %s234_s10 = scalar_lea.vmem %s209_s8, 32 }
   0x5   :  { %v81_v11 = vunpack.c.0.s8 %v80_v3  ;;  %p231_p0 = scmp.ne.s32.totalorder %s209_s8, %s230_s9  ;;  %p235_p1 = scmp.lt.s32.totalorder %s209_s8, %s209_s8 }
   0x6   :  { %v18_v12 = vrot.slane %v218_v4, %v17_v7  ;;  %v22_v13 = vrot.slane %v218_v4, %v21_v8  ;;  %v26_v14 = vrot.slane %v218_v4, %v25_v9  ;;  %v30_v15 = vrot.slane %v218_v4, %v29_v10  ;;  %p236_p2 = scmp.lt.s32.totalorder %s234_s10, %s230_s9 }
   0x7   :  { %v34_v16 = vrot.slane %v219_v6, %v17_v7  ;;  %v38_v17 = vrot.slane %v219_v6, %v21_v8  ;;  %v42_v18 = vrot.slane %v219_v6, %v25_v9  ;;  %v46_v19 = vrot.slane %v219_v6, %v29_v10 }
   0x8   :  { %v56_v20 = vsel %vm55_vm0, %v18_v12, 0.0  ;;  %v59_v21 = vsel %vm55_vm0, %v22_v13, 0.0  ;;  %v62_v22 = vsel %vm55_vm0, %v26_v14, 0.0  ;;  %v65_v23 = vsel %vm55_vm0, %v30_v15, 0.0  ;;  %p237_p3 = por %p236_p2, %p235_p1 }
   0x9   :  { %v57_v24 = vsel %vm55_vm0, %v34_v16, 0.0  ;;  %v60_v25 = vsel %vm55_vm0, %v38_v17, 0.0  ;;  %v63_v26 = vsel %vm55_vm0, %v42_v18, 0.0  ;;  %v66_v27 = vsel %vm55_vm0, %v46_v19, 0.0 }
   0xa   :  { %v58_v28 = vadd.f32 %v57_v24, %v56_v20  ;;  %v61_v29 = vadd.f32 %v60_v25, %v59_v21  ;;  %v64_v30 = vadd.f32 %v63_v26, %v62_v22  ;;  %v67_v31 = vadd.f32 %v66_v27, %v65_v23  ;;  %p238_p4 = pnand %p237_p3, %p231_p0 }
   0xb   :  { %v84_v32 = vsub.s32 %v81_v11, %v16_v5 }
   0xc   :  { %v69_v33 = vmul.f32 0.5, %v58_v28  ;;  %v70_v34 = vmul.f32 0.5, %v61_v29  ;;  %v71_v35 = vmul.f32 0.5, %v64_v30  ;;  %v72_v36 = vmul.f32 0.5, %v67_v31 }
   0xe   :  { %v77_v37 = vcombine.low %v69_v33, %v70_v34  ;;  %v78_v38 = vcombine.low %v71_v35, %v72_v36 }
  0x10   :  { %v85_v39 = vrot.slane %v77_v37, %v84_v32  ;;  %v92_v40 = vrot.slane %v78_v38, %v84_v32 }
  0x12   :  { %v93_v41 = vcombine.low %v85_v39, %v92_v40 }
  0x14   :  { %v95_v42 = vsub.f32 %v218_v4, %v93_v41  ;;  %v96_v43 = vsub.f32 %v219_v6, %v93_v41 }
  0x16   :  { %v97_v44 = vmul.f32 %v95_v42, %v95_v42  ;;  %v98_v45 = vmul.f32 %v96_v43, %v96_v43 }
  0x18   :  { %v104_v46 = vrot.slane %v97_v44, %v17_v7  ;;  %v108_v47 = vrot.slane %v97_v44, %v21_v8  ;;  %v112_v48 = vrot.slane %v97_v44, %v25_v9  ;;  %v116_v49 = vrot.slane %v97_v44, %v29_v10 }
  0x19   :  { %v120_v50 = vrot.slane %v98_v45, %v17_v7  ;;  %v124_v51 = vrot.slane %v98_v45, %v21_v8  ;;  %v128_v52 = vrot.slane %v98_v45, %v25_v9  ;;  %v132_v53 = vrot.slane %v98_v45, %v29_v10 }
  0x1a   :  { %v141_v54 = vsel %vm55_vm0, %v104_v46, 0.0  ;;  %v144_v55 = vsel %vm55_vm0, %v108_v47, 0.0  ;;  %v147_v56 = vsel %vm55_vm0, %v112_v48, 0.0  ;;  %v150_v57 = vsel %vm55_vm0, %v116_v49, 0.0 }
  0x1b   :  { %v142_v58 = vsel %vm55_vm0, %v120_v50, 0.0  ;;  %v145_v59 = vsel %vm55_vm0, %v124_v51, 0.0  ;;  %v148_v60 = vsel %vm55_vm0, %v128_v52, 0.0  ;;  %v151_v61 = vsel %vm55_vm0, %v132_v53, 0.0 }
  0x1c   :  { %v143_v62 = vadd.f32 %v142_v58, %v141_v54  ;;  %v146_v63 = vadd.f32 %v145_v59, %v144_v55  ;;  %v149_v0 = vadd.f32 %v148_v60, %v147_v56  ;;  %v152_v1 = vadd.f32 %v151_v61, %v150_v57 }
  0x1e   :  { %v153_v2 = vmul.f32 0.5, %v143_v62  ;;  %v154_v3 = vmul.f32 0.5, %v146_v63  ;;  %v155_v4 = vmul.f32 0.5, %v149_v0  ;;  %v156_v5 = vmul.f32 0.5, %v152_v1 }
  0x20   :  { %v157_v6 = vadd.f32 1e-08, %v153_v2  ;;  %v158_v7 = vadd.f32 1e-08, %v154_v3  ;;  %v159_v8 = vadd.f32 1e-08, %v155_v4 }
  0x21   :  { %v160_v9 = vadd.f32 1e-08, %v156_v5 }
  0x22   :  { %222 = vrsqrt.f32 %v157_v6  ;;  %vm163_vm1 = vcmp.eq.f32.partialorder %v157_v6, inf  ;;  %vm165_vm2 = vcmp.eq.f32.partialorder %v157_v6, 0.0  ;;  %v166_v11 = vand.u32 2147483648, %v157_v6 }
  0x23   :  { %224 = vrsqrt.f32 %v158_v7  ;;  %vm170_vm3 = vcmp.eq.f32.partialorder %v158_v7, inf  ;;  %vm172_vm4 = vcmp.eq.f32.partialorder %v158_v7, 0.0  ;;  %v173_v14 = vand.u32 2147483648, %v158_v7 }
  0x24   :  { %226 = vrsqrt.f32 %v159_v8  ;;  %vm177_vm5 = vcmp.eq.f32.partialorder %v159_v8, inf  ;;  %vm179_vm6 = vcmp.eq.f32.partialorder %v159_v8, 0.0  ;;  %v180_v17 = vand.u32 2147483648, %v159_v8 }
  0x25   :  { %228 = vrsqrt.f32 %v160_v9  ;;  %vm184_vm7 = vcmp.eq.f32.partialorder %v160_v9, inf  ;;  %v187_v21 = vand.u32 2147483648, %v160_v9  ;;  %vm186_vm8 = vcmp.eq.f32.partialorder %v160_v9, 0.0 }
  0x2c   :  { %v223_v10 = vpop.eup %222 }
  0x2d   :  { %v225_v12 = vpop.eup %224  ;;  %v162_v13 = vmul.f32 %v223_v10, %v157_v6 }
  0x2e   :  { %v227_v15 = vpop.eup %226  ;;  %v169_v16 = vmul.f32 %v225_v12, %v158_v7 }
  0x2f   :  { %v229_v18 = vpop.eup %228  ;;  %v164_v19 = vsel %vm163_vm1, %v157_v6, %v162_v13  ;;  %v176_v20 = vmul.f32 %v227_v15, %v159_v8 }
  0x30   :  { %v167_v22 = vsel %vm165_vm2, %v166_v11, %v164_v19  ;;  %v171_v23 = vsel %vm170_vm3, %v158_v7, %v169_v16  ;;  %v183_v24 = vmul.f32 %v229_v18, %v160_v9 }
  0x31   :  { %v174_v25 = vsel %vm172_vm4, %v173_v14, %v171_v23  ;;  %v178_v26 = vsel %vm177_vm5, %v159_v8, %v176_v20  ;;  %v189_v27 = vsel %vm55_vm0, %v167_v22, 0.0 }
  0x32   :  { %v181_v28 = vsel %vm179_vm6, %v180_v17, %v178_v26  ;;  %v185_v29 = vsel %vm184_vm7, %v160_v9, %v183_v24  ;;  %v190_v30 = vsel %vm55_vm0, %v174_v25, 0.0 }
  0x33   :  { %v188_v31 = vsel %vm186_vm8, %v187_v21, %v185_v29  ;;  %v191_v32 = vadd.f32 %v190_v30, %v189_v27  ;;  %v192_v33 = vsel %vm55_vm0, %v181_v28, 0.0 }
  0x34   :  { %v194_v34 = vsel %vm55_vm0, %v188_v31, 0.0 }
  0x35   :  { %v193_v35 = vadd.f32 %v192_v33, %v191_v32 }
  0x37   :  { %v195_v36 = vadd.f32 %v194_v34, %v193_v35 }
  0x39   :  { %196 = vadd.xlane.f32.xlu0 %v195_v36 }
  0xc6   :  { %v197_v37 = vpop.xlane.xlu0 %196 }
  0xc7   :  { %v199_v38 = vmul.f32 0.001953125, %v197_v37 }
  0xc9   :  { %201 = vst.msk [vmem:[#allocation2] sm:$0x1] %vm200_vm9, %v199_v38 }
  0xca   :  { %241 = shalt.err (!%p238_p4)
}
  0xcb   :  { %s242_s13 = scalar_lea.hbm %s304_s1, 16 }
  0xcc   :  { %p243_p5 = scmp.ne.s32.totalorder %s304_s1, %s242_s13  ;;  %p246_p6 = scmp.lt.u32.totalorder %s242_s13, %s304_s1 }
  0xce   :  { %p248_p7 = pnand %p246_p6, %p243_p5 }
  0xd0   :  { %251 = shalt.err (!%p248_p7)
}
  0xd1   :  { %211 = dma.vmem_to_hbm [thread:$0]  %s209_s8, 16, %s304_s1, [#allocation3]  }
  0xd2   :  { %252 = dma.done.wait [#allocation3], 16  }
  0xd3   :  { %253 = vsyncadd [#allocation3], 4294967280 }
  0xd4   :  { %215 = vsyncpa [#allocation3], 1 }

// kernel: encoder_forward.13
= control target key start
LH: loop header
LB: loop body
LE: loop exit
PB: predicated region body
PF: predicated region fallthrough
CT: control target
= control target key end

     0   :  { %s2001_s18 = smov 0   ;;  %s2313_s0 = inlined_call_operand.vmem [shape: bf16[2,4,16,144], index: 0, kind: input, shape index: {}]   ;;  %s2314_s1 = inlined_call_operand.vmem [shape: bf16[32,576], index: 1, kind: input, shape index: {}]   ;;  %s2315_s2 = inlined_call_operand.vmem [shape: f32[32,1], index: 2, kind: input, shape index: {}]   ;;  %s2316_s3 = inlined_call_operand.vmem [shape: bf16[2,4,16,138], index: 3, kind: input, shape index: {}]   ;;  %s2317_s4 = inlined_call_operand.vmem [shape: bf16[32,256], index: 4, kind: input, shape index: {}]   ;;  %s2318_s5 = inlined_call_operand.vmem [shape: bf16[2,32,128], index: 5, kind: output, shape index: {}]  }
   0x1 LB: > { %s1556_s19 = sadd.s32 4294967295, %s1960_s18   ;;  %p1560_p0 = scmp.ge.s32.totalorder %s1960_s18, 1  ;;  %s1960_s18 = sphi %s2001_s18, %s15_s18  }
   0x2   : > { %p197_p1 = scmp.lt.s32.totalorder %s1960_s18, 3 }
   0x4   : > { %p198_p2 = pnand %p1560_p0, %p197_p1 }
   0x5   : > { %p230_p3 = scmp.lt.s32.totalorder (!%p198_p2), %s1556_s19, 1  ;;  %s1962_s24 = smov (!%p198_p2), 116   ;;  %v1930_v10 = vld [vmem:[%s2314_s1 + $0xc] ss:$20 sps:$4 sm:$0xff] (!%p198_p2)   ;;  %vm644_vm0 = vcmask (!%p198_p2), 949248   ;;  %vm507_vm1 = vcmask (!%p198_p2), 982016  }
   0x6   : > { %201 = sbr.rel (%p198_p2) target bundleno = 539 (0x21b), region = 40  ;;  %s1963_s25 = smov (!%p198_p2), 120   ;;  %1047 = vmatprep.mubr.bf16.mxu1 (!%p198_p2), %v1930_v10  ;;  %v1937_v22 = vld [vmem:[%s2314_s1 + $0x4] ss:$20 sps:$4 sm:$0xff] (!%p198_p2)   ;;  %vm679_vm2 = vcmask (!%p198_p2), 941056   ;;  %vm437_vm3 = vcmask (!%p198_p2), 998400  }
   0x7   : > { %s1964_s29 = smov (!%p198_p2), 115   ;;  %s1965_s30 = smov (!%p198_p2), 122   ;;  %998 = vmatprep.mubr.bf16.mxu0 (!%p198_p2), %v1937_v22  ;;  %vm714_vm4 = vcmask (!%p198_p2), 932864   ;;  %vm472_vm5 = vcmask (!%p198_p2), 990208   ;;  %vm279_vm6 = vcmask (!%p198_p2), 1039360   ;;  %vm314_vm7 = vcmask (!%p198_p2), 1031168  }
   0x8   : > { %s1966_s6 = smov (!%p198_p2), 114   ;;  %s1967_s7 = smov (!%p198_p2), 121   ;;  %v888_v10 = vld [vmem:[%s2315_s2 + $0x18] sm:$0xff] (!%p198_p2)  ;;  %v1943_v22 = vld [vmem:[%s2314_s1 + $0x34] ss:$20 sps:$4 sm:$0xff] (!%p198_p2)   ;;  %vm959_vm8 = vcmask (!%p198_p2), 523264  }
   0x9   : > { %s1968_s8 = smov (!%p198_p2), 127   ;;  %s1969_s9 = smov (!%p198_p2), 126  }
   0xd   : > { %s2320_s19 = smov (!%p230_p3, %s1556_s19), 1 }
   0xe   : > { %s1763_s20 = sshll.u32 %s2320_s19, 6  ;;  %s1765_s26 = sshll.u32 %s2320_s19, 4 }
   0xf   : > { %s2015_s23 = scalar_lea.vmem %s2313_s0, %s1763_s20  ;;  %s2030_s28 = scalar_lea.vmem %s2316_s3, %s1763_s20 }
  0x10   : > { %v2018_v0 = vld [vmem:[%s2015_s23] ss:$8 sps:$4 sm:$0xff]   ;;  %v2021_v1 = vld [vmem:[%s2015_s23 + $0x4] ss:$8 sps:$4 sm:$0xff]   ;;  %v2033_v2 = vld [vmem:[%s2015_s23 + $0x10] ss:$8 sps:$4 sm:$0xff]  }
  0x11   : > { %640 = vrot.lane.b32.xlu0 %v2018_v0, %s1962_s24  ;;  %503 = vrot.lane.b32.xlu1 %v2018_v0, %s1963_s25  ;;  %v2040_v3 = vld [vmem:[%s2015_s23 + $0x14] ss:$8 sps:$4 sm:$0xff]   ;;  %v2055_v4 = vld [vmem:[%s2015_s23 + $0x20] ss:$8 sps:$4 sm:$0xff]  }
  0x12   : > { %v2058_v5 = vld [vmem:[%s2015_s23 + $0x24] ss:$8 sps:$4 sm:$0xff]   ;;  %v2069_v6 = vld [vmem:[%s2015_s23 + $0x30] ss:$8 sps:$4 sm:$0xff]   ;;  %v2072_v7 = vld [vmem:[%s2015_s23 + $0x34] ss:$8 sps:$4 sm:$0xff]  }
  0x13   : > { %v1914_v8 = vld [vmem:[%s2030_s28 + $0x4] ss:$8 sps:$4 sm:$0xff]   ;;  %v1916_v9 = vld [vmem:[%s2030_s28] ss:$8 sps:$4 sm:$0xff]   ;;  %v1917_v11 = vld [vmem:[%s2030_s28 + $0x14] ss:$8 sps:$4 sm:$0xff]  }
  0x14   : > { %v1919_v12 = vld [vmem:[%s2030_s28 + $0x10] ss:$8 sps:$4 sm:$0xff]   ;;  %v1920_v29 = vld [vmem:[%s2030_s28 + $0x24] ss:$8 sps:$4 sm:$0xff]   ;;  %v1922_v30 = vld [vmem:[%s2030_s28 + $0x20] ss:$8 sps:$4 sm:$0xff]  }
  0x15   : > { %642 = vrot.lane.b32.xlu0 %v2021_v1, %s1962_s24  ;;  %505 = vrot.lane.b32.xlu1 %v2021_v1, %s1963_s25  ;;  %v1923_v37 = vld [vmem:[%s2030_s28 + $0x34] ss:$8 sps:$4 sm:$0xff]   ;;  %v1925_v38 = vld [vmem:[%s2030_s28 + $0x30] ss:$8 sps:$4 sm:$0xff]  }
  0x16   : > { %v1926_v48 = vld [vmem:[%s2015_s23] ss:$8 sps:$4 sm:$0xff]   ;;  %v1927_v58 = vld [vmem:[%s2015_s23 + $0x10] ss:$8 sps:$4 sm:$0xff]  }
  0x19   : > { %658 = vrot.lane.b32.xlu0 %v2033_v2, %s1962_s24  ;;  %660 = vrot.lane.b32.xlu1 %v2040_v3, %s1962_s24 }
  0x1d   : > { %521 = vrot.lane.b32.xlu0 %v2033_v2, %s1963_s25  ;;  %523 = vrot.lane.b32.xlu1 %v2040_v3, %s1963_s25 }
  0x21   : > { %675 = vrot.lane.b32.xlu0 %v2018_v0, %s1964_s29  ;;  %677 = vrot.lane.b32.xlu1 %v2021_v1, %s1964_s29 }
  0x25   : > { %538 = vrot.lane.b32.xlu0 %v2055_v4, %s1965_s30  ;;  %540 = vrot.lane.b32.xlu1 %v2058_v5, %s1965_s30 }
  0x29   : > { %693 = vrot.lane.b32.xlu0 %v2033_v2, %s1964_s29  ;;  %695 = vrot.lane.b32.xlu1 %v2040_v3, %s1964_s29 }
  0x2d   : > { %555 = vrot.lane.b32.xlu0 %v2069_v6, %s1965_s30  ;;  %557 = vrot.lane.b32.xlu1 %v2072_v7, %s1965_s30 }
  0x31   : > { %710 = vrot.lane.b32.xlu0 %v2018_v0, %s1966_s6  ;;  %712 = vrot.lane.b32.xlu1 %v2021_v1, %s1966_s6 }
  0x35   : > { %572 = vrot.lane.b32.xlu0 %v2055_v4, %s1967_s7  ;;  %574 = vrot.lane.b32.xlu1 %v2058_v5, %s1967_s7 }
  0x39   : > { %367 = vrot.lane.b32.xlu1 %v2058_v5, %s1968_s8  ;;  %365 = vrot.lane.b32.xlu0 %v2055_v4, %s1968_s8 }
  0x3d   : > { %730 = vrot.lane.b32.xlu1 %v2040_v3, %s1966_s6  ;;  %728 = vrot.lane.b32.xlu0 %v2033_v2, %s1966_s6 }
  0x41   : > { %591 = vrot.lane.b32.xlu1 %v2072_v7, %s1967_s7  ;;  %589 = vrot.lane.b32.xlu0 %v2069_v6, %s1967_s7 }
  0x45   : > { %384 = vrot.lane.b32.xlu1 %v2072_v7, %s1968_s8  ;;  %382 = vrot.lane.b32.xlu0 %v2069_v6, %s1968_s8 }
  0x49   : > { %747 = vrot.lane.b32.xlu1 %v2058_v5, %s1962_s24  ;;  %745 = vrot.lane.b32.xlu0 %v2055_v4, %s1962_s24 }
  0x4d   : > { %608 = vrot.lane.b32.xlu1 %v2058_v5, %s1963_s25  ;;  %606 = vrot.lane.b32.xlu0 %v2055_v4, %s1963_s25 }
  0x51   : > { %401 = vrot.lane.b32.xlu1 %v2058_v5, %s1969_s9  ;;  %399 = vrot.lane.b32.xlu0 %v2055_v4, %s1969_s9 }
  0x55   : > { %277 = vrot.lane.b32.xlu1 %v2021_v1, %s1968_s8  ;;  %275 = vrot.lane.b32.xlu0 %v2018_v0, %s1968_s8 }
  0x59   : > { %764 = vrot.lane.b32.xlu1 %v2072_v7, %s1962_s24  ;;  %762 = vrot.lane.b32.xlu0 %v2069_v6, %s1962_s24 }
  0x5d   : > { %625 = vrot.lane.b32.xlu1 %v2072_v7, %s1963_s25  ;;  %623 = vrot.lane.b32.xlu0 %v2069_v6, %s1963_s25 }
  0x61   : > { %418 = vrot.lane.b32.xlu1 %v2072_v7, %s1969_s9  ;;  %416 = vrot.lane.b32.xlu0 %v2069_v6, %s1969_s9 }
  0x65   : > { %295 = vrot.lane.b32.xlu1 %v2040_v3, %s1968_s8  ;;  %293 = vrot.lane.b32.xlu0 %v2033_v2, %s1968_s8 }
  0x69   : > { %1248 = vrot.lane.b32.xlu1 %v1914_v8, %s1965_s30  ;;  %1246 = vrot.lane.b32.xlu0 %v1916_v9, %s1965_s30 }
  0x6d   : > { %435 = vrot.lane.b32.xlu1 %v2021_v1, %s1965_s30  ;;  %433 = vrot.lane.b32.xlu0 %v2018_v0, %s1965_s30 }
  0x71   : > { %312 = vrot.lane.b32.xlu1 %v2021_v1, %s1969_s9  ;;  %310 = vrot.lane.b32.xlu0 %v2018_v0, %s1969_s9 }
  0x75   : > { %1265 = vrot.lane.b32.xlu1 %v1917_v11, %s1965_s30  ;;  %1263 = vrot.lane.b32.xlu0 %v1919_v12, %s1965_s30 }
  0x79   : > { %453 = vrot.lane.b32.xlu1 %v2040_v3, %s1965_s30  ;;  %451 = vrot.lane.b32.xlu0 %v2033_v2, %s1965_s30 }
  0x7d   : > { %330 = vrot.lane.b32.xlu1 %v2040_v3, %s1969_s9  ;;  %328 = vrot.lane.b32.xlu0 %v2033_v2, %s1969_s9 }
  0x81   : > { %1282 = vrot.lane.b32.xlu1 %v1914_v8, %s1967_s7  ;;  %1280 = vrot.lane.b32.xlu0 %v1916_v9, %s1967_s7 }
  0x83   : > { %v641_v13 = vpop.permute.xlu0 %640  ;;  %v504_v14 = vpop.permute.xlu1 %503 }
  0x85   : > { %1160 = vrot.lane.b32.xlu1 %v1914_v8, %s1968_s8  ;;  %1158 = vrot.lane.b32.xlu0 %v1916_v9, %s1968_s8 }
  0x87   : > { %v643_v15 = vpop.permute.xlu0 %642  ;;  %v506_v16 = vpop.permute.xlu1 %505 }
  0x88   : > { %v645_v17 = vsel %vm644_vm0, %v641_v13, %v643_v15  ;;  %v508_v18 = vsel %vm507_vm1, %v504_v14, %v506_v16 }
  0x89   : > { %1809 = vmatprep.subr.bf16.mxu1 %v645_v17  ;;  %470 = vrot.lane.b32.xlu1 %v2021_v1, %s1967_s7 }
  0x8a   : > { %468 = vrot.lane.b32.xlu0 %v2018_v0, %s1967_s7  ;;  %1810 = vmatpush3.bf16.msra.mxu1 %v508_v18  ;;  %v1970_v0 = vmov 0  }
  0x8b   : > { %v659_v19 = vpop.permute.xlu0 %658  ;;  %v661_v20 = vpop.permute.xlu1 %660  ;;  %1901 = vset.pattern.permute.xlu1 %v1970_v0  ;;  %1900 = vset.pattern.permute.xlu0 %v1970_v0 }
  0x8c   : > { %v662_v21 = vsel %vm644_vm0, %v659_v19, %v661_v20 }
  0x8d   : > { %1811 = vmatprep.subr.bf16.mxu1 %v662_v21  ;;  %1299 = vrot.lane.b32.xlu1 %v1917_v11, %s1967_s7  ;;  %v1928_v21 = vld [vmem:[%s2314_s1 + $0x8] ss:$20 sps:$4 sm:$0xff]  }
  0x8e   : > { %1297 = vrot.lane.b32.xlu0 %v1919_v12, %s1967_s7 }
  0x8f   : > { %v522_v23 = vpop.permute.xlu0 %521  ;;  %v524_v24 = vpop.permute.xlu1 %523 }
  0x90   : > { %v525_v25 = vsel %vm507_vm1, %v522_v23, %v524_v24 }
  0x91   : > { %1812 = vmatpush3.bf16.msra.mxu1 %v525_v25  ;;  %1177 = vrot.lane.b32.xlu1 %v1917_v11, %s1968_s8 }
  0x92   : > { %1175 = vrot.lane.b32.xlu0 %v1919_v12, %s1968_s8 }
  0x93   : > { %v676_v26 = vpop.permute.xlu0 %675  ;;  %v678_v27 = vpop.permute.xlu1 %677 }
  0x94   : > { %v680_v28 = vsel %vm679_vm2, %v676_v26, %v678_v27 }
  0x95   : > { %1813 = vmatprep.subr.bf16.mxu1 %v680_v28  ;;  %488 = vrot.lane.b32.xlu1 %v2040_v3, %s1967_s7 }
  0x96   : > { %486 = vrot.lane.b32.xlu0 %v2033_v2, %s1967_s7  ;;  %v886_v2 = vld [vmem:[%s2315_s2 + $0x8] sm:$0xff] }
  0x97   : > { %v539_v31 = vpop.permute.xlu0 %538  ;;  %v541_v32 = vpop.permute.xlu1 %540 }
  0x98   : > { %v542_v33 = vsel %vm437_vm3, %v539_v31, %v541_v32  ;;  %v1931_v31 = vld [vmem:[%s2030_s28] ss:$8 sps:$4 sm:$0xff]  }
  0x99   : > { %1814 = vmatpush3.bf16.msra.mxu1 %v542_v33  ;;  %1316 = vrot.lane.b32.xlu1 %v1920_v29, %s1965_s30 }
  0x9a   : > { %1314 = vrot.lane.b32.xlu0 %v1922_v30, %s1965_s30 }
  0x9b   : > { %v694_v34 = vpop.permute.xlu0 %693  ;;  %v696_v35 = vpop.permute.xlu1 %695 }
  0x9c   : > { %v697_v36 = vsel %vm679_vm2, %v694_v34, %v696_v35 }
  0x9d   : > { %1815 = vmatprep.subr.bf16.mxu1 %v697_v36  ;;  %781 = vrot.lane.b32.xlu1 %v2058_v5, %s1964_s29 }
  0x9e   : > { %779 = vrot.lane.b32.xlu0 %v2055_v4, %s1964_s29 }
  0x9f   : > { %v556_v39 = vpop.permute.xlu0 %555  ;;  %v558_v40 = vpop.permute.xlu1 %557 }
  0xa0   : > { %v559_v41 = vsel %vm437_vm3, %v556_v39, %v558_v40 }
  0xa1   : > { %1816 = vmatpush3.bf16.msra.mxu1 %v559_v41  ;;  %1333 = vrot.lane.b32.xlu1 %v1923_v37, %s1965_s30  ;;  %v1932_v41 = vld [vmem:[%s2030_s28 + $0x10] ss:$8 sps:$4 sm:$0xff]  }
  0xa2   : > { %1331 = vrot.lane.b32.xlu0 %v1925_v38, %s1965_s30  ;;  %s244_s30 = scalar_lea.vmem %s2318_s5, %s1765_s26 }
  0xa3   : > { %v711_v42 = vpop.permute.xlu0 %710  ;;  %v713_v43 = vpop.permute.xlu1 %712 }
  0xa4   : > { %v715_v44 = vsel %vm714_vm4, %v711_v42, %v713_v43 }
  0xa5   : > { %1817 = vmatprep.subr.bf16.mxu1 %v715_v44  ;;  %798 = vrot.lane.b32.xlu1 %v2072_v7, %s1964_s29 }
  0xa6   : > { %796 = vrot.lane.b32.xlu0 %v2069_v6, %s1964_s29 }
  0xa7   : > { %v573_v45 = vpop.permute.xlu0 %572  ;;  %v575_v46 = vpop.permute.xlu1 %574 }
  0xa8   : > { %v576_v47 = vsel %vm472_vm5, %v573_v45, %v575_v46 }
  0xa9   : > { %1818 = vmatpush3.bf16.msra.mxu1 %v576_v47  ;;  %1350 = vrot.lane.b32.xlu1 %v1920_v29, %s1967_s7 }
  0xaa   : > { %1348 = vrot.lane.b32.xlu0 %v1922_v30, %s1967_s7 }
  0xab   : > { %v368_v49 = vpop.permute.xlu1 %367  ;;  %v366_v50 = vpop.permute.xlu0 %365 }
  0xac   : > { %v369_v51 = vsel %vm279_vm6, %v366_v50, %v368_v49 }
  0xad   : > { %1781 = vmatprep.subr.bf16.mxu0 %v369_v51  ;;  %1214 = vrot.lane.b32.xlu1 %v1920_v29, %s1968_s8  ;;  %v1945_v29 = vld [vmem:[%s2314_s1 + $0x30] ss:$20 sps:$4 sm:$0xff]  }
  0xae   : > { %1212 = vrot.lane.b32.xlu0 %v1922_v30, %s1968_s8  ;;  %1782 = vmatpush3.bf16.msra.mxu0 %v1926_v48  ;;  %v1948_v30 = vld [vmem:[%s2317_s4 + $0x4] ss:$8 sps:$4 sm:$0xff]  }
  0xaf   : > { %v731_v52 = vpop.permute.xlu1 %730  ;;  %v729_v53 = vpop.permute.xlu0 %728 }
  0xb0   : > { %v732_v54 = vsel %vm714_vm4, %v729_v53, %v731_v52 }
  0xb1   : > { %1819 = vmatprep.subr.bf16.mxu1 %v732_v54  ;;  %815 = vrot.lane.b32.xlu1 %v2058_v5, %s1966_s6  ;;  %v885_v5 = vld [vmem:[%s2315_s2] sm:$0xff] }
  0xb2   : > { %813 = vrot.lane.b32.xlu0 %v2055_v4, %s1966_s6 }
  0xb3   : > { %v592_v55 = vpop.permute.xlu1 %591  ;;  %v590_v56 = vpop.permute.xlu0 %589 }
  0xb4   : > { %v593_v57 = vsel %vm472_vm5, %v590_v56, %v592_v55 }
  0xb5   : > { %1820 = vmatpush3.bf16.msra.mxu1 %v593_v57  ;;  %1367 = vrot.lane.b32.xlu1 %v1923_v37, %s1967_s7 }
  0xb6   : > { %1365 = vrot.lane.b32.xlu0 %v1925_v38, %s1967_s7 }
  0xb7   : > { %v385_v59 = vpop.permute.xlu1 %384  ;;  %v383_v60 = vpop.permute.xlu0 %382 }
  0xb8   : > { %v386_v61 = vsel %vm279_vm6, %v383_v60, %v385_v59 }
  0xb9   : > { %1231 = vrot.lane.b32.xlu1 %v1923_v37, %s1968_s8  ;;  %1783 = vmatprep.subr.bf16.mxu0 %v386_v61 }
  0xba   : > { %1229 = vrot.lane.b32.xlu0 %v1925_v38, %s1968_s8  ;;  %1784 = vmatpush3.bf16.msra.mxu0 %v1927_v58  ;;  %v1933_v58 = vld [vmem:[%s2015_s23 + $0x20] ss:$8 sps:$4 sm:$0xff]  }
  0xbb   : > { %v748_v62 = vpop.permute.xlu1 %747  ;;  %v746_v63 = vpop.permute.xlu0 %745 }
  0xbc   : > { %v749_v1 = vsel %vm644_vm0, %v746_v63, %v748_v62 }
  0xbd   : > { %1821 = vmatprep.subr.bf16.mxu1 %v749_v1  ;;  %832 = vrot.lane.b32.xlu1 %v2072_v7, %s1966_s6 }
  0xbe   : > { %830 = vrot.lane.b32.xlu0 %v2069_v6, %s1966_s6  ;;  %v887_v6 = vld [vmem:[%s2315_s2 + $0x10] sm:$0xff] }
  0xbf   : > { %v609_v3 = vpop.permute.xlu1 %608  ;;  %v607_v4 = vpop.permute.xlu0 %606 }
  0xc0   : > { %v610_v8 = vsel %vm507_vm1, %v607_v4, %v609_v3  ;;  %v1934_v4 = vld [vmem:[%s2015_s23 + $0x30] ss:$8 sps:$4 sm:$0xff]  }
  0xc1   : > { %1822 = vmatpush3.bf16.msra.mxu1 %v610_v8  ;;  %896 = vperm.xlu1 %1901, %v886_v2  }
  0xc2   : > { %891 = vperm.xlu0 %1900, %v885_v5  }
  0xc3   : > { %v402_v7 = vpop.permute.xlu1 %401  ;;  %v400_v9 = vpop.permute.xlu0 %399 }
  0xc4   : > { %v403_v11 = vsel %vm314_vm7, %v400_v9, %v402_v7  ;;  %v1938_v9 = vld [vmem:[%s2030_s28 + $0x20] ss:$8 sps:$4 sm:$0xff]  }
  0xc5   : > { %1785 = vmatprep.subr.bf16.mxu0 %v403_v11  ;;  %901 = vperm.xlu1 %1901, %v887_v6   ;;  %v1935_v6 = vld [vmem:[%s2314_s1] ss:$20 sps:$4 sm:$0xff]  }
  0xc6   : > { %906 = vperm.xlu0 %1900, %v888_v10   ;;  %v1940_v10 = vld [vmem:[%s2314_s1 + $0x2c] ss:$20 sps:$4 sm:$0xff]  }
  0xc7   : > { %v278_v12 = vpop.permute.xlu1 %277  ;;  %v276_v13 = vpop.permute.xlu0 %275 }
  0xc8   : > { %v280_v14 = vsel %vm279_vm6, %v276_v13, %v278_v12 }
  0xc9   : > { %1786 = vmatpush3.bf16.msra.mxu0 %v280_v14 }
  0xcb   : > { %v765_v15 = vpop.permute.xlu1 %764  ;;  %v763_v16 = vpop.permute.xlu0 %762 }
  0xcc   : > { %v766_v17 = vsel %vm644_vm0, %v763_v16, %v765_v15  ;;  %v1942_v16 = vld [vmem:[%s2314_s1 + $0x28] ss:$20 sps:$4 sm:$0xff]  }
  0xcd   : > { %1823 = vmatprep.subr.bf16.mxu1 %v766_v17 }
  0xcf   : > { %v626_v18 = vpop.permute.xlu1 %625  ;;  %v624_v19 = vpop.permute.xlu0 %623 }
  0xd0   : > { %v627_v20 = vsel %vm507_vm1, %v624_v19, %v626_v18  ;;  %v1939_v18 = vld [vmem:[%s2030_s28 + $0x30] ss:$8 sps:$4 sm:$0xff]  }
  0xd1   : > { %1824 = vmatpush3.bf16.msra.mxu1 %v627_v20  ;;  %v1949_v19 = vld [vmem:[%s2314_s1 + $0x10] ss:$20 sps:$4 sm:$0xff]  }
  0xd3   : > { %v419_v23 = vpop.permute.xlu1 %418  ;;  %v417_v24 = vpop.permute.xlu0 %416 }
  0xd4   : > { %v420_v25 = vsel %vm314_vm7, %v417_v24, %v419_v23  ;;  %1048 = vmatmul.mubr.bf16.vlgmr.msra.gmra.mrb[0].mxu1 %v1928_v21 }
  0xd5   : > { %1787 = vmatprep.subr.bf16.mxu0 %v420_v25  ;;  %1055 = vmatprep.mubr.bf16.mxu1 %v1943_v22 }
  0xd7   : > { %v296_v26 = vpop.permute.xlu1 %295  ;;  %v294_v27 = vpop.permute.xlu0 %293 }
  0xd8   : > { %v297_v28 = vsel %vm279_vm6, %v294_v27, %v296_v26 }
  0xd9   : > { %1788 = vmatpush3.bf16.msra.mxu0 %v297_v28 }
  0xdb   : > { %v1249_v32 = vpop.permute.xlu1 %1248  ;;  %v1247_v33 = vpop.permute.xlu0 %1246 }
  0xdc   : > { %v1250_v34 = vsel %vm437_vm3, %v1247_v33, %v1249_v32  ;;  %1056 = vmatmul.mubr.bf16.gmra.mrb[4].mxu1 %v1945_v29 }
  0xdd   : > { %1843 = vmatprep.subr.bf16.mxu1 %v1250_v34  ;;  %1444 = vmatprep.mubr.bf16.mxu1 %v1948_v30 }
  0xde   : > { %1844 = vmatpush3.bf16.msra.mxu1 %v1931_v31 }
  0xdf   : > { %v436_v35 = vpop.permute.xlu1 %435  ;;  %v434_v36 = vpop.permute.xlu0 %433 }
  0xe0   : > { %v438_v37 = vsel %vm437_vm3, %v434_v36, %v436_v35 }
  0xe1   : > { %1789 = vmatprep.subr.bf16.mxu0 %v438_v37 }
  0xe3   : > { %v313_v38 = vpop.permute.xlu1 %312  ;;  %v311_v39 = vpop.permute.xlu0 %310 }
  0xe4   : > { %v315_v40 = vsel %vm314_vm7, %v311_v39, %v313_v38 }
  0xe5   : > { %1790 = vmatpush3.bf16.msra.mxu0 %v315_v40  ;;  %v1946_v40 = vld [vmem:[%s2317_s4] ss:$8 sps:$4 sm:$0xff]  }
  0xe7   : > { %v1266_v42 = vpop.permute.xlu1 %1265  ;;  %v1264_v43 = vpop.permute.xlu0 %1263 }
  0xe8   : > { %v1267_v44 = vsel %vm437_vm3, %v1264_v43, %v1266_v42 }
  0xe9   : > { %1845 = vmatprep.subr.bf16.mxu1 %v1267_v44 }
  0xea   : > { %1846 = vmatpush3.bf16.msra.mxu1 %v1932_v41  ;;  %v1951_v41 = vld [vmem:[%s2317_s4 + $0x14] ss:$8 sps:$4 sm:$0xff]  }
  0xeb   : > { %v454_v45 = vpop.permute.xlu1 %453  ;;  %v452_v46 = vpop.permute.xlu0 %451 }
  0xec   : > { %v455_v47 = vsel %vm437_vm3, %v452_v46, %v454_v45  ;;  %v1950_v45 = vld [vmem:[%s2314_s1 + $0x38] ss:$20 sps:$4 sm:$0xff]  }
  0xed   : > { %1791 = vmatprep.subr.bf16.mxu0 %v455_v47  ;;  %v1953_v46 = vld [vmem:[%s2317_s4 + $0x10] ss:$8 sps:$4 sm:$0xff]  }
  0xef   : > { %v331_v48 = vpop.permute.xlu1 %330  ;;  %v329_v49 = vpop.permute.xlu0 %328 }
  0xf0   : > { %v332_v50 = vsel %vm314_vm7, %v329_v49, %v331_v48 }
  0xf1   : > { %1792 = vmatpush3.bf16.msra.mxu0 %v332_v50 }
  0xf3   : > { %v1283_v51 = vpop.permute.xlu1 %1282  ;;  %v1281_v52 = vpop.permute.xlu0 %1280 }
  0xf4   : > { %v1284_v53 = vsel %vm472_vm5, %v1281_v52, %v1283_v51 }
  0xf5   : > { %1847 = vmatprep.subr.bf16.mxu1 %v1284_v53 }
  0xf7   : > { %v1161_v54 = vpop.permute.xlu1 %1160  ;;  %v1159_v55 = vpop.permute.xlu0 %1158 }
  0xf8   : > { %v1162_v56 = vsel %vm279_vm6, %v1159_v55, %v1161_v54 }
  0xf9   : > { %1848 = vmatpush3.bf16.msra.mxu1 %v1162_v56 }
  0xfb   : > { %v471_v57 = vpop.permute.xlu1 %470 }
  0xfc   : > { %v469_v59 = vpop.permute.xlu0 %468 }
  0xfd   : > { %v473_v60 = vsel %vm472_vm5, %v469_v59, %v471_v57 }
  0xfe   : > { %1793 = vmatprep.subr.bf16.mxu0 %v473_v60 }
  0xff   : > { %v1300_v61 = vpop.permute.xlu1 %1299  ;;  %1794 = vmatpush3.bf16.msra.mxu0 %v1933_v58 }
 0x100   : > { %v1298_v62 = vpop.permute.xlu0 %1297 }
 0x101   : > { %v1301_v63 = vsel %vm472_vm5, %v1298_v62, %v1300_v61 }
 0x102   : > { %1849 = vmatprep.subr.bf16.mxu1 %v1301_v63 }
 0x103   : > { %v1178_v0 = vpop.permute.xlu1 %1177 }
 0x104   : > { %v1176_v1 = vpop.permute.xlu0 %1175 }
 0x105   : > { %v1179_v2 = vsel %vm279_vm6, %v1176_v1, %v1178_v0 }
 0x106   : > { %1850 = vmatpush3.bf16.msra.mxu1 %v1179_v2 }
 0x107   : > { %v489_v3 = vpop.permute.xlu1 %488 }
 0x108   : > { %v487_v5 = vpop.permute.xlu0 %486 }
 0x109   : > { %v490_v8 = vsel %vm472_vm5, %v487_v5, %v489_v3 }
 0x10a   : > { %1795 = vmatprep.subr.bf16.mxu0 %v490_v8 }
 0x10b   : > { %v1317_v7 = vpop.permute.xlu1 %1316  ;;  %1796 = vmatpush3.bf16.msra.mxu0 %v1934_v4 }
 0x10c   : > { %v1315_v11 = vpop.permute.xlu0 %1314 }
 0x10d   : > { %v1318_v12 = vsel %vm437_vm3, %v1315_v11, %v1317_v7 }
 0x10e   : > { %1851 = vmatprep.subr.bf16.mxu1 %v1318_v12  ;;  %999 = vmatmul.mubr.bf16.vlgmr.msra.gmra.mrb[0].mxu0 %v1935_v6 }
 0x10f   : > { %v782_v13 = vpop.permute.xlu1 %781  ;;  %1852 = vmatpush3.bf16.msra.mxu1 %v1938_v9  ;;  %1006 = vmatprep.mubr.bf16.mxu0 %v1940_v10 }
 0x110   : > { %v780_v14 = vpop.permute.xlu0 %779 }
 0x111   : > { %v783_v15 = vsel %vm679_vm2, %v780_v14, %v782_v13 }
 0x112   : > { %1871 = vmatprep.subr.bf16.mxu0 %v783_v15 }
 0x113   : > { %1872 = vmatpush3.bf16.msra.mxu0 %v783_v15  ;;  %v1334_v17 = vpop.permute.xlu1 %1333 }
 0x114   : > { %v1332_v20 = vpop.permute.xlu0 %1331 }
 0x115   : > { %v1335_v21 = vsel %vm437_vm3, %v1332_v20, %v1334_v17 }
 0x116   : > { %1853 = vmatprep.subr.bf16.mxu1 %v1335_v21  ;;  %1007 = vmatmul.mubr.bf16.gmra.mrb[4].mxu0 %v1942_v16 }
 0x117   : > { %v799_v22 = vpop.permute.xlu1 %798  ;;  %1854 = vmatpush3.bf16.msra.mxu1 %v1939_v18  ;;  %1879 = vmatprep.mubr.msk.bf16.mxu0 %vm959_vm8, %v1949_v19 }
 0x118   : > { %v797_v23 = vpop.permute.xlu0 %796 }
 0x119   : > { %v800_v24 = vsel %vm679_vm2, %v797_v23, %v799_v22 }
 0x11a   : > { %1873 = vmatprep.subr.bf16.mxu0 %v800_v24 }
 0x11b   : > { %1874 = vmatpush3.bf16.msra.mxu0 %v800_v24  ;;  %v1351_v25 = vpop.permute.xlu1 %1350 }
 0x11c   : > { %v1349_v26 = vpop.permute.xlu0 %1348 }
 0x11d   : > { %v1352_v27 = vsel %vm472_vm5, %v1349_v26, %v1351_v25 }
 0x11e   : > { %1855 = vmatprep.subr.bf16.mxu1 %v1352_v27 }
 0x11f   : > { %v1215_v28 = vpop.permute.xlu1 %1214 }
 0x120   : > { %v1213_v29 = vpop.permute.xlu0 %1212 }
 0x121   : > { %v1216_v30 = vsel %vm279_vm6, %v1213_v29, %v1215_v28 }
 0x122   : > { %1856 = vmatpush3.bf16.msra.mxu1 %v1216_v30 }
 0x123   : > { %v816_v31 = vpop.permute.xlu1 %815 }
 0x124   : > { %v814_v32 = vpop.permute.xlu0 %813 }
 0x125   : > { %v817_v33 = vsel %vm714_vm4, %v814_v32, %v816_v31 }
 0x126   : > { %1875 = vmatprep.subr.bf16.mxu0 %v817_v33 }
 0x127   : > { %1876 = vmatpush3.bf16.msra.mxu0 %v817_v33  ;;  %v1368_v34 = vpop.permute.xlu1 %1367 }
 0x128   : > { %v1366_v35 = vpop.permute.xlu0 %1365 }
 0x129   : > { %v1369_v36 = vsel %vm472_vm5, %v1366_v35, %v1368_v34 }
 0x12a   : > { %1857 = vmatprep.subr.bf16.mxu1 %v1369_v36 }
 0x12b   : > { %v1232_v37 = vpop.permute.xlu1 %1231 }
 0x12c   : > { %v1230_v38 = vpop.permute.xlu0 %1229 }
 0x12d   : > { %v1233_v39 = vsel %vm279_vm6, %v1230_v38, %v1232_v37 }
 0x12e   : > { %1858 = vmatpush3.bf16.msra.mxu1 %v1233_v39 }
 0x12f   : > { %v833_v42 = vpop.permute.xlu1 %832 }
 0x130   : > { %v831_v43 = vpop.permute.xlu0 %830 }
 0x131   : > { %1445 = vmatmul.mubr.bf16.vlgmr.msra.gmra.mrb[8].mxu1 %v1946_v40  ;;  %v834_v44 = vsel %vm714_vm4, %v831_v43, %v833_v42 }
 0x132   : > { %1877 = vmatprep.subr.bf16.mxu0 %v834_v44  ;;  %1452 = vmatprep.mubr.bf16.mxu1 %v1951_v41 }
 0x133   : > { %1878 = vmatpush3.bf16.msra.mxu0 %v834_v44 }
 0x136   : > { %1880 = vmatmul.mubr.msk.bf16.vlgmr.msra.gmra.mrb[8].mxu0 %vm959_vm8, %v1950_v45 }
 0x139   : > { %1453 = vmatmul.mubr.bf16.gmra.mrb[12].mxu1 %v1953_v46 }
 0x140   : > { %v897_v1 = vpop.permute.xlu1 %896 }
 0x141   : > { %v892_v61 = vpop.permute.xlu0 %891 }
 0x144   : > { %v902_v9 = vpop.permute.xlu1 %901 }
 0x145   : > { %v907_v13 = vpop.permute.xlu0 %906 }
 0x1a7   : > { %v1825_v47 = vpop.f32.mrb[0].mxu1 }
 0x1a8   : > { %v1826_v48 = vpop.f32.mrb[1].mxu1 }
 0x1a9   : > { %v1827_v49 = vadd.f32 %v1826_v48, %v1825_v47  ;;  %v1828_v50 = vpop.f32.mrb[2].mxu1 }
 0x1aa   : > { %v1829_v51 = vpop.f32.mrb[3].mxu1 }
 0x1ab   : > { %v1830_v52 = vadd.f32 %v1829_v51, %v1828_v50 }
 0x1af   : > { %v1831_v53 = vpop.f32.mrb[4].mxu1 }
 0x1b0   : > { %v1832_v54 = vpop.f32.mrb[5].mxu1 }
 0x1b1   : > { %v1833_v55 = vadd.f32 %v1832_v54, %v1831_v53  ;;  %v1834_v56 = vpop.f32.mrb[6].mxu1 }
 0x1b2   : > { %v1835_v57 = vpop.f32.mrb[7].mxu1 }
 0x1b3   : > { %v1836_v58 = vadd.f32 %v1835_v57, %v1834_v56 }
 0x1e1   : > { %v1797_v59 = vpop.f32.mrb[0].mxu0 }
 0x1e2   : > { %v1798_v60 = vpop.f32.mrb[1].mxu0 }
 0x1e3   : > { %v1799_v62 = vadd.f32 %v1798_v60, %v1797_v59  ;;  %v1800_v63 = vpop.f32.mrb[2].mxu0 }
 0x1e4   : > { %v1801_v0 = vpop.f32.mrb[3].mxu0 }
 0x1e5   : > { %v1802_v2 = vadd.f32 %v1801_v0, %v1800_v63  ;;  %v1001_v3 = vadd.f32 %v1799_v62, %v892_v61 }
 0x1e7   : > { %v1004_v4 = vadd.f32 %v1802_v2, %v897_v1  ;;  %v1050_v5 = vadd.f32 %v1827_v49, %v1001_v3 }
 0x1e9   : > { %v1803_v8 = vpop.f32.mrb[4].mxu0  ;;  %v1053_v6 = vadd.f32 %v1830_v52, %v1004_v4 }
 0x1ea   : > { %v1804_v7 = vpop.f32.mrb[5].mxu0 }
 0x1eb   : > { %v1805_v10 = vadd.f32 %v1804_v7, %v1803_v8  ;;  %v1806_v11 = vpop.f32.mrb[6].mxu0 }
 0x1ec   : > { %v1807_v12 = vpop.f32.mrb[7].mxu0 }
 0x1ed   : > { %v1808_v14 = vadd.f32 %v1807_v12, %v1806_v11  ;;  %v1009_v15 = vadd.f32 %v1805_v10, %v902_v9 }
 0x1ef   : > { %v1012_v16 = vadd.f32 %v1808_v14, %v907_v13  ;;  %v1058_v17 = vadd.f32 %v1833_v55, %v1009_v15 }
 0x1f1   : > { %v1061_v18 = vadd.f32 %v1836_v58, %v1012_v16 }
 0x204   : > { %v1859_v19 = vpop.f32.mrb[8].mxu1 }
 0x205   : > { %v1860_v20 = vpop.f32.mrb[9].mxu1 }
 0x206   : > { %v1861_v21 = vadd.f32 %v1860_v20, %v1859_v19  ;;  %v1862_v22 = vpop.f32.mrb[10].mxu1 }
 0x207   : > { %v1863_v23 = vpop.f32.mrb[11].mxu1 }
 0x208   : > { %v1864_v24 = vadd.f32 %v1863_v23, %v1862_v22 }
 0x209   : > { %v1881_v25 = vpop.f32.mrb[8].mxu0 }
 0x20a   : > { %v1107_v26 = vadd.f32 %v1881_v25, %v1058_v17  ;;  %v1098_v27 = vpop.f32.mrb[9].mxu0 }
 0x20b   : > { %v1099_v28 = vadd.f32 %v1098_v27, %v1050_v5  ;;  %v1882_v29 = vpop.f32.mrb[10].mxu0 }
 0x20c   : > { %vm1115_vm9 = vcmp.ge.f32.partialorder %v1107_v26, 0.0  ;;  %v1119_v30 = vmul.f32 0.2, %v1107_v26  ;;  %v1110_v31 = vadd.f32 %v1882_v29, %v1061_v18  ;;  %v1101_v32 = vpop.f32.mrb[11].mxu0  ;;  %v1865_v33 = vpop.f32.mrb[12].mxu1 }
 0x20d   : > { %vm1113_vm10 = vcmp.ge.f32.partialorder %v1099_v28, 0.0  ;;  %v1117_v34 = vmul.f32 0.2, %v1099_v28  ;;  %v1102_v35 = vadd.f32 %v1101_v32, %v1053_v6  ;;  %v1866_v36 = vpop.f32.mrb[13].mxu1 }
 0x20e   : > { %vm1116_vm11 = vcmp.ge.f32.partialorder %v1110_v31, 0.0  ;;  %v1120_v37 = vmul.f32 0.2, %v1110_v31  ;;  %v1123_v38 = vsel %vm1115_vm9, %v1107_v26, %v1119_v30  ;;  %v1867_v39 = vadd.f32 %v1866_v36, %v1865_v33  ;;  %v1868_v40 = vpop.f32.mrb[14].mxu1 }
 0x20f   : > { %v1121_v41 = vsel %vm1113_vm10, %v1099_v28, %v1117_v34  ;;  %vm1114_vm12 = vcmp.ge.f32.partialorder %v1102_v35, 0.0  ;;  %v1118_v42 = vmul.f32 0.2, %v1102_v35  ;;  %v1127_v43 = vmul.f32 1.4142135, %v1123_v38  ;;  %v1869_v44 = vpop.f32.mrb[15].mxu1 }
 0x210   : > { %v1125_v45 = vmul.f32 1.4142135, %v1121_v41  ;;  %v1124_v46 = vsel %vm1116_vm11, %v1110_v31, %v1120_v37  ;;  %v1870_v47 = vadd.f32 %v1869_v44, %v1868_v40 }
 0x211   : > { %v1122_v48 = vsel %vm1114_vm12, %v1102_v35, %v1118_v42  ;;  %v1463_v49 = vadd.f32 %v1867_v39, %v1127_v43  ;;  %v1128_v50 = vmul.f32 1.4142135, %v1124_v46 }
 0x212   : > { %v1461_v51 = vadd.f32 %v1861_v21, %v1125_v45  ;;  %v1126_v52 = vmul.f32 1.4142135, %v1122_v48 }
 0x213   : > { %v1464_v53 = vadd.f32 %v1870_v47, %v1128_v50  ;;  %v1467_v55 = vmul.f32 0.70710677, %v1463_v49 }
 0x214   : > { %v1462_v54 = vadd.f32 %v1864_v24, %v1126_v52  ;;  %v1465_v57 = vmul.f32 0.70710677, %v1461_v51 }
 0x215   : > { %v1468_v56 = vmul.f32 0.70710677, %v1464_v53 }
 0x216   : > { %v1466_v58 = vmul.f32 0.70710677, %v1462_v54 }
 0x217   : > { %v1778_v59 = vpack.c.bf16 %v1468_v56, %v1467_v55 }
 0x218   : > { %v1773_v60 = vpack.c.bf16 %v1466_v58, %v1465_v57 }
 0x219   : > { %1780 = vst [vmem:[%s244_s30 + $0x8] sm:$0xff] %v1778_v59  }
 0x21a   : > { %1774 = vst [vmem:[%s244_s30] sm:$0xff] %v1773_v60  }
 0x21b PF: > { %s15_s18 = sadd.s32 1, %s1960_s18  }
 0x21c   : > { %p12_p4 = scmp.ge.s32.totalorder %s15_s18, 4  }
 0x21e   :  { %14 = sbr.rel (!%p12_p4) target bundleno = 1 (0x1), region = 79 }

// kernel: encoder_forward.15
= control target key start
LH: loop header
LB: loop body
LE: loop exit
PB: predicated region body
PF: predicated region fallthrough
CT: control target
= control target key end

     0   :  { %s1157_s12 = smov 0   ;;  %s1255_s0 = inlined_call_operand.vmem [shape: bf16[2,1,40,144], index: 0, kind: input, shape index: {}]   ;;  %s1256_s1 = inlined_call_operand.vmem [shape: bf16[32,360], index: 1, kind: input, shape index: {}]   ;;  %s1257_s2 = inlined_call_operand.vmem [shape: f32[32,1], index: 2, kind: input, shape index: {}]   ;;  %s1258_s3 = inlined_call_operand.vmem [shape: bf16[2,32,128], index: 3, kind: output, shape index: {}]  }
   0x1 LB: > { %s952_s13 = sadd.s32 4294967295, %s1126_s12   ;;  %p956_p0 = scmp.ge.s32.totalorder %s1126_s12, 1  ;;  %s1126_s12 = sphi %s1157_s12, %s13_s12  }
   0x2   : > { %p137_p1 = scmp.lt.s32.totalorder %s1126_s12, 3 }
   0x4   : > { %p138_p2 = pnand %p956_p0, %p137_p1 }
   0x5   : > { %p161_p3 = scmp.lt.s32.totalorder (!%p138_p2), %s952_s13, 1  ;;  %s1128_s18 = smov (!%p138_p2), 122   ;;  %v1111_v10 = vld [vmem:[%s1256_s1 + $0x4] ss:$12 sps:$4 sm:$0xff] (!%p138_p2)   ;;  %v1118_v11 = vld [vmem:[%s1256_s1 + $0x8] ss:$12 sps:$4 sm:$0xff] (!%p138_p2)  }
   0x6   : > { %141 = sbr.rel (%p138_p2) target bundleno = 453 (0x1c5), region = 32  ;;  %s1129_s19 = smov (!%p138_p2), 121   ;;  %795 = vmatprep.mubr.bf16.mxu0 (!%p138_p2), %v1111_v10  ;;  %vm752_vm0 = vcmask (!%p138_p2), 850944   ;;  %v563_v12 = vld [vmem:[%s1257_s2] sm:$0xff] (!%p138_p2)  ;;  %v564_v13 = vld [vmem:[%s1257_s2 + $0x8] sm:$0xff] (!%p138_p2)  ;;  %v1136_v14 = vmov (!%p138_p2), 0  }
   0x7   : > { %s1130_s20 = smov (!%p138_p2), 127   ;;  %s1131_s21 = smov (!%p138_p2), 120   ;;  %1064 = vmatprep.mubr.msk.bf16.mxu1 (!%p138_p2), %vm752_vm0, %v1118_v11  ;;  %1087 = vset.pattern.permute.xlu0 (!%p138_p2), %v1136_v14  ;;  %v565_v15 = vld [vmem:[%s1257_s2 + $0x10] sm:$0xff] (!%p138_p2)  ;;  %v566_v16 = vld [vmem:[%s1257_s2 + $0x18] sm:$0xff] (!%p138_p2)  ;;  %vm289_vm1 = vcmask (!%p138_p2), 998400   ;;  %vm330_vm2 = vcmask (!%p138_p2), 990208  }
   0x8   : > { %s1132_s22 = smov (!%p138_p2), 116   ;;  %s1133_s23 = smov (!%p138_p2), 115   ;;  %1088 = vset.pattern.permute.xlu1 (!%p138_p2), %v1136_v14  ;;  %vm207_vm3 = vcmask (!%p138_p2), 1039360   ;;  %vm371_vm4 = vcmask (!%p138_p2), 982016   ;;  %vm412_vm5 = vcmask (!%p138_p2), 949248   ;;  %vm453_vm6 = vcmask (!%p138_p2), 941056  }
   0x9   : > { %s1134_s24 = smov (!%p138_p2), 126   ;;  %s1135_s27 = smov (!%p138_p2), 114   ;;  %vm248_vm7 = vcmask (!%p138_p2), 1031168   ;;  %vm494_vm8 = vcmask (!%p138_p2), 932864   ;;  %vm759_vm9 = vcmask (!%p138_p2), 1043456  }
   0xd   : > { %s1260_s13 = smov (!%p161_p3, %s952_s13), 1 }
   0xe   : > { %s1069_s14 = smul.u32 40, %s1260_s13 }
  0x10   : > { %s165_s17 = scalar_lea.vmem %s1255_s0, %s1069_s14 }
  0x11   : > { %v267_v0 = vld [vmem:[%s165_s17 + $0x18] sm:$0xff]  ;;  %v265_v1 = vld [vmem:[%s165_s17 + $0x8] sm:$0xff]  ;;  %v268_v2 = vld [vmem:[%s165_s17 + $0x20] sm:$0xff] }
  0x12   : > { %280 = vrot.lane.b32.xlu1 %v267_v0, %s1128_s18  ;;  %276 = vrot.lane.b32.xlu0 %v265_v1, %s1128_s18  ;;  %v266_v3 = vld [vmem:[%s165_s17 + $0x10] sm:$0xff]  ;;  %v172_v4 = vld [vmem:[%s165_s17] sm:$0xf] }
  0x13   : > { %v173_v5 = vld [vmem:[%s165_s17 + $0x8] sm:$0xf]  ;;  %v174_v6 = vld [vmem:[%s165_s17 + $0x10] sm:$0xf]  ;;  %177 = vst [vmem:[#allocation2] sm:$0xf] %v172_v4 }
  0x14   : > { %178 = vst [vmem:[#allocation2 + $0x4] sm:$0xf] %v173_v5  ;;  %v175_v7 = vld [vmem:[%s165_s17 + $0x18] sm:$0xf]  ;;  %179 = vst [vmem:[#allocation2 + $0x8] sm:$0xf] %v174_v6 }
  0x15   : > { %v176_v8 = vld [vmem:[%s165_s17 + $0x20] sm:$0xf]  ;;  %180 = vst [vmem:[#allocation2 + $0xc] sm:$0xf] %v175_v7 }
  0x16   : > { %181 = vst [vmem:[#allocation2 + $0x10] sm:$0xf] %v176_v8  ;;  %282 = vrot.lane.b32.xlu1 %v268_v2, %s1128_s18  ;;  %278 = vrot.lane.b32.xlu0 %v266_v3, %s1128_s18  ;;  %v305_v9 = vld [vmem:[%s165_s17] sm:$0xff] }
  0x1a   : > { %317 = vrot.lane.b32.xlu1 %v265_v1, %s1129_s19  ;;  %315 = vrot.lane.b32.xlu0 %v305_v9, %s1129_s19 }
  0x1b   : > { %v1090_v39 = vld [vmem:[#allocation2] sm:$0xff]  }
  0x1c   : > { %v1092_v48 = vld [vmem:[#allocation2 + $0x8] sm:$0xff]  }
  0x1e   : > { %192 = vrot.lane.b32.xlu0 %v305_v9, %s1130_s20  ;;  %319 = vrot.lane.b32.xlu1 %v266_v3, %s1129_s19 }
  0x22   : > { %321 = vrot.lane.b32.xlu0 %v267_v0, %s1129_s19  ;;  %194 = vrot.lane.b32.xlu1 %v265_v1, %s1130_s20 }
  0x26   : > { %196 = vrot.lane.b32.xlu0 %v266_v3, %s1130_s20  ;;  %323 = vrot.lane.b32.xlu1 %v268_v2, %s1129_s19 }
  0x2a   : > { %356 = vrot.lane.b32.xlu0 %v305_v9, %s1131_s21  ;;  %401 = vrot.lane.b32.xlu1 %v266_v3, %s1132_s22 }
  0x2e   : > { %403 = vrot.lane.b32.xlu0 %v267_v0, %s1132_s22  ;;  %198 = vrot.lane.b32.xlu1 %v267_v0, %s1130_s20 }
  0x32   : > { %200 = vrot.lane.b32.xlu0 %v268_v2, %s1130_s20  ;;  %358 = vrot.lane.b32.xlu1 %v265_v1, %s1131_s21 }
  0x36   : > { %360 = vrot.lane.b32.xlu0 %v266_v3, %s1131_s21  ;;  %405 = vrot.lane.b32.xlu1 %v268_v2, %s1132_s22 }
  0x3a   : > { %438 = vrot.lane.b32.xlu0 %v305_v9, %s1133_s23  ;;  %233 = vrot.lane.b32.xlu1 %v305_v9, %s1134_s24 }
  0x3e   : > { %235 = vrot.lane.b32.xlu0 %v265_v1, %s1134_s24  ;;  %362 = vrot.lane.b32.xlu1 %v267_v0, %s1131_s21 }
  0x42   : > { %364 = vrot.lane.b32.xlu0 %v268_v2, %s1131_s21  ;;  %440 = vrot.lane.b32.xlu1 %v265_v1, %s1133_s23  ;;  %s997_s21 = sshll.u32 %s1260_s13, 4 }
  0x46   : > { %442 = vrot.lane.b32.xlu0 %v266_v3, %s1133_s23  ;;  %237 = vrot.lane.b32.xlu1 %v266_v3, %s1134_s24 }
  0x4a   : > { %239 = vrot.lane.b32.xlu0 %v267_v0, %s1134_s24  ;;  %397 = vrot.lane.b32.xlu1 %v305_v9, %s1132_s22 }
  0x4e   : > { %399 = vrot.lane.b32.xlu0 %v265_v1, %s1132_s22  ;;  %444 = vrot.lane.b32.xlu1 %v267_v0, %s1133_s23 }
  0x52   : > { %446 = vrot.lane.b32.xlu0 %v268_v2, %s1133_s23  ;;  %241 = vrot.lane.b32.xlu1 %v268_v2, %s1134_s24  ;;  %s170_s24 = scalar_lea.vmem %s1258_s3, %s997_s21 }
  0x56   : > { %274 = vrot.lane.b32.xlu0 %v305_v9, %s1128_s18  ;;  %479 = vrot.lane.b32.xlu1 %v305_v9, %s1135_s27 }
  0x5a   : > { %481 = vrot.lane.b32.xlu0 %v265_v1, %s1135_s27  ;;  %483 = vrot.lane.b32.xlu1 %v266_v3, %s1135_s27 }
  0x5e   : > { %485 = vrot.lane.b32.xlu0 %v267_v0, %s1135_s27  ;;  %487 = vrot.lane.b32.xlu1 %v268_v2, %s1135_s27 }
  0x62   : > { %569 = vperm.xlu0 %1087, %v563_v12   ;;  %574 = vperm.xlu1 %1088, %v564_v13  }
  0x66   : > { %579 = vperm.xlu1 %1088, %v565_v15   ;;  %584 = vperm.xlu0 %1087, %v566_v16  }
  0x84   : > { %v281_v17 = vpop.permute.xlu1 %280  ;;  %v277_v18 = vpop.permute.xlu0 %276 }
  0x85   : > { %v287_v19 = vrot.slane %v281_v17, 4  ;;  %v285_v20 = vrot.slane %v277_v18, 4 }
  0x87   : > { %v293_v21 = vsel %vm289_vm1, %v281_v17, %v287_v19  ;;  %v291_v22 = vsel %vm289_vm1, %v277_v18, %v285_v20 }
  0x88   : > { %303 = vst [vmem:[#allocation2 + $0x48] sm:$0xf] %v293_v21  ;;  %301 = vst [vmem:[#allocation2 + $0x40] sm:$0xf] %v291_v22  ;;  %v283_v23 = vpop.permute.xlu1 %282  ;;  %v279_v24 = vpop.permute.xlu0 %278 }
  0x89   : > { %v288_v25 = vrot.slane %v283_v23, 4  ;;  %v286_v26 = vrot.slane %v279_v24, 4 }
  0x8b   : > { %v294_v27 = vsel %vm289_vm1, %v283_v23, %v288_v25  ;;  %v292_v28 = vsel %vm289_vm1, %v279_v24, %v286_v26 }
  0x8c   : > { %304 = vst [vmem:[#allocation2 + $0x4c] sm:$0xf] %v294_v27  ;;  %302 = vst [vmem:[#allocation2 + $0x44] sm:$0xf] %v292_v28  ;;  %v318_v29 = vpop.permute.xlu1 %317  ;;  %v316_v30 = vpop.permute.xlu0 %315 }
  0x8d   : > { %v326_v31 = vrot.slane %v318_v29, 4  ;;  %v325_v32 = vrot.slane %v316_v30, 4 }
  0x8f   : > { %v332_v33 = vsel %vm330_vm2, %v318_v29, %v326_v31  ;;  %v331_v34 = vsel %vm330_vm2, %v316_v30, %v325_v32 }
  0x90   : > { %342 = vst [vmem:[#allocation2 + $0x54] sm:$0xf] %v332_v33  ;;  %341 = vst [vmem:[#allocation2 + $0x50] sm:$0xf] %v331_v34  ;;  %v193_v35 = vpop.permute.xlu0 %192  ;;  %v320_v36 = vpop.permute.xlu1 %319 }
  0x91   : > { %v202_v37 = vrot.slane %v193_v35, 4  ;;  %v327_v38 = vrot.slane %v320_v36, 4 }
  0x93   : > { %v208_v40 = vsel %vm207_vm3, %v193_v35, %v202_v37  ;;  %v333_v41 = vsel %vm330_vm2, %v320_v36, %v327_v38  ;;  %v1089_v42 = vld [vmem:[#allocation2 + $0x40] sm:$0xff]   ;;  %v1091_v47 = vld [vmem:[#allocation2 + $0x48] sm:$0xff]  }
  0x94   : > { %218 = vst [vmem:[#allocation2 + $0x14] sm:$0xf] %v208_v40  ;;  %343 = vst [vmem:[#allocation2 + $0x58] sm:$0xf] %v333_v41  ;;  %v322_v43 = vpop.permute.xlu0 %321  ;;  %v195_v44 = vpop.permute.xlu1 %194  ;;  %1013 = vmatprep.subr.bf16.mxu0 %v1089_v42 }
  0x95   : > { %v328_v45 = vrot.slane %v322_v43, 4  ;;  %v203_v46 = vrot.slane %v195_v44, 4  ;;  %1014 = vmatpush3.bf16.msra.mxu0 %v1090_v39 }
  0x96   : > { %1015 = vmatprep.subr.bf16.mxu0 %v1091_v47 }
  0x97   : > { %v334_v49 = vsel %vm330_vm2, %v322_v43, %v328_v45  ;;  %v209_v50 = vsel %vm207_vm3, %v195_v44, %v203_v46  ;;  %v1093_v55 = vld [vmem:[#allocation2 + $0x50] sm:$0xff]  }
  0x98   : > { %344 = vst [vmem:[#allocation2 + $0x5c] sm:$0xf] %v334_v49  ;;  %219 = vst [vmem:[#allocation2 + $0x18] sm:$0xf] %v209_v50  ;;  %v197_v51 = vpop.permute.xlu0 %196  ;;  %v324_v52 = vpop.permute.xlu1 %323 }
  0x99   : > { %v204_v53 = vrot.slane %v197_v51, 4  ;;  %v329_v54 = vrot.slane %v324_v52, 4  ;;  %1016 = vmatpush3.bf16.msra.mxu0 %v1092_v48 }
  0x9a   : > { %1017 = vmatprep.subr.bf16.mxu0 %v1093_v55 }
  0x9b   : > { %v210_v56 = vsel %vm207_vm3, %v197_v51, %v204_v53  ;;  %v335_v57 = vsel %vm330_vm2, %v324_v52, %v329_v54  ;;  %v1094_v58 = vld [vmem:[#allocation2 + $0x10] sm:$0xff]  }
  0x9c   : > { %220 = vst [vmem:[#allocation2 + $0x1c] sm:$0xf] %v210_v56  ;;  %345 = vst [vmem:[#allocation2 + $0x60] sm:$0xf] %v335_v57  ;;  %v357_v59 = vpop.permute.xlu0 %356  ;;  %v402_v60 = vpop.permute.xlu1 %401 }
  0x9d   : > { %v366_v61 = vrot.slane %v357_v59, 4  ;;  %v409_v62 = vrot.slane %v402_v60, 4  ;;  %1018 = vmatpush3.bf16.msra.mxu0 %v1094_v58 }
  0x9f   : > { %v372_v63 = vsel %vm371_vm4, %v357_v59, %v366_v61  ;;  %v415_v0 = vsel %vm412_vm5, %v402_v60, %v409_v62  ;;  %v1095_v1 = vld [vmem:[#allocation2 + $0x58] sm:$0xff]  }
  0xa0   : > { %382 = vst [vmem:[#allocation2 + $0x64] sm:$0xf] %v372_v63  ;;  %425 = vst [vmem:[#allocation2 + $0x80] sm:$0xf] %v415_v0  ;;  %v404_v2 = vpop.permute.xlu0 %403  ;;  %v199_v3 = vpop.permute.xlu1 %198  ;;  %1019 = vmatprep.subr.bf16.mxu0 %v1095_v1 }
  0xa1   : > { %v410_v4 = vrot.slane %v404_v2, 4  ;;  %v205_v5 = vrot.slane %v199_v3, 4 }
  0xa3   : > { %v416_v6 = vsel %vm412_vm5, %v404_v2, %v410_v4  ;;  %v211_v7 = vsel %vm207_vm3, %v199_v3, %v205_v5  ;;  %v1096_v8 = vld [vmem:[#allocation2 + $0x18] sm:$0xff]  }
  0xa4   : > { %426 = vst [vmem:[#allocation2 + $0x84] sm:$0xf] %v416_v6  ;;  %221 = vst [vmem:[#allocation2 + $0x20] sm:$0xf] %v211_v7  ;;  %v201_v9 = vpop.permute.xlu0 %200  ;;  %v359_v10 = vpop.permute.xlu1 %358  ;;  %1020 = vmatpush3.bf16.msra.mxu0 %v1096_v8 }
  0xa5   : > { %v206_v11 = vrot.slane %v201_v9, 4  ;;  %v367_v12 = vrot.slane %v359_v10, 4 }
  0xa7   : > { %v212_v13 = vsel %vm207_vm3, %v201_v9, %v206_v11  ;;  %v373_v14 = vsel %vm371_vm4, %v359_v10, %v367_v12  ;;  %v1097_v15 = vld [vmem:[#allocation2 + $0x60] sm:$0xff]  }
  0xa8   : > { %222 = vst [vmem:[#allocation2 + $0x24] sm:$0xf] %v212_v13  ;;  %383 = vst [vmem:[#allocation2 + $0x68] sm:$0xf] %v373_v14  ;;  %v361_v16 = vpop.permute.xlu0 %360  ;;  %v406_v17 = vpop.permute.xlu1 %405  ;;  %1021 = vmatprep.subr.bf16.mxu0 %v1097_v15 }
  0xa9   : > { %v368_v18 = vrot.slane %v361_v16, 4  ;;  %v411_v19 = vrot.slane %v406_v17, 4 }
  0xab   : > { %v374_v20 = vsel %vm371_vm4, %v361_v16, %v368_v18  ;;  %v417_v21 = vsel %vm412_vm5, %v406_v17, %v411_v19  ;;  %v1098_v22 = vld [vmem:[#allocation2 + $0x80] sm:$0xff]  }
  0xac   : > { %384 = vst [vmem:[#allocation2 + $0x6c] sm:$0xf] %v374_v20  ;;  %427 = vst [vmem:[#allocation2 + $0x88] sm:$0xf] %v417_v21  ;;  %v439_v23 = vpop.permute.xlu0 %438  ;;  %v234_v24 = vpop.permute.xlu1 %233  ;;  %1050 = vmatprep.subr.bf16.mxu1 %v1098_v22 }
  0xad   : > { %v448_v25 = vrot.slane %v439_v23, 4  ;;  %v243_v26 = vrot.slane %v234_v24, 4  ;;  %1051 = vmatpush3.bf16.msra.mxu1 %v1098_v22 }
  0xaf   : > { %v454_v27 = vsel %vm453_vm6, %v439_v23, %v448_v25  ;;  %v249_v28 = vsel %vm248_vm7, %v234_v24, %v243_v26  ;;  %v1099_v29 = vld [vmem:[#allocation2 + $0x20] sm:$0xff]  }
  0xb0   : > { %464 = vst [vmem:[#allocation2 + $0x8c] sm:$0xf] %v454_v27  ;;  %259 = vst [vmem:[#allocation2 + $0x28] sm:$0xf] %v249_v28  ;;  %v236_v30 = vpop.permute.xlu0 %235  ;;  %v363_v31 = vpop.permute.xlu1 %362  ;;  %1022 = vmatpush3.bf16.msra.mxu0 %v1099_v29  ;;  %v1109_v29 = vld [vmem:[%s1256_s1] ss:$12 sps:$4 sm:$0xff]  }
  0xb1   : > { %v244_v32 = vrot.slane %v236_v30, 4  ;;  %v369_v33 = vrot.slane %v363_v31, 4 }
  0xb3   : > { %v250_v34 = vsel %vm248_vm7, %v236_v30, %v244_v32  ;;  %v375_v35 = vsel %vm371_vm4, %v363_v31, %v369_v33  ;;  %v1100_v36 = vld [vmem:[#allocation2 + $0x68] sm:$0xff]  }
  0xb4   : > { %260 = vst [vmem:[#allocation2 + $0x2c] sm:$0xf] %v250_v34  ;;  %385 = vst [vmem:[#allocation2 + $0x70] sm:$0xf] %v375_v35  ;;  %v365_v37 = vpop.permute.xlu0 %364  ;;  %v441_v38 = vpop.permute.xlu1 %440  ;;  %1023 = vmatprep.subr.bf16.mxu0 %v1100_v36  ;;  %v1114_v30 = vld [vmem:[%s1256_s1 + $0x1c] ss:$12 sps:$4 sm:$0xff]  }
  0xb5   : > { %v370_v39 = vrot.slane %v365_v37, 4  ;;  %v449_v40 = vrot.slane %v441_v38, 4  ;;  %v1117_v34 = vld [vmem:[%s1256_s1 + $0x18] ss:$12 sps:$4 sm:$0xff]   ;;  %v1119_v36 = vld [vmem:[%s1256_s1 + $0x20] ss:$12 sps:$4 sm:$0xff]  }
  0xb7   : > { %v376_v41 = vsel %vm371_vm4, %v365_v37, %v370_v39  ;;  %v455_v42 = vsel %vm453_vm6, %v441_v38, %v449_v40  ;;  %v1101_v43 = vld [vmem:[#allocation2 + $0x88] sm:$0xff]  }
  0xb8   : > { %386 = vst [vmem:[#allocation2 + $0x74] sm:$0xf] %v376_v41  ;;  %465 = vst [vmem:[#allocation2 + $0x90] sm:$0xf] %v455_v42  ;;  %v443_v44 = vpop.permute.xlu0 %442  ;;  %v238_v45 = vpop.permute.xlu1 %237  ;;  %1052 = vmatprep.subr.bf16.mxu1 %v1101_v43 }
  0xb9   : > { %v450_v46 = vrot.slane %v443_v44, 4  ;;  %v245_v47 = vrot.slane %v238_v45, 4  ;;  %1053 = vmatpush3.bf16.msra.mxu1 %v1101_v43 }
  0xbb   : > { %v456_v48 = vsel %vm453_vm6, %v443_v44, %v450_v46  ;;  %v251_v49 = vsel %vm248_vm7, %v238_v45, %v245_v47  ;;  %v1102_v50 = vld [vmem:[#allocation2 + $0x28] sm:$0xff]  }
  0xbc   : > { %466 = vst [vmem:[#allocation2 + $0x94] sm:$0xf] %v456_v48  ;;  %261 = vst [vmem:[#allocation2 + $0x30] sm:$0xf] %v251_v49  ;;  %v240_v51 = vpop.permute.xlu0 %239  ;;  %v398_v52 = vpop.permute.xlu1 %397  ;;  %1024 = vmatpush3.bf16.msra.mxu0 %v1102_v50 }
  0xbd   : > { %v246_v53 = vrot.slane %v240_v51, 4  ;;  %v407_v54 = vrot.slane %v398_v52, 4 }
  0xbf   : > { %v252_v55 = vsel %vm248_vm7, %v240_v51, %v246_v53  ;;  %v413_v56 = vsel %vm412_vm5, %v398_v52, %v407_v54  ;;  %v1103_v57 = vld [vmem:[#allocation2 + $0x70] sm:$0xff]  }
  0xc0   : > { %262 = vst [vmem:[#allocation2 + $0x34] sm:$0xf] %v252_v55  ;;  %423 = vst [vmem:[#allocation2 + $0x78] sm:$0xf] %v413_v56  ;;  %v400_v58 = vpop.permute.xlu0 %399  ;;  %v445_v59 = vpop.permute.xlu1 %444  ;;  %1025 = vmatprep.subr.bf16.mxu0 %v1103_v57 }
  0xc1   : > { %v408_v60 = vrot.slane %v400_v58, 4  ;;  %v451_v61 = vrot.slane %v445_v59, 4 }
  0xc3   : > { %v414_v62 = vsel %vm412_vm5, %v400_v58, %v408_v60  ;;  %v457_v63 = vsel %vm453_vm6, %v445_v59, %v451_v61  ;;  %v1104_v0 = vld [vmem:[#allocation2 + $0x90] sm:$0xff]  }
  0xc4   : > { %424 = vst [vmem:[#allocation2 + $0x7c] sm:$0xf] %v414_v62  ;;  %467 = vst [vmem:[#allocation2 + $0x98] sm:$0xf] %v457_v63  ;;  %v447_v1 = vpop.permute.xlu0 %446  ;;  %v242_v2 = vpop.permute.xlu1 %241  ;;  %1054 = vmatprep.subr.bf16.mxu1 %v1104_v0 }
  0xc5   : > { %v452_v3 = vrot.slane %v447_v1, 4  ;;  %v247_v4 = vrot.slane %v242_v2, 4  ;;  %1055 = vmatpush3.bf16.msra.mxu1 %v1104_v0 }
  0xc7   : > { %v458_v5 = vsel %vm453_vm6, %v447_v1, %v452_v3  ;;  %v253_v6 = vsel %vm248_vm7, %v242_v2, %v247_v4  ;;  %v1105_v7 = vld [vmem:[#allocation2 + $0x30] sm:$0xff]  }
  0xc8   : > { %468 = vst [vmem:[#allocation2 + $0x9c] sm:$0xf] %v458_v5  ;;  %263 = vst [vmem:[#allocation2 + $0x38] sm:$0xf] %v253_v6  ;;  %v275_v8 = vpop.permute.xlu0 %274  ;;  %v480_v9 = vpop.permute.xlu1 %479  ;;  %1026 = vmatpush3.bf16.msra.mxu0 %v1105_v7 }
  0xc9   : > { %v284_v10 = vrot.slane %v275_v8, 4  ;;  %v489_v11 = vrot.slane %v480_v9, 4 }
  0xcb   : > { %v290_v12 = vsel %vm289_vm1, %v275_v8, %v284_v10  ;;  %v495_v13 = vsel %vm494_vm8, %v480_v9, %v489_v11  ;;  %v1106_v14 = vld [vmem:[#allocation2 + $0x78] sm:$0xff]  }
  0xcc   : > { %300 = vst [vmem:[#allocation2 + $0x3c] sm:$0xf] %v290_v12  ;;  %505 = vst [vmem:[#allocation2 + $0xa0] sm:$0xf] %v495_v13  ;;  %v482_v15 = vpop.permute.xlu0 %481  ;;  %v484_v16 = vpop.permute.xlu1 %483  ;;  %1027 = vmatprep.subr.bf16.mxu0 %v1106_v14 }
  0xcd   : > { %v490_v17 = vrot.slane %v482_v15, 4  ;;  %v491_v18 = vrot.slane %v484_v16, 4 }
  0xcf   : > { %v496_v19 = vsel %vm494_vm8, %v482_v15, %v490_v17  ;;  %v497_v20 = vsel %vm494_vm8, %v484_v16, %v491_v18  ;;  %v1107_v21 = vld [vmem:[#allocation2 + $0x98] sm:$0xff]  }
  0xd0   : > { %506 = vst [vmem:[#allocation2 + $0xa4] sm:$0xf] %v496_v19  ;;  %507 = vst [vmem:[#allocation2 + $0xa8] sm:$0xf] %v497_v20  ;;  %v486_v22 = vpop.permute.xlu0 %485  ;;  %v488_v23 = vpop.permute.xlu1 %487  ;;  %1056 = vmatprep.subr.bf16.mxu1 %v1107_v21 }
  0xd1   : > { %v492_v24 = vrot.slane %v486_v22, 4  ;;  %v493_v25 = vrot.slane %v488_v23, 4  ;;  %1057 = vmatpush3.bf16.msra.mxu1 %v1107_v21 }
  0xd3   : > { %v498_v26 = vsel %vm494_vm8, %v486_v22, %v492_v24  ;;  %v499_v27 = vsel %vm494_vm8, %v488_v23, %v493_v25  ;;  %v1108_v28 = vld [vmem:[#allocation2 + $0x38] sm:$0xff]  }
  0xd4   : > { %508 = vst [vmem:[#allocation2 + $0xac] sm:$0xf] %v498_v26  ;;  %509 = vst [vmem:[#allocation2 + $0xb0] sm:$0xf] %v499_v27  ;;  %1028 = vmatpush3.bf16.msra.mxu0 %v1108_v28 }
  0xd7   : > { %v1112_v31 = vld [vmem:[#allocation2 + $0xa0] sm:$0xff]   ;;  %796 = vmatmul.mubr.bf16.vlgmr.msra.gmra.mrb[0].mxu0 %v1109_v29 }
  0xd8   : > { %1058 = vmatprep.subr.bf16.mxu1 %v1112_v31  ;;  %803 = vmatprep.mubr.bf16.mxu0 %v1114_v30 }
  0xd9   : > { %1059 = vmatpush3.bf16.msra.mxu1 %v1112_v31 }
  0xdb   : > { %v1113_v32 = vld [vmem:[#allocation2 + $0xa8] sm:$0xff]   ;;  %v1116_v33 = vld [vmem:[#allocation2 + $0xb0] ss:$0 sps:$4 sm:$0xff]  }
  0xdc   : > { %1060 = vmatprep.subr.bf16.mxu1 %v1113_v32  ;;  %v761_v35 = vsel %vm759_vm9, %v1116_v33, 0 }
  0xdd   : > { %1061 = vmatpush3.bf16.msra.mxu1 %v1113_v32 }
  0xde   : > { %1068 = vmatprep.subr.msk.bf16.mxu1 %vm759_vm9, %v1116_v33 }
  0xdf   : > { %804 = vmatmul.mubr.bf16.gmra.mrb[4].mxu0 %v1117_v34 }
  0xe1   : > { %1063 = vmatpush3.bf16.msra.mxu1 %v761_v35  ;;  %v575_v42 = vpop.permute.xlu1 %574  ;;  %v570_v44 = vpop.permute.xlu0 %569 }
  0xe4   : > { %1065 = vmatmul.mubr.msk.bf16.vlgmr.msra.gmra.mrb[0].mxu1 %vm752_vm0, %v1119_v36 }
  0xe5   : > { %v580_v47 = vpop.permute.xlu1 %579  ;;  %v585_v54 = vpop.permute.xlu0 %584 }
 0x1aa   : > { %v1029_v37 = vpop.f32.mrb[0].mxu0 }
 0x1ab   : > { %v1030_v38 = vpop.f32.mrb[1].mxu0 }
 0x1ac   : > { %v1031_v39 = vadd.f32 %v1030_v38, %v1029_v37  ;;  %v1032_v40 = vpop.f32.mrb[2].mxu0 }
 0x1ad   : > { %v1033_v41 = vpop.f32.mrb[3].mxu0 }
 0x1ae   : > { %v1034_v43 = vadd.f32 %v1033_v41, %v1032_v40  ;;  %v798_v53 = vadd.f32 %v1031_v39, %v570_v44 }
 0x1b0   : > { %v801_v59 = vadd.f32 %v1034_v43, %v575_v42 }
 0x1b2   : > { %v1035_v45 = vpop.f32.mrb[4].mxu0 }
 0x1b3   : > { %v1036_v46 = vpop.f32.mrb[5].mxu0 }
 0x1b4   : > { %v1037_v48 = vadd.f32 %v1036_v46, %v1035_v45  ;;  %v1038_v49 = vpop.f32.mrb[6].mxu0 }
 0x1b5   : > { %v1039_v50 = vpop.f32.mrb[7].mxu0 }
 0x1b6   : > { %v806_v51 = vadd.f32 %v1037_v48, %v580_v47  ;;  %v1040_v52 = vadd.f32 %v1039_v50, %v1038_v49 }
 0x1b7   : > { %v1066_v55 = vpop.f32.mrb[0].mxu1 }
 0x1b8   : > { %v855_v56 = vadd.f32 %v1066_v55, %v806_v51  ;;  %v846_v57 = vpop.f32.mrb[1].mxu1  ;;  %v809_v58 = vadd.f32 %v1040_v52, %v585_v54 }
 0x1b9   : > { %v847_v60 = vadd.f32 %v846_v57, %v798_v53  ;;  %v1067_v61 = vpop.f32.mrb[2].mxu1 }
 0x1ba   : > { %vm863_vm10 = vcmp.ge.f32.partialorder %v855_v56, 0.0  ;;  %v867_v62 = vmul.f32 0.2, %v855_v56  ;;  %v858_v63 = vadd.f32 %v1067_v61, %v809_v58  ;;  %v849_v0 = vpop.f32.mrb[3].mxu1 }
 0x1bb   : > { %vm861_vm11 = vcmp.ge.f32.partialorder %v847_v60, 0.0  ;;  %v865_v1 = vmul.f32 0.2, %v847_v60  ;;  %v850_v2 = vadd.f32 %v849_v0, %v801_v59 }
 0x1bc   : > { %v871_v3 = vsel %vm863_vm10, %v855_v56, %v867_v62  ;;  %vm864_vm12 = vcmp.ge.f32.partialorder %v858_v63, 0.0  ;;  %v868_v4 = vmul.f32 0.2, %v858_v63 }
 0x1bd   : > { %v869_v5 = vsel %vm861_vm11, %v847_v60, %v865_v1  ;;  %vm862_vm13 = vcmp.ge.f32.partialorder %v850_v2, 0.0  ;;  %v866_v6 = vmul.f32 0.2, %v850_v2  ;;  %v875_v8 = vmul.f32 1.4142135, %v871_v3 }
 0x1be   : > { %v872_v7 = vsel %vm864_vm12, %v858_v63, %v868_v4  ;;  %v873_v11 = vmul.f32 1.4142135, %v869_v5 }
 0x1bf   : > { %v876_v9 = vmul.f32 1.4142135, %v872_v7  ;;  %v870_v10 = vsel %vm862_vm13, %v850_v2, %v866_v6 }
 0x1c0   : > { %v874_v12 = vmul.f32 1.4142135, %v870_v10 }
 0x1c1   : > { %v1010_v13 = vpack.c.bf16 %v876_v9, %v875_v8 }
 0x1c2   : > { %v1005_v14 = vpack.c.bf16 %v874_v12, %v873_v11 }
 0x1c3   : > { %1012 = vst [vmem:[%s170_s24 + $0x8] sm:$0xff] %v1010_v13  }
 0x1c4   : > { %1006 = vst [vmem:[%s170_s24] sm:$0xff] %v1005_v14  }
 0x1c5 PF: > { %s13_s12 = sadd.s32 1, %s1126_s12  }
 0x1c6   : > { %p10_p4 = scmp.ge.s32.totalorder %s13_s12, 4  }
 0x1c8   :  { %12 = sbr.rel (!%p10_p4) target bundleno = 1 (0x1), region = 62 }

// kernel: encoder_forward.17
= control target key start
LH: loop header
LB: loop body
LE: loop exit
PB: predicated region body
PF: predicated region fallthrough
CT: control target
= control target key end

     0   :  { %v193_v0 = vmov 0.0   ;;  %vm194_vm0 = vmmov 0   ;;  %s248_s1 = inlined_call_operand.vmem [shape: bf16[128,128], index: 1, kind: input, shape index: {}]   ;;  %s249_s0 = inlined_call_operand.vmem [shape: bf16[8,128], index: 0, kind: input, shape index: {}]   ;;  %s250_s2 = inlined_call_operand.vmem [shape: f32[1,128], index: 2, kind: input, shape index: {}]   ;;  %s251_s3 = inlined_call_operand.vmem [shape: f32[8,128], index: 3, kind: output, shape index: {}]  }
   0x1   :  { %163 = vmatprep.subr.bf16.mxu0 %v193_v0  ;;  %v185_v1 = vld [vmem:[%s248_s1] sm:$0xff]   ;;  %179 = vmatprep.mubr.msk.bf16.mxu0 %vm194_vm0, %v193_v0  ;;  %v186_v2 = vld [vmem:[%s248_s1 + $0x8] sm:$0xff]   ;;  %v187_v3 = vld [vmem:[%s248_s1 + $0x10] sm:$0xff]  }
   0x2   :  { %164 = vmatpush3.bf16.msra.mxu0 %v185_v1  ;;  %v188_v4 = vld [vmem:[%s248_s1 + $0x18] sm:$0xff]   ;;  %v189_v5 = vld [vmem:[%s248_s1 + $0x20] sm:$0xff]   ;;  %v190_v6 = vld [vmem:[%s248_s1 + $0x28] sm:$0xff]  }
   0x3   :  { %165 = vmatprep.subr.bf16.mxu0 %v193_v0  ;;  %v191_v7 = vld [vmem:[%s248_s1 + $0x30] sm:$0xff]   ;;  %v192_v8 = vld [vmem:[%s248_s1 + $0x38] sm:$0xff]   ;;  %v21_v9 = vld [vmem:[%s249_s0] sm:$0xf] }
   0x4   :  { %v153_v10 = vld [vmem:[%s250_s2] ss:$0 sm:$0xff] }
   0x6   :  { %166 = vmatpush3.bf16.msra.mxu0 %v186_v2 }
   0x7   :  { %167 = vmatprep.subr.bf16.mxu0 %v193_v0 }
   0xa   :  { %168 = vmatpush3.bf16.msra.mxu0 %v187_v3 }
   0xb   :  { %169 = vmatprep.subr.bf16.mxu0 %v193_v0 }
   0xe   :  { %170 = vmatpush3.bf16.msra.mxu0 %v188_v4 }
   0xf   :  { %171 = vmatprep.subr.bf16.mxu0 %v193_v0 }
  0x12   :  { %172 = vmatpush3.bf16.msra.mxu0 %v189_v5 }
  0x13   :  { %173 = vmatprep.subr.bf16.mxu0 %v193_v0 }
  0x16   :  { %174 = vmatpush3.bf16.msra.mxu0 %v190_v6 }
  0x17   :  { %175 = vmatprep.subr.bf16.mxu0 %v193_v0 }
  0x1a   :  { %176 = vmatpush3.bf16.msra.mxu0 %v191_v7 }
  0x1b   :  { %177 = vmatprep.subr.bf16.mxu0 %v193_v0 }
  0x1e   :  { %178 = vmatpush3.bf16.msra.mxu0 %v192_v8 }
  0x21   :  { %180 = vmatmul.mubr.bf16.vlgmr.msra.gmra.mrb[0].mxu0 %v21_v9 }
  0xf4   :  { %v120_v11 = vpop.f32.mrb[0].mxu0 }
  0xf5   :  { %v139_v12 = vadd.f32 %v153_v10, %v120_v11  ;;  %v181_v13 = vpop.f32.mrb[1].mxu0 }
  0xf6   :  { %v123_v14 = vpop.f32.mrb[2].mxu0 }
  0xf7   :  { %140 = vst [vmem:[%s251_s3] sm:$0xff] %v139_v12  ;;  %v182_v15 = vpop.f32.mrb[3].mxu0 }

// kernel: encoder_forward.16
= control target key start
LH: loop header
LB: loop body
LE: loop exit
PB: predicated region body
PF: predicated region fallthrough
CT: control target
= control target key end

     0   :  { %s641_s1 = inlined_call_operand.vmem [shape: bf16[512,128], index: 1, kind: input, shape index: {}]   ;;  %s642_s0 = inlined_call_operand.vmem [shape: bf16[8,512], index: 0, kind: input, shape index: {}]   ;;  %s643_s2 = inlined_call_operand.vmem [shape: f32[1,128], index: 2, kind: input, shape index: {}]   ;;  %s644_s3 = inlined_call_operand.vmem [shape: f32[8,128], index: 3, kind: output, shape index: {}]  }
   0x1   :  { %v477_v0 = vld [vmem:[%s641_s1 + $0x40] sm:$0xff]   ;;  %v481_v4 = vld [vmem:[%s641_s1 + $0x48] sm:$0xff]   ;;  %v485_v8 = vld [vmem:[%s641_s1 + $0x50] sm:$0xff]  }
   0x2   :  { %v478_v1 = vld [vmem:[%s641_s1 + $0xc0] sm:$0xff]   ;;  %433 = vmatprep.subr.bf16.mxu0 %v477_v0  ;;  %v482_v5 = vld [vmem:[%s641_s1 + $0xc8] sm:$0xff]   ;;  %v486_v9 = vld [vmem:[%s641_s1 + $0xd0] sm:$0xff]  }
   0x3   :  { %v479_v2 = vld [vmem:[%s641_s1] sm:$0xff]   ;;  %455 = vmatprep.subr.bf16.mxu1 %v478_v1  ;;  %v483_v6 = vld [vmem:[%s641_s1 + $0x8] sm:$0xff]   ;;  %v487_v10 = vld [vmem:[%s641_s1 + $0x10] sm:$0xff]  }
   0x4   :  { %v480_v3 = vld [vmem:[%s641_s1 + $0x80] sm:$0xff]   ;;  %434 = vmatpush3.bf16.msra.mxu0 %v479_v2  ;;  %v484_v7 = vld [vmem:[%s641_s1 + $0x88] sm:$0xff]   ;;  %v488_v11 = vld [vmem:[%s641_s1 + $0x90] sm:$0xff]  }
   0x5   :  { %456 = vmatpush3.bf16.msra.mxu1 %v480_v3  ;;  %435 = vmatprep.subr.bf16.mxu0 %v481_v4  ;;  %v489_v12 = vld [vmem:[%s641_s1 + $0x58] sm:$0xff]   ;;  %v493_v16 = vld [vmem:[%s641_s1 + $0x60] sm:$0xff]   ;;  %v497_v20 = vld [vmem:[%s641_s1 + $0x68] sm:$0xff]  }
   0x6   :  { %457 = vmatprep.subr.bf16.mxu1 %v482_v5  ;;  %v490_v13 = vld [vmem:[%s641_s1 + $0xd8] sm:$0xff]   ;;  %v494_v17 = vld [vmem:[%s641_s1 + $0xe0] sm:$0xff]   ;;  %v498_v21 = vld [vmem:[%s641_s1 + $0xe8] sm:$0xff]  }
   0x7   :  { %v491_v14 = vld [vmem:[%s641_s1 + $0x18] sm:$0xff]   ;;  %v495_v18 = vld [vmem:[%s641_s1 + $0x20] sm:$0xff]   ;;  %v499_v22 = vld [vmem:[%s641_s1 + $0x28] sm:$0xff]  }
   0x8   :  { %436 = vmatpush3.bf16.msra.mxu0 %v483_v6  ;;  %v492_v15 = vld [vmem:[%s641_s1 + $0x98] sm:$0xff]   ;;  %v496_v19 = vld [vmem:[%s641_s1 + $0xa0] sm:$0xff]   ;;  %v500_v23 = vld [vmem:[%s641_s1 + $0xa8] sm:$0xff]  }
   0x9   :  { %458 = vmatpush3.bf16.msra.mxu1 %v484_v7  ;;  %437 = vmatprep.subr.bf16.mxu0 %v485_v8  ;;  %v501_v24 = vld [vmem:[%s641_s1 + $0x70] sm:$0xff]   ;;  %v505_v28 = vld [vmem:[%s641_s1 + $0x78] sm:$0xff]   ;;  %v21_v32 = vld [vmem:[%s642_s0] sm:$0xff] }
   0xa   :  { %459 = vmatprep.subr.bf16.mxu1 %v486_v9  ;;  %v502_v25 = vld [vmem:[%s641_s1 + $0xf0] sm:$0xff]   ;;  %v506_v29 = vld [vmem:[%s641_s1 + $0xf8] sm:$0xff]   ;;  %v22_v33 = vld [vmem:[%s642_s0 + $0x8] sm:$0xff]  ;;  %v396_v34 = vcombine.low %v21_v32, %v21_v32  ;;  %v397_v35 = vcombine.high %v21_v32, %v21_v32 }
   0xb   :  { %v503_v26 = vld [vmem:[%s641_s1 + $0x30] sm:$0xff]   ;;  %v507_v30 = vld [vmem:[%s641_s1 + $0x38] sm:$0xff]   ;;  %v398_v36 = vcombine.low %v22_v33, %v22_v33  ;;  %v399_v37 = vcombine.high %v22_v33, %v22_v33  ;;  %v432_v46 = vld [vmem:[%s643_s2] ss:$0 sm:$0xff] }
   0xc   :  { %438 = vmatpush3.bf16.msra.mxu0 %v487_v10  ;;  %v504_v27 = vld [vmem:[%s641_s1 + $0xb0] sm:$0xff]   ;;  %v508_v31 = vld [vmem:[%s641_s1 + $0xb8] sm:$0xff]   ;;  %325 = vmatprep.mubr.bf16.mxu0 %v397_v35 }
   0xd   :  { %460 = vmatpush3.bf16.msra.mxu1 %v488_v11  ;;  %439 = vmatprep.subr.bf16.mxu0 %v489_v12 }
   0xe   :  { %461 = vmatprep.subr.bf16.mxu1 %v490_v13  ;;  %365 = vmatprep.mubr.bf16.mxu1 %v399_v37 }
  0x10   :  { %440 = vmatpush3.bf16.msra.mxu0 %v491_v14 }
  0x11   :  { %462 = vmatpush3.bf16.msra.mxu1 %v492_v15  ;;  %441 = vmatprep.subr.bf16.mxu0 %v493_v16 }
  0x12   :  { %463 = vmatprep.subr.bf16.mxu1 %v494_v17 }
  0x14   :  { %442 = vmatpush3.bf16.msra.mxu0 %v495_v18 }
  0x15   :  { %464 = vmatpush3.bf16.msra.mxu1 %v496_v19  ;;  %443 = vmatprep.subr.bf16.mxu0 %v497_v20 }
  0x16   :  { %465 = vmatprep.subr.bf16.mxu1 %v498_v21 }
  0x18   :  { %444 = vmatpush3.bf16.msra.mxu0 %v499_v22 }
  0x19   :  { %466 = vmatpush3.bf16.msra.mxu1 %v500_v23  ;;  %445 = vmatprep.subr.bf16.mxu0 %v501_v24 }
  0x1a   :  { %467 = vmatprep.subr.bf16.mxu1 %v502_v25 }
  0x1c   :  { %446 = vmatpush3.bf16.msra.mxu0 %v503_v26 }
  0x1d   :  { %468 = vmatpush3.bf16.msra.mxu1 %v504_v27  ;;  %447 = vmatprep.subr.bf16.mxu0 %v505_v28 }
  0x1e   :  { %469 = vmatprep.subr.bf16.mxu1 %v506_v29 }
  0x20   :  { %448 = vmatpush3.bf16.msra.mxu0 %v507_v30 }
  0x21   :  { %470 = vmatpush3.bf16.msra.mxu1 %v508_v31 }
  0x23   :  { %326 = vmatmul.mubr.bf16.vlgmr.msra.gmra.mrb[0].mxu0 %v396_v34 }
  0x24   :  { %366 = vmatmul.mubr.bf16.vlgmr.msra.gmra.mrb[0].mxu1 %v398_v36 }
  0xf6   :  { %v449_v38 = vpop.f32.mrb[0].mxu0 }
  0xf7   :  { %v471_v39 = vpop.f32.mrb[0].mxu1  ;;  %v450_v40 = vpop.f32.mrb[1].mxu0 }
  0xf8   :  { %v472_v41 = vpop.f32.mrb[1].mxu1  ;;  %v451_v42 = vadd.f32 %v450_v40, %v449_v38  ;;  %v452_v44 = vpop.f32.mrb[2].mxu0 }
  0xf9   :  { %v473_v43 = vadd.f32 %v472_v41, %v471_v39  ;;  %v474_v45 = vpop.f32.mrb[2].mxu1  ;;  %v453_v47 = vpop.f32.mrb[3].mxu0 }
  0xfa   :  { %v475_v48 = vpop.f32.mrb[3].mxu1 }
  0xfb   :  { %v368_v49 = vadd.f32 %v473_v43, %v451_v42 }
  0xfd   :  { %v386_v50 = vadd.f32 %v432_v46, %v368_v49 }
  0xff   :  { %vm387_vm0 = vcmp.ge.f32.partialorder %v386_v50, 0.0  ;;  %v388_v51 = vmul.f32 0.2, %v386_v50 }
 0x101   :  { %v389_v52 = vsel %vm387_vm0, %v386_v50, %v388_v51 }
 0x102   :  { %v390_v53 = vmul.f32 1.4142135, %v389_v52 }
 0x104   :  { %391 = vst [vmem:[%s644_s3] sm:$0xff] %v390_v53 }

</bundles_post_ra>
